<compile_context>
chip_gen: v5e
topology: v5e:2x2
jax: 0.10.0
libtpu: 0.0.40
codegen_flags: <defaults>
</compile_context>

<pallas_src>
import functools

import jax
import jax.numpy as jnp
from jax.experimental import pallas as pl
from jax.experimental.pallas import tpu as pltpu

BN_EPS = 1e-5


# ---------------------------------------------------------------------------
# Kernel 1: all SK branches for one batch element.
#   dilated 3x3 grouped conv (single im2col matmul per branch, K = 9*C)
#   + folded conv-bias/BatchNorm2d + ReLU, and the partial GAP sum of
#   feature_U (sum over branches) fused into the epilogue.
# ---------------------------------------------------------------------------
def _branches_conv_kernel(xpad_ref, w_ref, scale_ref, shift_ref,
                          feats_ref, ssum_ref, *, Br, H, W, C, DMAX):
    s_acc = None
    for br in range(Br):
        dil = br + 1
        base = DMAX - dil
        # im2col slab: 9 shifted (H, W, C) windows -> (H*W, 9*C)
        pieces = []
        for ky in range(3):
            for kx in range(3):
                xs = xpad_ref[0,
                              base + ky * dil: base + ky * dil + H,
                              base + kx * dil: base + kx * dil + W, :]
                pieces.append(xs.reshape(H * W, C))
        slab = jnp.concatenate(pieces, axis=1)                       # (H*W, 9C)
        # one MXU matmul with K = 9*C (instead of 9 matmuls with K = C)
        y = jnp.dot(slab, w_ref[br], preferred_element_type=jnp.float32)
        # folded conv-bias + BatchNorm2d (inference), then ReLU
        y = jnp.maximum(y * scale_ref[br] + shift_ref[br], 0.0)      # (H*W, C)
        feats_ref[br, 0] = y.reshape(H, W, C)
        part = jnp.sum(y, axis=0, keepdims=True)                     # (1, C)
        s_acc = part if s_acc is None else s_acc + part
    ssum_ref[0] = s_acc                                              # GAP numerator of U


def branch_convs(xpad, w_im2col, scale2, shift2, *, B, H, W, C, Br, DMAX):
    Hp = H + 2 * DMAX
    Wp = W + 2 * DMAX
    kernel = functools.partial(_branches_conv_kernel,
                               Br=Br, H=H, W=W, C=C, DMAX=DMAX)
    return pl.pallas_call(
        kernel,
        grid=(B,),
        out_shape=(
            jax.ShapeDtypeStruct((Br, B, H, W, C), jnp.float32),     # branch feats
            jax.ShapeDtypeStruct((B, 1, C), jnp.float32),            # GAP sums of U
        ),
        in_specs=[
            pl.BlockSpec((1, Hp, Wp, C), lambda b: (b, 0, 0, 0)),
            pl.BlockSpec((Br, 9 * C, C), lambda b: (0, 0, 0)),
            pl.BlockSpec((Br, 1, C), lambda b: (0, 0, 0)),
            pl.BlockSpec((Br, 1, C), lambda b: (0, 0, 0)),
        ],
        out_specs=(
            pl.BlockSpec((Br, 1, H, W, C), lambda b: (0, b, 0, 0, 0)),
            pl.BlockSpec((1, 1, C), lambda b: (b, 0, 0)),
        ),
        compiler_params=pltpu.CompilerParams(
            dimension_semantics=("parallel",)),
    )(xpad, w_im2col, scale2, shift2)


# ---------------------------------------------------------------------------
# Kernel 2 (tiny): fc(+BN1d+ReLU) -> per-branch fc -> softmax over branches.
# Works on (B, C)/(B, d) only — the spatial reduction already happened in
# kernel 1, so no feature-map traffic here.
# ---------------------------------------------------------------------------
def _attention_kernel(ssum_ref, w1t_ref, scale1_ref, shift1_ref,
                      wfcs_ref, bfcs_ref, att_ref, *, Br, B, C, inv_hw):
    s = ssum_ref[...].reshape(B, C) * inv_hw                         # GAP of U
    z = jnp.dot(s, w1t_ref[...], preferred_element_type=jnp.float32)
    z = jnp.maximum(z * scale1_ref[...] + shift1_ref[...], 0.0)      # fc+BN1d+ReLU
    logits = [jnp.dot(z, wfcs_ref[k], preferred_element_type=jnp.float32)
              + bfcs_ref[k] for k in range(Br)]
    m = logits[0]
    for k in range(1, Br):
        m = jnp.maximum(m, logits[k])
    exps = [jnp.exp(l - m) for l in logits]
    denom = exps[0]
    for k in range(1, Br):
        denom = denom + exps[k]
    inv = 1.0 / denom
    for k in range(Br):
        att_ref[k] = exps[k] * inv                                   # (B, C)


def sk_attention(ssum, w1t, scale1, shift1, wfcs_t, bfcs, *, Br, B, C, d, H, W):
    kernel = functools.partial(_attention_kernel, Br=Br, B=B, C=C,
                               inv_hw=1.0 / float(H * W))
    return pl.pallas_call(
        kernel,
        grid=(1,),
        out_shape=jax.ShapeDtypeStruct((Br, B, C), jnp.float32),
        in_specs=[
            pl.BlockSpec((B, 1, C), lambda i: (0, 0, 0)),
            pl.BlockSpec((C, d), lambda i: (0, 0)),
            pl.BlockSpec((1, d), lambda i: (0, 0)),
            pl.BlockSpec((1, d), lambda i: (0, 0)),
            pl.BlockSpec((Br, d, C), lambda i: (0, 0, 0)),
            pl.BlockSpec((Br, 1, C), lambda i: (0, 0, 0)),
        ],
        out_specs=pl.BlockSpec((Br, B, C), lambda i: (0, 0, 0)),
        compiler_params=pltpu.CompilerParams(
            dimension_semantics=("arbitrary",)),
    )(ssum, w1t, scale1, shift1, wfcs_t, bfcs)


# ---------------------------------------------------------------------------
# Kernel 3: attention-weighted recombination, lane-dense (last dim = W*C),
# tiled over (batch, row-blocks), both axes parallel.
# ---------------------------------------------------------------------------
def _recombine_kernel(feats_ref, att_ref, out_ref, *, Br):
    feats = feats_ref[...]                                           # (Br,1,TH,WC)
    att = att_ref[...]                                               # (Br,1,1,WC)
    acc = feats[0, 0] * att[0, 0]
    for k in range(1, Br):
        acc = acc + feats[k, 0] * att[k, 0]
    out_ref[0] = acc


def recombine(feats_wc, att_wc, *, Br, B, H, WC, TH):
    n_rb = H // TH
    kernel = functools.partial(_recombine_kernel, Br=Br)
    return pl.pallas_call(
        kernel,
        grid=(B, n_rb),
        out_shape=jax.ShapeDtypeStruct((B, H, WC), jnp.float32),
        in_specs=[
            pl.BlockSpec((Br, 1, TH, WC), lambda b, r: (0, b, r, 0)),
            pl.BlockSpec((Br, 1, 1, WC), lambda b, r: (0, b, 0, 0)),
        ],
        out_specs=pl.BlockSpec((1, TH, WC), lambda b, r: (b, r, 0)),
        compiler_params=pltpu.CompilerParams(
            dimension_semantics=("parallel", "parallel")),
    )(feats_wc, att_wc)


# ---------------------------------------------------------------------------
# Parameter construction (deterministic, synthetic) + folding for the kernels
# ---------------------------------------------------------------------------
def init_skconv_params(key, in_channels, branches, groups, down_ratio,
                       min_dim=32):
    C = in_channels
    Cg = C // groups
    d = max(int(C / down_ratio), min_dim)
    kit = iter(jax.random.split(key, 64))
    nxt = lambda: next(kit)  # noqa: E731
    nrm = lambda shp, s=0.1: s * jax.random.normal(nxt(), shp, jnp.float32)  # noqa: E731

    raw = dict(
        conv_w=[nrm((C, Cg, 3, 3)) for _ in range(branches)],
        conv_b=[nrm((C,)) for _ in range(branches)],
        bn2_g=[1.0 + nrm((C,), 0.05) for _ in range(branches)],
        bn2_b=[nrm((C,), 0.05) for _ in range(branches)],
        bn2_rm=[nrm((C,), 0.05) for _ in range(branches)],
        bn2_rv=[0.5 + jnp.abs(nrm((C,), 0.5)) for _ in range(branches)],
        fc_w=nrm((d, C)), fc_b=nrm((d,)),
        bn1_g=1.0 + nrm((d,), 0.05), bn1_b=nrm((d,), 0.05),
        bn1_rm=nrm((d,), 0.05), bn1_rv=0.5 + jnp.abs(nrm((d,), 0.5)),
        fcs_w=[nrm((C, d)) for _ in range(branches)],
        fcs_b=[nrm((C,)) for _ in range(branches)],
    )

    # grouped [C, Cg, 3, 3] -> block-diagonal dense [C, C, 3, 3]
    # (kept dense: Cg = C/groups is far below the 128-lane MXU width here)
    def to_dense(wg):
        dense = jnp.zeros((C, C, 3, 3), jnp.float32)
        for g in range(groups):
            dense = dense.at[g * Cg:(g + 1) * Cg, g * Cg:(g + 1) * Cg, :, :].set(
                wg[g * Cg:(g + 1) * Cg])
        return dense

    w_im2col, scale2, shift2 = [], [], []
    for i in range(branches):
        dense = to_dense(raw['conv_w'][i])                        # [Cout,Cin,3,3]
        # tap-major im2col weight: rows = (ky*3+kx)*C + cin, cols = cout
        wt = jnp.transpose(dense, (2, 3, 1, 0)).reshape(9 * C, C)
        sc = raw['bn2_g'][i] / jnp.sqrt(raw['bn2_rv'][i] + BN_EPS)
        sh = raw['bn2_b'][i] + (raw['conv_b'][i] - raw['bn2_rm'][i]) * sc
        w_im2col.append(wt)
        scale2.append(sc.reshape(1, C))
        shift2.append(sh.reshape(1, C))

    sc1 = raw['bn1_g'] / jnp.sqrt(raw['bn1_rv'] + BN_EPS)
    sh1 = raw['bn1_b'] + (raw['fc_b'] - raw['bn1_rm']) * sc1

    params = dict(
        branches=branches, C=C, d=d,
        w_im2col=jnp.stack(w_im2col, axis=0),                     # [Br, 9C, C]
        scale2=jnp.stack(scale2, axis=0),                         # [Br, 1, C]
        shift2=jnp.stack(shift2, axis=0),                         # [Br, 1, C]
        w1t=raw['fc_w'].T,                                        # [C, d]
        scale1=sc1.reshape(1, d), shift1=sh1.reshape(1, d),
        wfcs_t=jnp.stack([w.T for w in raw['fcs_w']], axis=0),    # [Br, d, C]
        bfcs=jnp.stack([b.reshape(1, C) for b in raw['fcs_b']], axis=0),
    )
    return params, raw


# ---------------------------------------------------------------------------
# Forward pass (Pallas) and a plain-JAX reference for verification
# ---------------------------------------------------------------------------
def skconv_forward(x_nchw, params):
    Br, C, d = params['branches'], params['C'], params['d']
    B, _, H, W = x_nchw.shape
    DMAX = Br                                                     # max dilation

    x = jnp.transpose(x_nchw, (0, 2, 3, 1)).astype(jnp.float32)   # NCHW -> NHWC
    xpad = jnp.pad(x, ((0, 0), (DMAX, DMAX), (DMAX, DMAX), (0, 0)))

    feats, ssum = branch_convs(xpad, params['w_im2col'], params['scale2'],
                               params['shift2'],
                               B=B, H=H, W=W, C=C, Br=Br, DMAX=DMAX)
    att = sk_attention(ssum, params['w1t'], params['scale1'], params['shift1'],
                       params['wfcs_t'], params['bfcs'],
                       Br=Br, B=B, C=C, d=d, H=H, W=W)            # [Br, B, C]

    # lane-dense recombination: last dim = W*C (multiple of 128)
    WC = W * C
    feats_wc = feats.reshape(Br, B, H, WC)                        # free reshape
    att_wc = jnp.tile(att[:, :, None, :], (1, 1, W, 1)).reshape(Br, B, 1, WC)
    TH = 8 if H % 8 == 0 else H
    out = recombine(feats_wc, att_wc, Br=Br, B=B, H=H, WC=WC, TH=TH)
    out = out.reshape(B, H, W, C)
    return jnp.transpose(out, (0, 3, 1, 2))                       # NHWC -> NCHW


def skconv_reference(x, raw, branches, groups):
    feats = []
    for i in range(branches):
        dil = 1 + i
        y = jax.lax.conv_general_dilated(
            x, raw['conv_w'][i], window_strides=(1, 1),
            padding=[(dil, dil), (dil, dil)], rhs_dilation=(dil, dil),
            dimension_numbers=('NCHW', 'OIHW', 'NCHW'),
            feature_group_count=groups)
        y = y + raw['conv_b'][i][None, :, None, None]
        g, b = raw['bn2_g'][i], raw['bn2_b'][i]
        rm, rv = raw['bn2_rm'][i], raw['bn2_rv'][i]
        y = ((y - rm[None, :, None, None]) /
             jnp.sqrt(rv[None, :, None, None] + BN_EPS)) * g[None, :, None, None] \
            + b[None, :, None, None]
        feats.append(jnp.maximum(y, 0.0))
    feats = jnp.stack(feats, axis=1)                              # [B, Br, C, H, W]
    U = jnp.sum(feats, axis=1)
    s = jnp.mean(U, axis=(2, 3))                                  # [B, C]
    z = s @ raw['fc_w'].T + raw['fc_b']
    z = (z - raw['bn1_rm']) / jnp.sqrt(raw['bn1_rv'] + BN_EPS) * raw['bn1_g'] \
        + raw['bn1_b']
    z = jnp.maximum(z, 0.0)
    logits = jnp.stack([z @ raw['fcs_w'][i].T + raw['fcs_b'][i]
                        for i in range(branches)], axis=1)        # [B, Br, C]
    att = jax.nn.softmax(logits, axis=1)
    return jnp.sum(feats * att[..., None, None], axis=1)


# ---------------------------------------------------------------------------
if __name__ == "__main__":
    # SKConv(in_channels=32, branches=2, groups=2, down_ratio=2) -> d = 32
    B, C, H, W = 2, 32, 16, 16
    branches, groups, down_ratio = 2, 2, 2

    key = jax.random.PRNGKey(0)
    kx, kp = jax.random.split(key)
    x = jax.random.normal(kx, (B, C, H, W), jnp.float32)

    params, raw = init_skconv_params(kp, C, branches, groups, down_ratio)

    out = skconv_forward(x, params)
    jax.block_until_ready(out)

    ref = skconv_reference(x, raw, branches, groups)
    assert out.shape == ref.shape == (B, C, H, W)
    err = float(jnp.max(jnp.abs(out - ref)))
    if err < 1e-2:
        print("KERNEL_OK")
    else:
        print(f"MISMATCH max_abs_err={err}")
</pallas_src>

<mosaic_0001>
module attributes {stable_mosaic.version = 11 : i64} {
  func.func @_branches_conv_kernel(%arg0: i32, %arg1: memref<1x20x20x32xf32, #tpu.memory_space<vmem>>, %arg2: memref<2x288x32xf32, #tpu.memory_space<vmem>>, %arg3: memref<2x1x32xf32, #tpu.memory_space<vmem>>, %arg4: memref<2x1x32xf32, #tpu.memory_space<vmem>>, %arg5: memref<2x1x16x16x32xf32, #tpu.memory_space<vmem>>, %arg6: memref<1x1x32xf32, #tpu.memory_space<vmem>>) attributes {dimension_semantics = [#tpu.dimension_semantics<parallel>], iteration_bounds = array<i64: 2>, scalar_prefetch = 0 : i64, scratch_operands = 0 : i64, tpu.core_type = #tpu.core_type<tc>, window_params = [{transform_indices = @transform_0, window_bounds = array<i64: 1, 20, 20, 32>}, {pipeline_mode = #tpu.pipeline_mode<synchronous>, transform_indices = @transform_1, window_bounds = array<i64: 2, 288, 32>}, {pipeline_mode = #tpu.pipeline_mode<synchronous>, transform_indices = @transform_2, window_bounds = array<i64: 2, 1, 32>}, {pipeline_mode = #tpu.pipeline_mode<synchronous>, transform_indices = @transform_3, window_bounds = array<i64: 2, 1, 32>}, {transform_indices = @transform_4, window_bounds = array<i64: 2, 1, 16, 16, 32>}, {transform_indices = @transform_5, window_bounds = array<i64: 1, 1, 32>}]} {
    %c0 = arith.constant 0 : index
    %c1 = arith.constant 1 : index
    %c1_0 = arith.constant 1 : index
    %c0_1 = arith.constant 0 : index
    %0 = vector.load %arg1[%c0, %c1, %c1_0, %c0_1] : memref<1x20x20x32xf32, #tpu.memory_space<vmem>>, vector<1x16x16x32xf32>
    %1 = vector.shape_cast %0 : vector<1x16x16x32xf32> to vector<16x16x32xf32>
    %2 = vector.shape_cast %1 : vector<16x16x32xf32> to vector<256x32xf32>
    %c0_2 = arith.constant 0 : index
    %c1_3 = arith.constant 1 : index
    %c2 = arith.constant 2 : index
    %c0_4 = arith.constant 0 : index
    %3 = vector.load %arg1[%c0_2, %c1_3, %c2, %c0_4] : memref<1x20x20x32xf32, #tpu.memory_space<vmem>>, vector<1x16x16x32xf32>
    %4 = vector.shape_cast %3 : vector<1x16x16x32xf32> to vector<16x16x32xf32>
    %5 = vector.shape_cast %4 : vector<16x16x32xf32> to vector<256x32xf32>
    %c0_5 = arith.constant 0 : index
    %c1_6 = arith.constant 1 : index
    %c3 = arith.constant 3 : index
    %c0_7 = arith.constant 0 : index
    %6 = vector.load %arg1[%c0_5, %c1_6, %c3, %c0_7] : memref<1x20x20x32xf32, #tpu.memory_space<vmem>>, vector<1x16x16x32xf32>
    %7 = vector.shape_cast %6 : vector<1x16x16x32xf32> to vector<16x16x32xf32>
    %8 = vector.shape_cast %7 : vector<16x16x32xf32> to vector<256x32xf32>
    %c0_8 = arith.constant 0 : index
    %c2_9 = arith.constant 2 : index
    %c1_10 = arith.constant 1 : index
    %c0_11 = arith.constant 0 : index
    %9 = vector.load %arg1[%c0_8, %c2_9, %c1_10, %c0_11] : memref<1x20x20x32xf32, #tpu.memory_space<vmem>>, vector<1x16x16x32xf32>
    %10 = vector.shape_cast %9 : vector<1x16x16x32xf32> to vector<16x16x32xf32>
    %11 = vector.shape_cast %10 : vector<16x16x32xf32> to vector<256x32xf32>
    %c0_12 = arith.constant 0 : index
    %c2_13 = arith.constant 2 : index
    %c2_14 = arith.constant 2 : index
    %c0_15 = arith.constant 0 : index
    %12 = vector.load %arg1[%c0_12, %c2_13, %c2_14, %c0_15] : memref<1x20x20x32xf32, #tpu.memory_space<vmem>>, vector<1x16x16x32xf32>
    %13 = vector.shape_cast %12 : vector<1x16x16x32xf32> to vector<16x16x32xf32>
    %14 = vector.shape_cast %13 : vector<16x16x32xf32> to vector<256x32xf32>
    %c0_16 = arith.constant 0 : index
    %c2_17 = arith.constant 2 : index
    %c3_18 = arith.constant 3 : index
    %c0_19 = arith.constant 0 : index
    %15 = vector.load %arg1[%c0_16, %c2_17, %c3_18, %c0_19] : memref<1x20x20x32xf32, #tpu.memory_space<vmem>>, vector<1x16x16x32xf32>
    %16 = vector.shape_cast %15 : vector<1x16x16x32xf32> to vector<16x16x32xf32>
    %17 = vector.shape_cast %16 : vector<16x16x32xf32> to vector<256x32xf32>
    %c0_20 = arith.constant 0 : index
    %c3_21 = arith.constant 3 : index
    %c1_22 = arith.constant 1 : index
    %c0_23 = arith.constant 0 : index
    %18 = vector.load %arg1[%c0_20, %c3_21, %c1_22, %c0_23] : memref<1x20x20x32xf32, #tpu.memory_space<vmem>>, vector<1x16x16x32xf32>
    %19 = vector.shape_cast %18 : vector<1x16x16x32xf32> to vector<16x16x32xf32>
    %20 = vector.shape_cast %19 : vector<16x16x32xf32> to vector<256x32xf32>
    %c0_24 = arith.constant 0 : index
    %c3_25 = arith.constant 3 : index
    %c2_26 = arith.constant 2 : index
    %c0_27 = arith.constant 0 : index
    %21 = vector.load %arg1[%c0_24, %c3_25, %c2_26, %c0_27] : memref<1x20x20x32xf32, #tpu.memory_space<vmem>>, vector<1x16x16x32xf32>
    %22 = vector.shape_cast %21 : vector<1x16x16x32xf32> to vector<16x16x32xf32>
    %23 = vector.shape_cast %22 : vector<16x16x32xf32> to vector<256x32xf32>
    %c0_28 = arith.constant 0 : index
    %c3_29 = arith.constant 3 : index
    %c3_30 = arith.constant 3 : index
    %c0_31 = arith.constant 0 : index
    %24 = vector.load %arg1[%c0_28, %c3_29, %c3_30, %c0_31] : memref<1x20x20x32xf32, #tpu.memory_space<vmem>>, vector<1x16x16x32xf32>
    %25 = vector.shape_cast %24 : vector<1x16x16x32xf32> to vector<16x16x32xf32>
    %26 = vector.shape_cast %25 : vector<16x16x32xf32> to vector<256x32xf32>
    %27 = tpu.concatenate %2, %5, %8, %11, %14, %17, %20, %23, %26 in 1 : vector<256x32xf32>, vector<256x32xf32>, vector<256x32xf32>, vector<256x32xf32>, vector<256x32xf32>, vector<256x32xf32>, vector<256x32xf32>, vector<256x32xf32>, vector<256x32xf32> -> vector<256x288xf32>
    %c0_32 = arith.constant 0 : index
    %c0_33 = arith.constant 0 : index
    %c0_34 = arith.constant 0 : index
    %28 = vector.load %arg2[%c0_32, %c0_33, %c0_34] : memref<2x288x32xf32, #tpu.memory_space<vmem>>, vector<1x288x32xf32>
    %29 = vector.shape_cast %28 : vector<1x288x32xf32> to vector<288x32xf32>
    %cst = arith.constant dense<0.000000e+00> : vector<256x32xf32>
    %30 = tpu.matmul %27, %29, %cst {dimension_numbers = #tpu.dot_dimension_numbers<[1], [0], [0], [1], [0, 0, 1, 1], [], []>} : vector<256x288xf32>, vector<288x32xf32>, vector<256x32xf32> -> vector<256x32xf32>
    %c0_35 = arith.constant 0 : index
    %c0_36 = arith.constant 0 : index
    %c0_37 = arith.constant 0 : index
    %31 = vector.load %arg3[%c0_35, %c0_36, %c0_37] : memref<2x1x32xf32, #tpu.memory_space<vmem>>, vector<1x1x32xf32>
    %32 = vector.shape_cast %31 : vector<1x1x32xf32> to vector<1x32xf32>
    %33 = vector.broadcast %32 : vector<1x32xf32> to vector<256x32xf32>
    %34 = arith.mulf %30, %33 : vector<256x32xf32>
    %c0_38 = arith.constant 0 : index
    %c0_39 = arith.constant 0 : index
    %c0_40 = arith.constant 0 : index
    %35 = vector.load %arg4[%c0_38, %c0_39, %c0_40] : memref<2x1x32xf32, #tpu.memory_space<vmem>>, vector<1x1x32xf32>
    %36 = vector.shape_cast %35 : vector<1x1x32xf32> to vector<1x32xf32>
    %37 = vector.broadcast %36 : vector<1x32xf32> to vector<256x32xf32>
    %38 = arith.addf %34, %37 : vector<256x32xf32>
    %cst_41 = arith.constant 0.000000e+00 : f32
    %39 = vector.broadcast %cst_41 : f32 to vector<256x32xf32>
    %40 = arith.maximumf %38, %39 : vector<256x32xf32>
    %41 = vector.shape_cast %40 : vector<256x32xf32> to vector<16x16x32xf32>
    %c0_42 = arith.constant 0 : index
    %c0_43 = arith.constant 0 : index
    %c0_44 = arith.constant 0 : index
    %c0_45 = arith.constant 0 : index
    %c0_46 = arith.constant 0 : index
    %42 = vector.load %arg5[%c0_42, %c0_43, %c0_44, %c0_45, %c0_46] : memref<2x1x16x16x32xf32, #tpu.memory_space<vmem>>, vector<1x1x16x16x32xf32>
    %43 = vector.shape_cast %42 : vector<1x1x16x16x32xf32> to vector<16x16x32xf32>
    %44 = vector.shape_cast %41 : vector<16x16x32xf32> to vector<1x1x16x16x32xf32>
    tpu.vector_store %arg5[%c0_42, %c0_43, %c0_44, %c0_45, %c0_46], %44 {strides = array<i32>} : memref<2x1x16x16x32xf32, #tpu.memory_space<vmem>>, vector<1x1x16x16x32xf32>,
    %cst_47 = arith.constant dense<0.000000e+00> : vector<32xf32>
    %45 = vector.multi_reduction <add>, %40, %cst_47 [0] : vector<256x32xf32> to vector<32xf32>
    %46 = vector.shape_cast %45 : vector<32xf32> to vector<1x32xf32>
    %c0_48 = arith.constant 0 : index
    %c0_49 = arith.constant 0 : index
    %c0_50 = arith.constant 0 : index
    %c0_51 = arith.constant 0 : index
    %47 = vector.load %arg1[%c0_48, %c0_49, %c0_50, %c0_51] : memref<1x20x20x32xf32, #tpu.memory_space<vmem>>, vector<1x16x16x32xf32>
    %48 = vector.shape_cast %47 : vector<1x16x16x32xf32> to vector<16x16x32xf32>
    %49 = vector.shape_cast %48 : vector<16x16x32xf32> to vector<256x32xf32>
    %c0_52 = arith.constant 0 : index
    %c0_53 = arith.constant 0 : index
    %c2_54 = arith.constant 2 : index
    %c0_55 = arith.constant 0 : index
    %50 = vector.load %arg1[%c0_52, %c0_53, %c2_54, %c0_55] : memref<1x20x20x32xf32, #tpu.memory_space<vmem>>, vector<1x16x16x32xf32>
    %51 = vector.shape_cast %50 : vector<1x16x16x32xf32> to vector<16x16x32xf32>
    %52 = vector.shape_cast %51 : vector<16x16x32xf32> to vector<256x32xf32>
    %c0_56 = arith.constant 0 : index
    %c0_57 = arith.constant 0 : index
    %c4 = arith.constant 4 : index
    %c0_58 = arith.constant 0 : index
    %53 = vector.load %arg1[%c0_56, %c0_57, %c4, %c0_58] : memref<1x20x20x32xf32, #tpu.memory_space<vmem>>, vector<1x16x16x32xf32>
    %54 = vector.shape_cast %53 : vector<1x16x16x32xf32> to vector<16x16x32xf32>
    %55 = vector.shape_cast %54 : vector<16x16x32xf32> to vector<256x32xf32>
    %c0_59 = arith.constant 0 : index
    %c2_60 = arith.constant 2 : index
    %c0_61 = arith.constant 0 : index
    %c0_62 = arith.constant 0 : index
    %56 = vector.load %arg1[%c0_59, %c2_60, %c0_61, %c0_62] : memref<1x20x20x32xf32, #tpu.memory_space<vmem>>, vector<1x16x16x32xf32>
    %57 = vector.shape_cast %56 : vector<1x16x16x32xf32> to vector<16x16x32xf32>
    %58 = vector.shape_cast %57 : vector<16x16x32xf32> to vector<256x32xf32>
    %c0_63 = arith.constant 0 : index
    %c2_64 = arith.constant 2 : index
    %c2_65 = arith.constant 2 : index
    %c0_66 = arith.constant 0 : index
    %59 = vector.load %arg1[%c0_63, %c2_64, %c2_65, %c0_66] : memref<1x20x20x32xf32, #tpu.memory_space<vmem>>, vector<1x16x16x32xf32>
    %60 = vector.shape_cast %59 : vector<1x16x16x32xf32> to vector<16x16x32xf32>
    %61 = vector.shape_cast %60 : vector<16x16x32xf32> to vector<256x32xf32>
    %c0_67 = arith.constant 0 : index
    %c2_68 = arith.constant 2 : index
    %c4_69 = arith.constant 4 : index
    %c0_70 = arith.constant 0 : index
    %62 = vector.load %arg1[%c0_67, %c2_68, %c4_69, %c0_70] : memref<1x20x20x32xf32, #tpu.memory_space<vmem>>, vector<1x16x16x32xf32>
    %63 = vector.shape_cast %62 : vector<1x16x16x32xf32> to vector<16x16x32xf32>
    %64 = vector.shape_cast %63 : vector<16x16x32xf32> to vector<256x32xf32>
    %c0_71 = arith.constant 0 : index
    %c4_72 = arith.constant 4 : index
    %c0_73 = arith.constant 0 : index
    %c0_74 = arith.constant 0 : index
    %65 = vector.load %arg1[%c0_71, %c4_72, %c0_73, %c0_74] : memref<1x20x20x32xf32, #tpu.memory_space<vmem>>, vector<1x16x16x32xf32>
    %66 = vector.shape_cast %65 : vector<1x16x16x32xf32> to vector<16x16x32xf32>
    %67 = vector.shape_cast %66 : vector<16x16x32xf32> to vector<256x32xf32>
    %c0_75 = arith.constant 0 : index
    %c4_76 = arith.constant 4 : index
    %c2_77 = arith.constant 2 : index
    %c0_78 = arith.constant 0 : index
    %68 = vector.load %arg1[%c0_75, %c4_76, %c2_77, %c0_78] : memref<1x20x20x32xf32, #tpu.memory_space<vmem>>, vector<1x16x16x32xf32>
    %69 = vector.shape_cast %68 : vector<1x16x16x32xf32> to vector<16x16x32xf32>
    %70 = vector.shape_cast %69 : vector<16x16x32xf32> to vector<256x32xf32>
    %c0_79 = arith.constant 0 : index
    %c4_80 = arith.constant 4 : index
    %c4_81 = arith.constant 4 : index
    %c0_82 = arith.constant 0 : index
    %71 = vector.load %arg1[%c0_79, %c4_80, %c4_81, %c0_82] : memref<1x20x20x32xf32, #tpu.memory_space<vmem>>, vector<1x16x16x32xf32>
    %72 = vector.shape_cast %71 : vector<1x16x16x32xf32> to vector<16x16x32xf32>
    %73 = vector.shape_cast %72 : vector<16x16x32xf32> to vector<256x32xf32>
    %74 = tpu.concatenate %49, %52, %55, %58, %61, %64, %67, %70, %73 in 1 : vector<256x32xf32>, vector<256x32xf32>, vector<256x32xf32>, vector<256x32xf32>, vector<256x32xf32>, vector<256x32xf32>, vector<256x32xf32>, vector<256x32xf32>, vector<256x32xf32> -> vector<256x288xf32>
    %c1_83 = arith.constant 1 : index
    %c0_84 = arith.constant 0 : index
    %c0_85 = arith.constant 0 : index
    %75 = vector.load %arg2[%c1_83, %c0_84, %c0_85] : memref<2x288x32xf32, #tpu.memory_space<vmem>>, vector<1x288x32xf32>
    %76 = vector.shape_cast %75 : vector<1x288x32xf32> to vector<288x32xf32>
    %cst_86 = arith.constant dense<0.000000e+00> : vector<256x32xf32>
    %77 = tpu.matmul %74, %76, %cst_86 {dimension_numbers = #tpu.dot_dimension_numbers<[1], [0], [0], [1], [0, 0, 1, 1], [], []>} : vector<256x288xf32>, vector<288x32xf32>, vector<256x32xf32> -> vector<256x32xf32>
    %c1_87 = arith.constant 1 : index
    %c0_88 = arith.constant 0 : index
    %c0_89 = arith.constant 0 : index
    %78 = vector.load %arg3[%c1_87, %c0_88, %c0_89] : memref<2x1x32xf32, #tpu.memory_space<vmem>>, vector<1x1x32xf32>
    %79 = vector.shape_cast %78 : vector<1x1x32xf32> to vector<1x32xf32>
    %80 = vector.broadcast %79 : vector<1x32xf32> to vector<256x32xf32>
    %81 = arith.mulf %77, %80 : vector<256x32xf32>
    %c1_90 = arith.constant 1 : index
    %c0_91 = arith.constant 0 : index
    %c0_92 = arith.constant 0 : index
    %82 = vector.load %arg4[%c1_90, %c0_91, %c0_92] : memref<2x1x32xf32, #tpu.memory_space<vmem>>, vector<1x1x32xf32>
    %83 = vector.shape_cast %82 : vector<1x1x32xf32> to vector<1x32xf32>
    %84 = vector.broadcast %83 : vector<1x32xf32> to vector<256x32xf32>
    %85 = arith.addf %81, %84 : vector<256x32xf32>
    %cst_93 = arith.constant 0.000000e+00 : f32
    %86 = vector.broadcast %cst_93 : f32 to vector<256x32xf32>
    %87 = arith.maximumf %85, %86 : vector<256x32xf32>
    %88 = vector.shape_cast %87 : vector<256x32xf32> to vector<16x16x32xf32>
    %c1_94 = arith.constant 1 : index
    %c0_95 = arith.constant 0 : index
    %c0_96 = arith.constant 0 : index
    %c0_97 = arith.constant 0 : index
    %c0_98 = arith.constant 0 : index
    %89 = vector.load %arg5[%c1_94, %c0_95, %c0_96, %c0_97, %c0_98] : memref<2x1x16x16x32xf32, #tpu.memory_space<vmem>>, vector<1x1x16x16x32xf32>
    %90 = vector.shape_cast %89 : vector<1x1x16x16x32xf32> to vector<16x16x32xf32>
    %91 = vector.shape_cast %88 : vector<16x16x32xf32> to vector<1x1x16x16x32xf32>
    tpu.vector_store %arg5[%c1_94, %c0_95, %c0_96, %c0_97, %c0_98], %91 {strides = array<i32>} : memref<2x1x16x16x32xf32, #tpu.memory_space<vmem>>, vector<1x1x16x16x32xf32>,
    %cst_99 = arith.constant dense<0.000000e+00> : vector<32xf32>
    %92 = vector.multi_reduction <add>, %87, %cst_99 [0] : vector<256x32xf32> to vector<32xf32>
    %93 = vector.shape_cast %92 : vector<32xf32> to vector<1x32xf32>
    %94 = arith.addf %46, %93 : vector<1x32xf32>
    %c0_100 = arith.constant 0 : index
    %c0_101 = arith.constant 0 : index
    %c0_102 = arith.constant 0 : index
    %95 = vector.load %arg6[%c0_100, %c0_101, %c0_102] : memref<1x1x32xf32, #tpu.memory_space<vmem>>, vector<1x1x32xf32>
    %96 = vector.shape_cast %95 : vector<1x1x32xf32> to vector<1x32xf32>
    %97 = vector.shape_cast %94 : vector<1x32xf32> to vector<1x1x32xf32>
    tpu.vector_store %arg6[%c0_100, %c0_101, %c0_102], %97 {strides = array<i32>} : memref<1x1x32xf32, #tpu.memory_space<vmem>>, vector<1x1x32xf32>,
    return
  }
  func.func @transform_0(%arg0: i32) -> (i32, i32, i32, i32) {
    %c0_i32 = arith.constant 0 : i32
    %c0_i32_0 = arith.constant 0 : i32
    %c0_i32_1 = arith.constant 0 : i32
    %c0_i32_2 = arith.constant 0 : i32
    return %arg0, %c0_i32, %c0_i32_0, %c0_i32_1 : i32, i32, i32, i32
  }
  func.func @transform_1(%arg0: i32) -> (i32, i32, i32) {
    %c0_i32 = arith.constant 0 : i32
    %c0_i32_0 = arith.constant 0 : i32
    %c0_i32_1 = arith.constant 0 : i32
    %c0_i32_2 = arith.constant 0 : i32
    return %c0_i32, %c0_i32_0, %c0_i32_1 : i32, i32, i32
  }
  func.func @transform_2(%arg0: i32) -> (i32, i32, i32) {
    %c0_i32 = arith.constant 0 : i32
    %c0_i32_0 = arith.constant 0 : i32
    %c0_i32_1 = arith.constant 0 : i32
    %c0_i32_2 = arith.constant 0 : i32
    return %c0_i32, %c0_i32_0, %c0_i32_1 : i32, i32, i32
  }
  func.func @transform_3(%arg0: i32) -> (i32, i32, i32) {
    %c0_i32 = arith.constant 0 : i32
    %c0_i32_0 = arith.constant 0 : i32
    %c0_i32_1 = arith.constant 0 : i32
    %c0_i32_2 = arith.constant 0 : i32
    return %c0_i32, %c0_i32_0, %c0_i32_1 : i32, i32, i32
  }
  func.func @transform_4(%arg0: i32) -> (i32, i32, i32, i32, i32) {
    %c0_i32 = arith.constant 0 : i32
    %c0_i32_0 = arith.constant 0 : i32
    %c0_i32_1 = arith.constant 0 : i32
    %c0_i32_2 = arith.constant 0 : i32
    %c0_i32_3 = arith.constant 0 : i32
    return %c0_i32, %arg0, %c0_i32_0, %c0_i32_1, %c0_i32_2 : i32, i32, i32, i32, i32
  }
  func.func @transform_5(%arg0: i32) -> (i32, i32, i32) {
    %c0_i32 = arith.constant 0 : i32
    %c0_i32_0 = arith.constant 0 : i32
    %c0_i32_1 = arith.constant 0 : i32
    return %arg0, %c0_i32, %c0_i32_0 : i32, i32, i32
  }
}

</mosaic_0001>

<bundles_post_ra>
// kernel: tpu_custom_call.1
= control target key start
LH: loop header
LB: loop body
LE: loop exit
PB: predicated region body
PF: predicated region fallthrough
CT: control target
= control target key end

     0   :  { %11 = vsyncpa [#allocation3], 0  ;;  %s9343_s0 = inlined_call_operand.vmem [shape: f32[2,20,20,32], index: 0, kind: input, shape index: {}]   ;;  %s9344_s1 = inlined_call_operand.vmem [shape: f32[2,288,32], index: 1, kind: input, shape index: {}]   ;;  %s9345_s2 = inlined_call_operand.vmem [shape: f32[2,1,32], index: 2, kind: input, shape index: {}]   ;;  %s9346_s3 = inlined_call_operand.vmem [shape: f32[2,1,32], index: 3, kind: input, shape index: {}]   ;;  %s9347_s4 = inlined_call_operand.hbm [shape: f32[2,2,16,16,32], index: 4, kind: output, shape index: {0}]   ;;  %s9348_s5 = inlined_call_operand.hbm [shape: f32[2,1,32], index: 5, kind: output, shape index: {1}]  }
   0x1   :  { %13 = vsyncpa [#allocation3 + $0x1], 0 }
   0x2   :  { %14 = vsyncpa [#allocation5], 0 }
   0x3   :  { %16 = vsyncpa [#allocation5 + $0x1], 0  ;;  %s6042_s18 = smov 0   ;;  %s6044_s19 = smov 0  }
   0x4   :  { %s6046_s20 = smov 0   ;;  %s6048_s21 = smov 0  }
   0x5 LB: > { %s6063_s22 = sadd.s32 4294967295, %s6000_s21   ;;  %s4241_s23 = sadd.s32 4294967294, %s6000_s21   ;;  %s6000_s21 = sphi %s6048_s21, %s9495_s21   ;;  %s5996_s20 = sphi %s6046_s20, %s9494_s20   ;;  %s5992_s19 = sphi %s6044_s19, %s9493_s19   ;;  %s5988_s18 = sphi %s6042_s18, %s9492_s18  }
   0x6   : > { %s6067_s24 = sadd.s32 1, %s6000_s21   ;;  %s118_s25 = sadd.s32 1, %s5996_s20 }
   0x7   : > { %s115_s26 = ssub.s32 %s6000_s21, %s6067_s24  ;;  %p128_p0 = scmp.ne.s32.totalorder %s5996_s20, %s5992_s19 }
   0x8   : > { %p116_p1 = scmp.eq.s32.totalorder %s115_s26, 0  ;;  %p129_p2 = scmp.eq.s32.totalorder %s6063_s22, 1 }
   0x9   : > { %p134_p3 = scmp.ne.s32.totalorder %s5992_s19, %s5988_s18  ;;  %p135_p4 = scmp.eq.s32.totalorder %s4241_s23, 1 }
   0xa   : > { %s6078_s27 = scalar_select %p116_p1, %s5996_s20, %s118_s25  }
   0xb   : > { %p6080_p5 = por %p129_p2, %p128_p0  ;;  %p6084_p6 = por %p135_p4, %p134_p3 }
   0xc   : > { %p4244_p7 = scmp.ge.s32.totalorder %s6000_s21, 1  ;;  %p196_p8 = scmp.lt.s32.totalorder %s6000_s21, 3 }
   0xe   : > { %p197_p9 = pnand %p4244_p7, %p196_p8 }
  0x10   : > { %200 = sbr.rel (%p197_p9) target bundleno = 900 (0x384), region = 36 }
  0x15   : > { %p228_p10 = scmp.lt.s32.totalorder %s6063_s22, 1  ;;  %s6002_s10 = smov 32   ;;  %vm1292_vm0 = vcmask 261120   ;;  %vm1358_vm1 = vcmask 785408   ;;  %vm1325_vm2 = vcmask 523264   ;;  %vm4093_vm3 = vcmask 253952  }
  0x16   : > { %s6003_s11 = smov 64   ;;  %s6004_s12 = smov 96  }
  0x17   : > { %s229_s30 = scalar_select %p228_p10, %s6063_s22, 1 }
  0x18   : > { %s8198_s17 = sand.u32 1, %s5992_s19  }
  0x19   : > { %s4891_s6 = smul.u32 480, %s229_s30  ;;  %s4245_s26 = sshll.u32 %s8198_s17, 9 }
  0x1a   : > { %s8253_s30 = scalar_lea.vmem [#allocation2], %s4245_s26 }
  0x1b   : > { %s6095_s9 = scalar_lea.vmem %s9343_s0, %s4891_s6  ;;  %s4096_s6 = scalar_lea.sflag [#allocation3], %s8198_s17 }
  0x1c   : > { %v4287_v0 = vld [vmem:[%s6095_s9 + $0x7a] sm:$0xff]  ;;  %v4288_v1 = vld [vmem:[%s6095_s9 + $0x82] sm:$0xff]  ;;  %v4283_v2 = vld [vmem:[%s6095_s9 + $0x4a] sm:$0xff] }
  0x1d   : > { %v4972_v3 = vpack.i.bf16 %v4288_v1, %v4287_v0  ;;  %v4284_v4 = vld [vmem:[%s6095_s9 + $0x52] sm:$0xff]  ;;  %v4279_v5 = vld [vmem:[%s6095_s9 + $0x1a] sm:$0xff]  ;;  %v4280_v6 = vld [vmem:[%s6095_s9 + $0x22] sm:$0xff] }
  0x1e   : > { %v6103_v7 = vpack.i.bf16 %v4284_v4, %v4283_v2  ;;  %v4952_v8 = vpack.i.bf16 %v4280_v6, %v4279_v5  ;;  %v4289_v9 = vld [vmem:[%s6095_s9 + $0x92] sm:$0xff]  ;;  %v4290_v10 = vld [vmem:[%s6095_s9 + $0x9a] sm:$0xff]  ;;  %v4285_v11 = vld [vmem:[%s6095_s9 + $0x62] sm:$0xff] }
  0x1f   : > { %4973 = vrot.lane.b32.xlu2 %v4972_v3, %s6002_s10  ;;  %v4286_v12 = vld [vmem:[%s6095_s9 + $0x6a] sm:$0xff]  ;;  %v4281_v13 = vld [vmem:[%s6095_s9 + $0x32] sm:$0xff]  ;;  %v4282_v14 = vld [vmem:[%s6095_s9 + $0x3a] sm:$0xff]  ;;  %v6115_v15 = vpack.i.bf16 %v4290_v10, %v4289_v9 }
  0x20   : > { %4963 = vrot.lane.b32.xlu1 %v6103_v7, %s6002_s10  ;;  %4953 = vrot.lane.b32.xlu0 %v4952_v8, %s6002_s10  ;;  %v6117_v16 = vpack.i.bf16 %v4286_v12, %v4285_v11  ;;  %v4957_v17 = vpack.i.bf16 %v4282_v14, %v4281_v13  ;;  %v4295_v18 = vld [vmem:[%s6095_s9 + $0xda] sm:$0xff]  ;;  %v4296_v19 = vld [vmem:[%s6095_s9 + $0xe2] sm:$0xff] }
  0x21   : > { %v4293_v20 = vld [vmem:[%s6095_s9 + $0xc2] sm:$0xff]  ;;  %v4294_v21 = vld [vmem:[%s6095_s9 + $0xca] sm:$0xff]  ;;  %v4292_v23 = vld [vmem:[%s6095_s9 + $0xb2] sm:$0xff]  ;;  %v4992_v24 = vpack.i.bf16 %v4296_v19, %v4295_v18 }
  0x22   : > { %v4291_v22 = vld [vmem:[%s6095_s9 + $0xaa] sm:$0xff]  ;;  %v4987_v25 = vpack.i.bf16 %v4294_v21, %v4293_v20  ;;  %v4301_v27 = vld [vmem:[%s6095_s9 + $0x122] sm:$0xff]  ;;  %v4300_v30 = vld [vmem:[%s6095_s9 + $0x112] sm:$0xff] }
  0x23   : > { %v4982_v26 = vpack.i.bf16 %v4292_v23, %v4291_v22  ;;  %v4302_v28 = vld [vmem:[%s6095_s9 + $0x12a] sm:$0xff]  ;;  %v4297_v31 = vld [vmem:[%s6095_s9 + $0xf2] sm:$0xff]  ;;  %v4298_v32 = vld [vmem:[%s6095_s9 + $0xfa] sm:$0xff] }
  0x24   : > { %v4299_v29 = vld [vmem:[%s6095_s9 + $0x10a] sm:$0xff]  ;;  %v5007_v33 = vpack.i.bf16 %v4302_v28, %v4301_v27  ;;  %v4997_v35 = vpack.i.bf16 %v4298_v32, %v4297_v31  ;;  %v4308_v37 = vld [vmem:[%s6095_s9 + $0x172] sm:$0xff]  ;;  %v4306_v39 = vld [vmem:[%s6095_s9 + $0x15a] sm:$0xff] }
  0x25   : > { %v5002_v34 = vpack.i.bf16 %v4300_v30, %v4299_v29  ;;  %v4307_v36 = vld [vmem:[%s6095_s9 + $0x16a] sm:$0xff]  ;;  %v4305_v38 = vld [vmem:[%s6095_s9 + $0x152] sm:$0xff]  ;;  %v4303_v40 = vld [vmem:[%s6095_s9 + $0x13a] sm:$0xff] }
  0x26   : > { %v4304_v41 = vld [vmem:[%s6095_s9 + $0x142] sm:$0xff]  ;;  %v5022_v42 = vpack.i.bf16 %v4308_v37, %v4307_v36  ;;  %v5017_v43 = vpack.i.bf16 %v4306_v39, %v4305_v38  ;;  %v4313_v45 = vld [vmem:[%s6095_s9 + $0x33] sm:$0xff]  ;;  %v4310_v50 = vld [vmem:[%s6095_s9 + $0x18a] sm:$0xff] }
  0x27   : > { %4978 = vrot.lane.b32.xlu2 %v6115_v15, %s6002_s10  ;;  %v5012_v44 = vpack.i.bf16 %v4304_v41, %v4303_v40  ;;  %v4314_v46 = vld [vmem:[%s6095_s9 + $0x3b] sm:$0xff]  ;;  %v4312_v48 = vld [vmem:[%s6095_s9 + $0x23] sm:$0xff]  ;;  %v4318_v57 = vld [vmem:[%s6095_s9 + $0x6b] sm:$0xff] }
  0x28   : > { %4968 = vrot.lane.b32.xlu1 %v6117_v16, %s6002_s10  ;;  %4958 = vrot.lane.b32.xlu0 %v4957_v17, %s6002_s10  ;;  %v4311_v47 = vld [vmem:[%s6095_s9 + $0x1b] sm:$0xff]  ;;  %v6157_v51 = vpack.i.bf16 %v4314_v46, %v4313_v45  ;;  %v4320_v55 = vld [vmem:[%s6095_s9 + $0x83] sm:$0xff] }
  0x29   : > { %v4309_v49 = vld [vmem:[%s6095_s9 + $0x182] sm:$0xff]  ;;  %v5032_v52 = vpack.i.bf16 %v4312_v48, %v4311_v47  ;;  %v4315_v58 = vld [vmem:[%s6095_s9 + $0x4b] sm:$0xff]  ;;  %v4316_v59 = vld [vmem:[%s6095_s9 + $0x53] sm:$0xff] }
  0x2a   : > { %v5027_v53 = vpack.i.bf16 %v4310_v50, %v4309_v49  ;;  %v4319_v54 = vld [vmem:[%s6095_s9 + $0x7b] sm:$0xff]  ;;  %v4317_v56 = vld [vmem:[%s6095_s9 + $0x63] sm:$0xff]  ;;  %v6173_v62 = vpack.i.bf16 %v4316_v59, %v4315_v58  ;;  %v4326_v0 = vld [vmem:[%s6095_s9 + $0xcb] sm:$0xff] }
  0x2b   : > { %v6169_v60 = vpack.i.bf16 %v4320_v55, %v4319_v54  ;;  %v6171_v61 = vpack.i.bf16 %v4318_v57, %v4317_v56  ;;  %v4325_v63 = vld [vmem:[%s6095_s9 + $0xc3] sm:$0xff]  ;;  %v4323_v1 = vld [vmem:[%s6095_s9 + $0xab] sm:$0xff]  ;;  %v4324_v2 = vld [vmem:[%s6095_s9 + $0xb3] sm:$0xff] }
  0x2c   : > { %v4321_v3 = vld [vmem:[%s6095_s9 + $0x93] sm:$0xff]  ;;  %v4322_v4 = vld [vmem:[%s6095_s9 + $0x9b] sm:$0xff]  ;;  %v6187_v5 = vpack.i.bf16 %v4326_v0, %v4325_v63  ;;  %v6189_v6 = vpack.i.bf16 %v4324_v2, %v4323_v1  ;;  %v4331_v9 = vld [vmem:[%s6095_s9 + $0x10b] sm:$0xff] }
  0x2d   : > { %v6191_v8 = vpack.i.bf16 %v4322_v4, %v4321_v3  ;;  %v4332_v10 = vld [vmem:[%s6095_s9 + $0x113] sm:$0xff]  ;;  %v4330_v12 = vld [vmem:[%s6095_s9 + $0xfb] sm:$0xff]  ;;  %v4328_v14 = vld [vmem:[%s6095_s9 + $0xe3] sm:$0xff] }
  0x2e   : > { %v4329_v11 = vld [vmem:[%s6095_s9 + $0xf3] sm:$0xff]  ;;  %v4327_v13 = vld [vmem:[%s6095_s9 + $0xdb] sm:$0xff]  ;;  %v6205_v17 = vpack.i.bf16 %v4332_v10, %v4331_v9  ;;  %v4336_v23 = vld [vmem:[%s6095_s9 + $0x143] sm:$0xff] }
  0x2f   : > { %4993 = vrot.lane.b32.xlu2 %v4992_v24, %s6002_s10  ;;  %v6207_v18 = vpack.i.bf16 %v4330_v12, %v4329_v11  ;;  %v6209_v19 = vpack.i.bf16 %v4328_v14, %v4327_v13  ;;  %v4337_v20 = vld [vmem:[%s6095_s9 + $0x153] sm:$0xff]  ;;  %v4338_v21 = vld [vmem:[%s6095_s9 + $0x15b] sm:$0xff]  ;;  %v4333_v24 = vld [vmem:[%s6095_s9 + $0x123] sm:$0xff] }
  0x30   : > { %4988 = vrot.lane.b32.xlu1 %v4987_v25, %s6002_s10  ;;  %4983 = vrot.lane.b32.xlu0 %v4982_v26, %s6002_s10  ;;  %v4335_v22 = vld [vmem:[%s6095_s9 + $0x13b] sm:$0xff]  ;;  %v4334_v25 = vld [vmem:[%s6095_s9 + $0x12b] sm:$0xff]  ;;  %v6223_v26 = vpack.i.bf16 %v4338_v21, %v4337_v20 }
  0x31   : > { %v6225_v27 = vpack.i.bf16 %v4336_v23, %v4335_v22  ;;  %v6227_v28 = vpack.i.bf16 %v4334_v25, %v4333_v24  ;;  %v6232_v29 = vld [vmem:[%s6095_s9 + $0x31] sm:$0xff]  ;;  %v6239_v30 = vld [vmem:[%s6095_s9 + $0x39] sm:$0xff]  ;;  %v4341_v31 = vld [vmem:[%s6095_s9 + $0x183] sm:$0xff] }
  0x32   : > { %v4342_v32 = vld [vmem:[%s6095_s9 + $0x18b] sm:$0xff]  ;;  %v4349_v38 = vld [vmem:[%s6095_s9 + $0x79] sm:$0xff]  ;;  %v4350_v39 = vld [vmem:[%s6095_s9 + $0x81] sm:$0xff] }
  0x33   : > { %v6247_v36 = vpack.i.bf16 %v4342_v32, %v4341_v31  ;;  %v6259_v40 = vld [vmem:[%s6095_s9 + $0x61] sm:$0xff]  ;;  %v6262_v41 = vld [vmem:[%s6095_s9 + $0x69] sm:$0xff]  ;;  %v4352_v54 = vld [vmem:[%s6095_s9 + $0x99] sm:$0xff] }
  0x34   : > { %v6274_v45 = vpack.i.bf16 %v6262_v41, %v6259_v40  ;;  %v4355_v47 = vld [vmem:[%s6095_s9 + $0xc1] sm:$0xff]  ;;  %v4356_v48 = vld [vmem:[%s6095_s9 + $0xc9] sm:$0xff]  ;;  %v4362_v59 = vld [vmem:[%s6095_s9 + $0x111] sm:$0xff] }
  0x35   : > { %v4353_v49 = vld [vmem:[%s6095_s9 + $0xa9] sm:$0xff]  ;;  %v6294_v55 = vpack.i.bf16 %v4356_v48, %v4355_v47  ;;  %v6311_v63 = vld [vmem:[%s6095_s9 + $0xf1] sm:$0xff]  ;;  %v6316_v1 = vld [vmem:[%s6095_s9 + $0xf9] sm:$0xff] }
  0x36   : > { %v6303_v58 = vld [vmem:[%s6095_s9 + $0x109] sm:$0xff]  ;;  %v6319_v2 = vld [vmem:[%s6095_s9 + $0xd9] sm:$0xff]  ;;  %v6322_v3 = vld [vmem:[%s6095_s9 + $0xe1] sm:$0xff]  ;;  %v6329_v9 = vpack.i.bf16 %v6316_v1, %v6311_v63 }
  0x37   : > { %5008 = vrot.lane.b32.xlu2 %v5007_v33, %s6002_s10  ;;  %v4339_v33 = vld [vmem:[%s6095_s9 + $0x16b] sm:$0xff]  ;;  %v6325_v4 = vpack.i.bf16 %v4362_v59, %v6303_v58  ;;  %v6333_v10 = vpack.i.bf16 %v6322_v3, %v6319_v2  ;;  %v4368_v12 = vld [vmem:[%s6095_s9 + $0x159] sm:$0xff]  ;;  %v4366_v20 = vld [vmem:[%s6095_s9 + $0x141] sm:$0xff] }
  0x38   : > { %5003 = vrot.lane.b32.xlu1 %v5002_v34, %s6002_s10  ;;  %4998 = vrot.lane.b32.xlu0 %v4997_v35, %s6002_s10  ;;  %v4340_v34 = vld [vmem:[%s6095_s9 + $0x173] sm:$0xff]  ;;  %v5112_v35 = vpack.i.bf16 %v6239_v30, %v6232_v29  ;;  %v4363_v21 = vld [vmem:[%s6095_s9 + $0x121] sm:$0xff] }
  0x39   : > { %v6249_v37 = vpack.i.bf16 %v4340_v34, %v4339_v33  ;;  %v4367_v11 = vld [vmem:[%s6095_s9 + $0x151] sm:$0xff]  ;;  %v4365_v13 = vld [vmem:[%s6095_s9 + $0x139] sm:$0xff]  ;;  %v4364_v22 = vld [vmem:[%s6095_s9 + $0x129] sm:$0xff] }
  0x3a   : > { %v6349_v23 = vpack.i.bf16 %v4368_v12, %v4367_v11  ;;  %v1502_v24 = vld [vmem:[%s9344_s1 + $0x78] sm:$0xff]  ;;  %v6354_v25 = vpack.i.bf16 %v4366_v20, %v4365_v13  ;;  %v6356_v31 = vpack.i.bf16 %v4364_v22, %v4363_v21  ;;  %v4374_v33 = vld [vmem:[%s6095_s9 + $0x1a1] sm:$0xff]  ;;  %v4369_v47 = vld [vmem:[%s6095_s9 + $0x169] sm:$0xff] }
  0x3b   : > { %1619 = vmatpush.msra.mxu0 %v1502_v24  ;;  %4867 = vmatpush.msra.mxu1 %v1502_v24  ;;  %v4373_v32 = vld [vmem:[%s6095_s9 + $0x199] sm:$0xff]  ;;  %v4371_v34 = vld [vmem:[%s6095_s9 + $0x181] sm:$0xff]  ;;  %v4370_v48 = vld [vmem:[%s6095_s9 + $0x171] sm:$0xff] }
  0x3c   : > { %v1499_v59 = vld [vmem:[%s9344_s1 + $0x60] sm:$0xff]  ;;  %v6389_v12 = vpack.i.bf16 %v4370_v48, %v4369_v47  ;;  %v1498_v13 = vld [vmem:[%s9344_s1 + $0x58] sm:$0xff]  ;;  %v1497_v20 = vld [vmem:[%s9344_s1 + $0x50] sm:$0xff] }
  0x3f   : > { %5023 = vrot.lane.b32.xlu2 %v5022_v42, %s6002_s10  ;;  %v6265_v42 = vld [vmem:[%s6095_s9 + $0x49] sm:$0xff] }
  0x40   : > { %5018 = vrot.lane.b32.xlu1 %v5017_v43, %s6002_s10  ;;  %5013 = vrot.lane.b32.xlu0 %v5012_v44, %s6002_s10  ;;  %v6268_v43 = vld [vmem:[%s6095_s9 + $0x51] sm:$0xff]  ;;  %v6270_v44 = vpack.i.bf16 %v4350_v39, %v4349_v38  ;;  %v4372_v39 = vld [vmem:[%s6095_s9 + $0x189] sm:$0xff] }
  0x41   : > { %v6278_v46 = vpack.i.bf16 %v6268_v43, %v6265_v42  ;;  %v6387_v11 = vpack.i.bf16 %v4372_v39, %v4371_v34  ;;  %v1494_v34 = vld [vmem:[%s9344_s1 + $0x38] sm:$0xff] }
  0x47   : > { %5038 = vrot.lane.b32.xlu2 %v6157_v51, %s6003_s11 }
  0x48   : > { %5033 = vrot.lane.b32.xlu1 %v5032_v52, %s6003_s11  ;;  %5028 = vrot.lane.b32.xlu0 %v5027_v53, %s6002_s10  ;;  %v4354_v52 = vld [vmem:[%s6095_s9 + $0xb1] sm:$0xff] }
  0x49   : > { %v4351_v53 = vld [vmem:[%s6095_s9 + $0x91] sm:$0xff]  ;;  %v6296_v56 = vpack.i.bf16 %v4354_v52, %v4353_v49 }
  0x4a   : > { %v6298_v57 = vpack.i.bf16 %v4352_v54, %v4351_v53  ;;  %v1500_v53 = vld [vmem:[%s9344_s1 + $0x68] sm:$0xff]  ;;  %v6382_v54 = vpack.i.bf16 %v4374_v33, %v4373_v32  ;;  %v1495_v33 = vld [vmem:[%s9344_s1 + $0x40] sm:$0xff] }
  0x4b   : > { %v1496_v32 = vld [vmem:[%s9344_s1 + $0x48] sm:$0xff] }
  0x4f   : > { %5053 = vrot.lane.b32.xlu2 %v6169_v60, %s6003_s11 }
  0x50   : > { %5048 = vrot.lane.b32.xlu1 %v6171_v61, %s6003_s11  ;;  %5043 = vrot.lane.b32.xlu0 %v6173_v62, %s6003_s11 }
  0x57   : > { %5068 = vrot.lane.b32.xlu2 %v6187_v5, %s6003_s11 }
  0x58   : > { %5063 = vrot.lane.b32.xlu1 %v6189_v6, %s6003_s11  ;;  %5058 = vrot.lane.b32.xlu0 %v6191_v8, %s6003_s11 }
  0x5f   : > { %5083 = vrot.lane.b32.xlu2 %v6205_v17, %s6003_s11 }
  0x60   : > { %5078 = vrot.lane.b32.xlu1 %v6207_v18, %s6003_s11  ;;  %5073 = vrot.lane.b32.xlu0 %v6209_v19, %s6003_s11 }
  0x67   : > { %5098 = vrot.lane.b32.xlu2 %v6223_v26, %s6003_s11 }
  0x68   : > { %5093 = vrot.lane.b32.xlu1 %v6225_v27, %s6003_s11  ;;  %5088 = vrot.lane.b32.xlu0 %v6227_v28, %s6003_s11 }
  0x6f   : > { %5113 = vrot.lane.b32.xlu2 %v5112_v35, %s6004_s12  ;;  %v1501_v35 = vld [vmem:[%s9344_s1 + $0x70] sm:$0xff] }
  0x70   : > { %5108 = vrot.lane.b32.xlu1 %v6247_v36, %s6003_s11  ;;  %5103 = vrot.lane.b32.xlu0 %v6249_v37, %s6003_s11 }
  0x71   : > { %1620 = vmatpush.msra.mxu0 %v1501_v35  ;;  %4868 = vmatpush.msra.mxu1 %v1501_v35  ;;  %v1493_v35 = vld [vmem:[%s9344_s1 + $0x30] sm:$0xff] }
  0x73   : > { %1621 = vmatpush.msra.mxu0 %v1500_v53  ;;  %4869 = vmatpush.msra.mxu1 %v1500_v53  ;;  %v1489_v53 = vld [vmem:[%s9344_s1 + $0x10] sm:$0xff] }
  0x75   : > { %1622 = vmatpush.msra.mxu0 %v1499_v59  ;;  %4870 = vmatpush.msra.mxu1 %v1499_v59 }
  0x77   : > { %5128 = vrot.lane.b32.xlu2 %v6270_v44, %s6004_s12  ;;  %1623 = vmatpush.msra.mxu0 %v1498_v13 }
  0x78   : > { %5123 = vrot.lane.b32.xlu1 %v6274_v45, %s6004_s12  ;;  %5118 = vrot.lane.b32.xlu0 %v6278_v46, %s6004_s12 }
  0x79   : > { %v6289_v50 = vpop.permute.xlu2 %4973  ;;  %1624 = vmatpush.msra.mxu0 %v1497_v20  ;;  %4871 = vmatpush.msra.mxu1 %v1498_v13 }
  0x7b   : > { %1625 = vmatpush.msra.mxu0 %v1496_v32  ;;  %4872 = vmatpush.msra.mxu1 %v1497_v20 }
  0x7d   : > { %1626 = vmatpush.msra.mxu0 %v1495_v33  ;;  %4873 = vmatpush.msra.mxu1 %v1496_v32 }
  0x7f   : > { %5143 = vrot.lane.b32.xlu2 %v6294_v55, %s6004_s12  ;;  %1627 = vmatpush.msra.mxu0 %v1494_v34 }
  0x80   : > { %5138 = vrot.lane.b32.xlu1 %v6296_v56, %s6004_s12  ;;  %5133 = vrot.lane.b32.xlu0 %v6298_v57, %s6004_s12 }
  0x81   : > { %v6313_v0 = vpop.permute.xlu2 %4978  ;;  %1628 = vmatpush.msra.mxu0 %v1493_v35  ;;  %4874 = vmatpush.msra.mxu1 %v1495_v33 }
  0x83   : > { %4875 = vmatpush.msra.mxu1 %v1494_v34  ;;  %v4438_v34 = vld [vmem:[%s6095_s9 + $0x1a3] sm:$0xff] }
  0x85   : > { %4876 = vmatpush.msra.mxu1 %v1493_v35 }
  0x87   : > { %5158 = vrot.lane.b32.xlu2 %v6325_v4, %s6004_s12 }
  0x88   : > { %5153 = vrot.lane.b32.xlu1 %v6329_v9, %s6004_s12  ;;  %5148 = vrot.lane.b32.xlu0 %v6333_v10, %s6004_s12 }
  0x89   : > { %v6344_v14 = vpop.permute.xlu2 %4993 }
  0x8f   : > { %5173 = vrot.lane.b32.xlu2 %v6349_v23, %s6004_s12 }
  0x90   : > { %5168 = vrot.lane.b32.xlu1 %v6354_v25, %s6004_s12  ;;  %5163 = vrot.lane.b32.xlu0 %v6356_v31, %s6004_s12 }
  0x91   : > { %v6370_v38 = vpop.permute.xlu2 %5008 }
  0x92   : > { %v6375_v49 = vpop.permute.xlu1 %4963  ;;  %v6377_v52 = vpop.permute.xlu0 %4953 }
  0x97   : > { %5188 = vrot.lane.b32.xlu2 %v6382_v54, %s6004_s12 }
  0x98   : > { %5183 = vrot.lane.b32.xlu1 %v6387_v11, %s6004_s12  ;;  %5178 = vrot.lane.b32.xlu0 %v6389_v12, %s6004_s12 }
  0x99   : > { %v6403_v21 = vpop.permute.xlu2 %5023 }
  0x9a   : > { %9372 = vst [vmem:[#allocation10_spill] sm:$0xff] %v6403_v21  ;;  %v6405_v22 = vpop.permute.xlu1 %4968  ;;  %v6407_v24 = vpop.permute.xlu0 %4958 }
  0x9f   : > { %5203 = vrot.lane.b32.xlu2 %v6171_v61, %s6002_s10  ;;  %v1492_v61 = vld [vmem:[%s9344_s1 + $0x28] sm:$0xff] }
  0xa0   : > { %5198 = vrot.lane.b32.xlu1 %v6173_v62, %s6002_s10  ;;  %5193 = vrot.lane.b32.xlu0 %v6157_v51, %s6002_s10  ;;  %v1491_v51 = vld [vmem:[%s9344_s1 + $0x20] sm:$0xff]  ;;  %v1490_v62 = vld [vmem:[%s9344_s1 + $0x18] sm:$0xff] }
  0xa1   : > { %v6427_v39 = vpop.permute.xlu2 %5038  ;;  %1629 = vmatpush.msra.mxu0 %v1492_v61  ;;  %4877 = vmatpush.msra.mxu1 %v1492_v61 }
  0xa2   : > { %v6429_v47 = vpop.permute.xlu1 %4988  ;;  %v6431_v48 = vpop.permute.xlu0 %4983 }
  0xa3   : > { %1630 = vmatpush.msra.mxu0 %v1491_v51  ;;  %4878 = vmatpush.msra.mxu1 %v1491_v51  ;;  %v4955_v51 = vunpack.i.l.bf16 %v6377_v52 }
  0xa5   : > { %1631 = vmatpush.msra.mxu0 %v1490_v62  ;;  %4879 = vmatpush.msra.mxu1 %v1490_v62 }
  0xa7   : > { %5218 = vrot.lane.b32.xlu2 %v6189_v6, %s6002_s10  ;;  %1632 = vmatpush.msra.mxu0 %v1489_v53  ;;  %v1488_v6 = vld [vmem:[%s9344_s1 + $0x8] sm:$0xff] }
  0xa8   : > { %5213 = vrot.lane.b32.xlu1 %v6191_v8, %s6002_s10  ;;  %5208 = vrot.lane.b32.xlu0 %v6169_v60, %s6002_s10  ;;  %v1487_v60 = vld [vmem:[%s9344_s1] sm:$0xff] }
  0xa9   : > { %v6451_v59 = vpop.permute.xlu2 %5053  ;;  %1633 = vmatpush.msra.mxu0 %v1488_v6  ;;  %4880 = vmatpush.msra.mxu1 %v1489_v53 }
  0xaa   : > { %v6453_v13 = vpop.permute.xlu1 %5003  ;;  %v6455_v20 = vpop.permute.xlu0 %4998 }
  0xab   : > { %1634 = vmatpush.msra.mxu0 %v1487_v60  ;;  %4881 = vmatpush.msra.mxu1 %v1488_v6 }
  0xad   : > { %4882 = vmatpush.msra.mxu1 %v1487_v60 }
  0xaf   : > { %5233 = vrot.lane.b32.xlu2 %v6207_v18, %s6002_s10 }
  0xb0   : > { %5228 = vrot.lane.b32.xlu1 %v6209_v19, %s6002_s10  ;;  %5223 = vrot.lane.b32.xlu0 %v6187_v5, %s6002_s10 }
  0xb1   : > { %v6469_v8 = vpop.permute.xlu2 %5068 }
  0xb2   : > { %v6471_v32 = vpop.permute.xlu1 %5018  ;;  %v6473_v33 = vpop.permute.xlu0 %5013 }
  0xb7   : > { %5248 = vrot.lane.b32.xlu2 %v6225_v27, %s6002_s10 }
  0xb8   : > { %5243 = vrot.lane.b32.xlu1 %v6227_v28, %s6002_s10  ;;  %5238 = vrot.lane.b32.xlu0 %v6205_v17, %s6002_s10  ;;  %v4437_v28 = vld [vmem:[%s6095_s9 + $0x19b] sm:$0xff] }
  0xb9   : > { %v6481_v5 = vpop.permute.xlu2 %5083  ;;  %v5267_v61 = vpack.i.bf16 %v4438_v34, %v4437_v28  ;;  %v4956_v34 = vunpack.i.h.bf16 %v6377_v52 }
  0xba   : > { %v5034_v18 = vpop.permute.xlu1 %5033  ;;  %v6483_v19 = vpop.permute.xlu0 %5028 }
  0xbb   : > { %9373 = vst [vmem:[#allocation11_spill] sm:$0xff] %v6483_v19  ;;  %v5035_v62 = vunpack.i.l.bf16 %v5034_v18 }
  0xbf   : > { %5263 = vrot.lane.b32.xlu2 %v6247_v36, %s6002_s10  ;;  %v4247_v36 = vld [vmem:[%s6095_s9 + $0x19] sm:$0xff] }
  0xc0   : > { %5258 = vrot.lane.b32.xlu1 %v6249_v37, %s6002_s10  ;;  %5253 = vrot.lane.b32.xlu0 %v6223_v26, %s6002_s10  ;;  %v1293_v60 = vsel %vm1292_vm0, %v4247_v36, %v4955_v51 }
  0xc1   : > { %v6491_v27 = vpop.permute.xlu2 %5098 }
  0xc2   : > { %v6495_v17 = vpop.permute.xlu1 %5048  ;;  %v6497_v35 = vpop.permute.xlu0 %5043 }
  0xc7   : > { %5278 = vrot.lane.b32.xlu2 %v6274_v45, %s6003_s11  ;;  %v1326_v45 = vsel %vm1325_vm2, %v1293_v60, %v5035_v62 }
  0xc8   : > { %5273 = vrot.lane.b32.xlu1 %v6278_v46, %s6003_s11  ;;  %5268 = vrot.lane.b32.xlu0 %v5267_v61, %s6002_s10  ;;  %v5036_v46 = vunpack.i.h.bf16 %v5034_v18  ;;  %v4248_v61 = vld [vmem:[%s6095_s9 + $0x21] sm:$0xff] }
  0xc9   : > { %v5114_v26 = vpop.permute.xlu2 %5113  ;;  %v1294_v52 = vsel %vm1292_vm0, %v4248_v61, %v4956_v34  ;;  %v5041_v61 = vunpack.i.h.bf16 %v6427_v39 }
  0xca   : > { %v5115_v37 = vunpack.i.l.bf16 %v5114_v26  ;;  %v6506_v53 = vpop.permute.xlu1 %5063  ;;  %v6508_v6 = vpop.permute.xlu0 %5058  ;;  %v5116_v19 = vunpack.i.h.bf16 %v5114_v26  ;;  %v1327_v18 = vsel %vm1325_vm2, %v1294_v52, %v5036_v46 }
  0xcc   : > { %v1359_v28 = vsel %vm1358_vm1, %v1326_v45, %v5115_v37  ;;  %v5040_v37 = vunpack.i.l.bf16 %v6427_v39 }
  0xcd   : > { %1635 = vmatmul.f32.vlgmr.msra.gmra.mxu0 %v1359_v28 }
  0xcf   : > { %5293 = vrot.lane.b32.xlu2 %v6296_v56, %s6003_s11  ;;  %v1360_v56 = vsel %vm1358_vm1, %v1327_v18, %v5116_v19  ;;  %v4960_v19 = vunpack.i.l.bf16 %v6407_v24  ;;  %v4475_v18 = vld [vmem:[%s6095_s9 + $0x7a] sm:$0xff] }
  0xd0   : > { %5288 = vrot.lane.b32.xlu1 %v6298_v57, %s6003_s11  ;;  %5283 = vrot.lane.b32.xlu0 %v6270_v44, %s6003_s11 }
  0xd1   : > { %v6521_v51 = vpop.permute.xlu2 %5128 }
  0xd2   : > { %v6523_v62 = vpop.permute.xlu1 %5078  ;;  %v6525_v36 = vpop.permute.xlu0 %5073 }
  0xd5   : > { %1638 = vmatmul.f32.gmra.mxu0 %v1360_v56  ;;  %v4476_v56 = vld [vmem:[%s6095_s9 + $0x82] sm:$0xff] }
  0xd7   : > { %5308 = vrot.lane.b32.xlu2 %v6329_v9, %s6003_s11 }
  0xd8   : > { %5303 = vrot.lane.b32.xlu1 %v6333_v10, %s6003_s11  ;;  %5298 = vrot.lane.b32.xlu0 %v6294_v55, %s6003_s11 }
  0xd9   : > { %v6536_v44 = vpop.permute.xlu2 %5143 }
  0xda   : > { %v6538_v57 = vpop.permute.xlu1 %5093  ;;  %v6540_v26 = vpop.permute.xlu0 %5088 }
  0xdf   : > { %5323 = vrot.lane.b32.xlu2 %v6354_v25, %s6003_s11  ;;  %v4469_v25 = vld [vmem:[%s6095_s9 + $0x1b1] sm:$0xff] }
  0xe0   : > { %5318 = vrot.lane.b32.xlu1 %v6356_v31, %s6003_s11  ;;  %5313 = vrot.lane.b32.xlu0 %v6325_v4, %s6003_s11  ;;  %v4470_v31 = vld [vmem:[%s6095_s9 + $0x1b9] sm:$0xff] }
  0xe1   : > { %v6548_v9 = vpop.permute.xlu2 %5158  ;;  %v5347_v46 = vpack.i.bf16 %v4470_v31, %v4469_v25  ;;  %v4995_v25 = vunpack.i.l.bf16 %v6344_v14  ;;  %v4965_v31 = vunpack.i.l.bf16 %v6375_v49 }
  0xe2   : > { %v6550_v55 = vpop.permute.xlu1 %5108  ;;  %v6552_v10 = vpop.permute.xlu0 %5103 }
  0xe3   : > { %9374 = vst [vmem:[#allocation12_spill] sm:$0xff] %v6550_v55 }
  0xe4   : > { %9375 = vst [vmem:[#allocation13_spill] sm:$0xff] %v6552_v10 }
  0xe7   : > { %5338 = vrot.lane.b32.xlu2 %v6387_v11, %s6003_s11  ;;  %v1295_v11 = vsel %vm1292_vm0, %v6232_v29, %v4960_v19 }
  0xe8   : > { %5333 = vrot.lane.b32.xlu1 %v6389_v12, %s6003_s11  ;;  %5328 = vrot.lane.b32.xlu0 %v6349_v23, %s6003_s11  ;;  %v1328_v34 = vsel %vm1325_vm2, %v1295_v11, %v5040_v37  ;;  %v4961_v23 = vunpack.i.h.bf16 %v6407_v24  ;;  %v6590_v37 = vpack.i.bf16 %v4476_v56, %v4475_v18  ;;  %v4484_v11 = vld [vmem:[%s6095_s9 + $0xe2] sm:$0xff] }
  0xe9   : > { %v6562_v4 = vpop.permute.xlu2 %5173 }
  0xea   : > { %v6566_v60 = vpop.permute.xlu1 %5123  ;;  %v5119_v45 = vpop.permute.xlu0 %5118 }
  0xeb   : > { %v5120_v28 = vunpack.i.l.bf16 %v5119_v45  ;;  %v5121_v29 = vunpack.i.h.bf16 %v5119_v45  ;;  %v4483_v45 = vld [vmem:[%s6095_s9 + $0xda] sm:$0xff] }
  0xed   : > { %v1361_v12 = vsel %vm1358_vm1, %v1328_v34, %v5120_v28  ;;  %v5075_v28 = vunpack.i.l.bf16 %v6525_v36  ;;  %v4481_v34 = vld [vmem:[%s6095_s9 + $0xc2] sm:$0xff] }
  0xee   : > { %1641 = vmatmul.f32.gmra.mxu0 %v1361_v12 }
  0xef   : > { %5353 = vrot.lane.b32.xlu2 %v6103_v7, %s6004_s12  ;;  %v1296_v7 = vsel %vm1292_vm0, %v6239_v30, %v4961_v23  ;;  %v5045_v30 = vunpack.i.l.bf16 %v6497_v35  ;;  %v4482_v23 = vld [vmem:[%s6095_s9 + $0xca] sm:$0xff] }
  0xf0   : > { %5348 = vrot.lane.b32.xlu1 %v5347_v46, %s6003_s11  ;;  %5343 = vrot.lane.b32.xlu0 %v6382_v54, %s6003_s11  ;;  %v1329_v39 = vsel %vm1325_vm2, %v1296_v7, %v5041_v61  ;;  %v5125_v46 = vunpack.i.l.bf16 %v6566_v60  ;;  %v4479_v61 = vld [vmem:[%s6095_s9 + $0xaa] sm:$0xff]  ;;  %v1297_v7 = vsel %vm1292_vm0, %v6265_v42, %v4965_v31  ;;  %v6622_v55 = vpack.i.bf16 %v4482_v23, %v4481_v34  ;;  %v4486_v34 = vld [vmem:[%s6095_s9 + $0xfa] sm:$0xff] }
  0xf1   : > { %v6579_v52 = vpop.permute.xlu2 %5188  ;;  %v1362_v54 = vsel %vm1358_vm1, %v1329_v39, %v5121_v29  ;;  %v6618_v39 = vpack.i.bf16 %v4484_v11, %v4483_v45  ;;  %v4996_v42 = vunpack.i.h.bf16 %v6344_v14  ;;  %v5046_v31 = vunpack.i.h.bf16 %v6497_v35  ;;  %v4485_v11 = vld [vmem:[%s6095_s9 + $0xf2] sm:$0xff] }
  0xf2   : > { %9376 = vst [vmem:[#allocation14_spill] sm:$0xff] %v6579_v52  ;;  %v6583_v19 = vpop.permute.xlu1 %5138  ;;  %v6585_v24 = vpop.permute.xlu0 %5133  ;;  %v5076_v45 = vunpack.i.h.bf16 %v6525_v36  ;;  %v5126_v14 = vunpack.i.h.bf16 %v6566_v60 }
  0xf3   : > { %v1310_v23 = vsel %vm1292_vm0, %v6322_v3, %v4996_v42  ;;  %v5000_v3 = vunpack.i.l.bf16 %v6455_v20  ;;  %v5080_v42 = vunpack.i.l.bf16 %v6523_v62 }
  0xf6   : > { %1644 = vmatmul.f32.gmra.mxu0 %v1362_v54  ;;  %v1330_v54 = vsel %vm1325_vm2, %v1297_v7, %v5045_v30 }
  0xf7   : > { %5368 = vrot.lane.b32.xlu2 %v6115_v15, %s6004_s12  ;;  %v4480_v15 = vld [vmem:[%s6095_s9 + $0xb2] sm:$0xff]  ;;  %v1363_v21 = vsel %vm1358_vm1, %v1330_v54, %v5125_v46  ;;  %v5050_v54 = vunpack.i.l.bf16 %v6495_v17 }
  0xf8   : > { %5363 = vrot.lane.b32.xlu1 %v6590_v37, %s6004_s12  ;;  %5358 = vrot.lane.b32.xlu0 %v6117_v16, %s6004_s12  ;;  %v1309_v16 = vsel %vm1292_vm0, %v6319_v2, %v4995_v25  ;;  %v6624_v10 = vpack.i.bf16 %v4480_v15, %v4479_v61  ;;  %v4966_v2 = vunpack.i.h.bf16 %v6375_v49  ;;  %v4489_v25 = vld [vmem:[%s6095_s9 + $0x122] sm:$0xff]  ;;  %v1343_v15 = vsel %vm1325_vm2, %v1310_v23, %v5076_v45 }
  0xf9   : > { %v6607_v12 = vpop.permute.xlu2 %5203  ;;  %v1342_v52 = vsel %vm1325_vm2, %v1309_v16, %v5075_v28  ;;  %v4488_v28 = vld [vmem:[%s6095_s9 + $0x112] sm:$0xff]  ;;  %v4495_v16 = vld [vmem:[%s6095_s9 + $0x16a] sm:$0xff]  ;;  %v5160_v45 = vunpack.i.l.bf16 %v6548_v9 }
  0xfa   : > { %v5154_v29 = vpop.permute.xlu1 %5153  ;;  %v6612_v18 = vpop.permute.xlu0 %5148  ;;  %v1298_v36 = vsel %vm1292_vm0, %v6268_v43, %v4966_v2  ;;  %v4970_v43 = vunpack.i.l.bf16 %v6405_v22  ;;  %v4496_v2 = vld [vmem:[%s6095_s9 + $0x172] sm:$0xff] }
  0xfb   : > { %9377 = vst [vmem:[#allocation15_spill] sm:$0xff] %v6612_v18  ;;  %v5155_v56 = vunpack.i.l.bf16 %v5154_v29  ;;  %v5156_v30 = vunpack.i.h.bf16 %v5154_v29  ;;  %v1331_v60 = vsel %vm1325_vm2, %v1298_v36, %v5046_v31  ;;  %v5130_v31 = vunpack.i.l.bf16 %v6521_v51 }
  0xfc   : > { %v1311_v36 = vsel %vm1292_vm0, %v6311_v63, %v5000_v3  ;;  %v6693_v23 = vpack.i.bf16 %v4496_v2, %v4495_v16  ;;  %v5051_v3 = vunpack.i.h.bf16 %v6495_v17  ;;  %v5081_v16 = vunpack.i.h.bf16 %v6523_v62  ;;  %v4499_v17 = vld [vmem:[%s6095_s9 + $0x19a] sm:$0xff]  ;;  %v6719_v62 = vld [vmem:[%s6095_s9 + $0x32] sm:$0xff] }
  0xfd   : > { %v1375_v18 = vsel %vm1358_vm1, %v1342_v52, %v5155_v56  ;;  %v4487_v52 = vld [vmem:[%s6095_s9 + $0x10a] sm:$0xff]  ;;  %v1364_v56 = vsel %vm1358_vm1, %v1331_v60, %v5126_v14  ;;  %v1376_v7 = vsel %vm1358_vm1, %v1343_v15, %v5156_v30  ;;  %v4491_v14 = vld [vmem:[%s6095_s9 + $0x13a] sm:$0xff]  ;;  %v4492_v30 = vld [vmem:[%s6095_s9 + $0x142] sm:$0xff]  ;;  %v1344_v15 = vsel %vm1325_vm2, %v1311_v36, %v5080_v42 }
  0xfe   : > { %1647 = vmatmul.f32.gmra.mxu0 %v1363_v21  ;;  %1683 = vmatmul.f32.vlgmr.msra.gmra.mxu1 %v1375_v18  ;;  %v4490_v21 = vld [vmem:[%s6095_s9 + $0x12a] sm:$0xff]  ;;  %v6659_v29 = vpack.i.bf16 %v4488_v28, %v4487_v52  ;;  %v6661_v18 = vpack.i.bf16 %v4486_v34, %v4485_v11  ;;  %v4494_v52 = vld [vmem:[%s6095_s9 + $0x15a] sm:$0xff]  ;;  %v1299_v34 = vsel %vm1292_vm0, %v6259_v40, %v4970_v43  ;;  %v5001_v40 = vunpack.i.h.bf16 %v6455_v20 }
  0xff   : > { %5383 = vrot.lane.b32.xlu2 %v6618_v39, %s6004_s12  ;;  %v6655_v61 = vpack.i.bf16 %v4490_v21, %v4489_v25  ;;  %v4493_v25 = vld [vmem:[%s6095_s9 + $0x152] sm:$0xff]  ;;  %v1332_v60 = vsel %vm1325_vm2, %v1299_v34, %v5050_v54  ;;  %v1377_v63 = vsel %vm1358_vm1, %v1344_v15, %v5160_v45  ;;  %v4502_v54 = vld [vmem:[%s6095_s9 + $0x1ba] sm:$0xff]  ;;  %v5131_v20 = vunpack.i.h.bf16 %v6521_v51  ;;  %v4498_v45 = vld [vmem:[%s6095_s9 + $0x18a] sm:$0xff] }
 0x100   : > { %5378 = vrot.lane.b32.xlu1 %v6622_v55, %s6004_s12  ;;  %5373 = vrot.lane.b32.xlu0 %v6624_v10, %s6004_s12  ;;  %v1365_v43 = vsel %vm1358_vm1, %v1332_v60, %v5130_v31  ;;  %v5161_v42 = vunpack.i.h.bf16 %v6548_v9  ;;  %v1312_v51 = vsel %vm1292_vm0, %v6316_v1, %v5001_v40  ;;  %v4500_v9 = vld [vmem:[%s6095_s9 + $0x1a2] sm:$0xff]  ;;  %v2200_v60 = vld [vmem:[%s6095_s9 + $0x3a] sm:$0xff] }
 0x101   : > { %v6642_v49 = vpop.permute.xlu2 %5218  ;;  %v4497_v31 = vld [vmem:[%s6095_s9 + $0x182] sm:$0xff]  ;;  %v1345_v34 = vsel %vm1325_vm2, %v1312_v51, %v5081_v16  ;;  %v6734_v15 = vld [vmem:[%s6095_s9 + $0x4a] sm:$0xff]  ;;  %v5055_v51 = vunpack.i.l.bf16 %v6451_v59 }
 0x102   : > { %v6647_v46 = vpop.permute.xlu1 %5168  ;;  %v6649_v35 = vpop.permute.xlu0 %5163 }
 0x106   : > { %1650 = vmatmul.f32.gmra.mxu0 %v1364_v56  ;;  %1686 = vmatmul.f32.gmra.mxu1 %v1376_v7  ;;  %v6697_v56 = vpack.i.bf16 %v4494_v52, %v4493_v25  ;;  %v6699_v7 = vpack.i.bf16 %v4492_v30, %v4491_v14 }
 0x107   : > { %5398 = vrot.lane.b32.xlu2 %v6655_v61, %s6004_s12 }
 0x108   : > { %5393 = vrot.lane.b32.xlu1 %v6659_v29, %s6004_s12  ;;  %5388 = vrot.lane.b32.xlu0 %v6661_v18, %s6004_s12 }
 0x109   : > { %v6680_v21 = vpop.permute.xlu2 %5233 }
 0x10a   : > { %9378 = vst [vmem:[#allocation16_spill] sm:$0xff] %v6680_v21  ;;  %v6685_v28 = vpop.permute.xlu1 %5183  ;;  %v6687_v11 = vpop.permute.xlu0 %5178  ;;  %v5422_v21 = vpack.i.bf16 %v4500_v9, %v4499_v17  ;;  %v4255_v17 = vld [vmem:[%s6095_s9 + $0x79] sm:$0xff]  ;;  %v5085_v9 = vunpack.i.l.bf16 %v6481_v5 }
 0x10b   : > { %9379 = vst [vmem:[#allocation17_spill] sm:$0xff] %v6685_v28  ;;  %v4971_v28 = vunpack.i.h.bf16 %v6405_v22  ;;  %v4501_v22 = vld [vmem:[%s6095_s9 + $0x1b2] sm:$0xff] }
 0x10c   : > { %v5427_v36 = vpack.i.bf16 %v4502_v54, %v4501_v22 }
 0x10d   : > { %v1300_v25 = vsel %vm1292_vm0, %v6262_v41, %v4971_v28 }
 0x10e   : > { %1653 = vmatmul.f32.gmra.mxu0 %v1365_v43  ;;  %1689 = vmatmul.f32.gmra.mxu1 %v1377_v63  ;;  %v1333_v30 = vsel %vm1325_vm2, %v1300_v25, %v5051_v3  ;;  %v6737_v43 = vld [vmem:[%s6095_s9 + $0x52] sm:$0xff]  ;;  %v5417_v3 = vpack.i.bf16 %v4498_v45, %v4497_v31  ;;  %v2197_v31 = vld [vmem:[%s6095_s9 + $0x1a] sm:$0xff]  ;;  %v5135_v45 = vunpack.i.l.bf16 %v6585_v24 }
 0x10f   : > { %5413 = vrot.lane.b32.xlu2 %v6693_v23, %s6004_s12  ;;  %v1366_v40 = vsel %vm1358_vm1, %v1333_v30, %v5131_v20  ;;  %v4975_v20 = vunpack.i.l.bf16 %v6289_v50  ;;  %v2198_v30 = vld [vmem:[%s6095_s9 + $0x22] sm:$0xff] }
 0x110   : > { %5408 = vrot.lane.b32.xlu1 %v6697_v56, %s6004_s12  ;;  %5403 = vrot.lane.b32.xlu0 %v6699_v7, %s6004_s12 }
 0x111   : > { %v6721_v2 = vpop.permute.xlu2 %5248 }
 0x112   : > { %9380 = vst [vmem:[#allocation18_spill] sm:$0xff] %v6721_v2  ;;  %v5199_v52 = vpop.permute.xlu1 %5198  ;;  %v5194_v14 = vpop.permute.xlu0 %5193  ;;  %v1378_v2 = vsel %vm1358_vm1, %v1345_v34, %v5161_v42  ;;  %v5005_v42 = vunpack.i.l.bf16 %v6453_v13  ;;  %v2195_v34 = vld [vmem:[%s6095_s9 + $0x2] sm:$0xff] }
 0x113   : > { %v5201_v63 = vunpack.i.h.bf16 %v5199_v52  ;;  %v5200_v41 = vunpack.i.l.bf16 %v5199_v52  ;;  %v5196_v28 = vunpack.i.h.bf16 %v5194_v14  ;;  %v5195_v1 = vunpack.i.l.bf16 %v5194_v14 }
 0x114   : > { %v5165_v52 = vunpack.i.l.bf16 %v6649_v35 }
 0x115   : > { %v6743_v16 = vsel %vm1292_vm0, %v6719_v62, %v5195_v1  ;;  %v6746_v22 = vsel %vm1292_vm0, %v2200_v60, %v5196_v28  ;;  %v6750_v54 = vsel %vm1292_vm0, %v6734_v15, %v5200_v41  ;;  %v6754_v25 = vsel %vm1292_vm0, %v6737_v43, %v5201_v63  ;;  %v1521_v41 = vld [vmem:[%s9344_s1 + $0x110] sm:$0xff] }
 0x116   : > { %9381 = vst [vmem:[#allocation19_spill] sm:$0xff] %v6743_v16  ;;  %1656 = vmatmul.f32.gmra.mxu0 %v1366_v40  ;;  %1692 = vmatmul.f32.gmra.mxu1 %v1378_v2  ;;  %v1522_v2 = vld [vmem:[%s9344_s1 + $0x118] sm:$0xff]  ;;  %v1301_v28 = vsel %vm1292_vm0, %v4255_v17, %v4975_v20  ;;  %v1313_v1 = vsel %vm1292_vm0, %v6303_v58, %v5005_v42  ;;  %v1519_v42 = vld [vmem:[%s9344_s1 + $0x100] sm:$0xff] }
 0x117   : > { %5428 = vrot.lane.b32.xlu2 %v5427_v36, %s6004_s12  ;;  %v2196_v36 = vld [vmem:[%s6095_s9 + $0xa] sm:$0xff]  ;;  %1857 = vmatpush.msra.mxu2 %v1522_v2  ;;  %v5442_v40 = vpack.i.bf16 %v2200_v60, %v6719_v62  ;;  %v1346_v16 = vsel %vm1325_vm2, %v1313_v1, %v5085_v9  ;;  %v4976_v62 = vunpack.i.h.bf16 %v6289_v50  ;;  %v5006_v60 = vunpack.i.h.bf16 %v6453_v13 }
 0x118   : > { %5423 = vrot.lane.b32.xlu1 %v5422_v21, %s6004_s12  ;;  %5418 = vrot.lane.b32.xlu0 %v5417_v3, %s6004_s12  ;;  %v1520_v3 = vld [vmem:[%s9344_s1 + $0x108] sm:$0xff]  ;;  %v5432_v20 = vpack.i.bf16 %v2196_v36, %v2195_v34  ;;  %v1379_v58 = vsel %vm1358_vm1, %v1346_v16, %v5165_v52  ;;  %v5056_v9 = vunpack.i.h.bf16 %v6451_v59  ;;  %v5136_v50 = vunpack.i.h.bf16 %v6585_v24 }
 0x119   : > { %v6770_v14 = vpop.permute.xlu2 %5263  ;;  %4883 = vmatpush.msra.mxu3 %v1522_v2  ;;  %1858 = vmatpush.msra.mxu2 %v1521_v41  ;;  %v1334_v2 = vsel %vm1325_vm2, %v1301_v28, %v5055_v51  ;;  %v4503_v51 = vld [vmem:[%s6095_s9 + $0x4b] sm:$0xff]  ;;  %v4256_v16 = vld [vmem:[%s6095_s9 + $0x81] sm:$0xff]  ;;  %v5166_v13 = vunpack.i.h.bf16 %v6649_v35 }
 0x11a   : > { %9382 = vst [vmem:[#allocation20_spill] sm:$0xff] %v6770_v14  ;;  %v6775_v63 = vpop.permute.xlu1 %5213  ;;  %v6777_v21 = vpop.permute.xlu0 %5208  ;;  %v5437_v14 = vpack.i.bf16 %v2198_v30, %v2197_v31  ;;  %v1367_v17 = vsel %vm1358_vm1, %v1334_v2, %v5135_v45  ;;  %v5086_v31 = vunpack.i.h.bf16 %v6481_v5  ;;  %v4268_v45 = vld [vmem:[%s6095_s9 + $0x111] sm:$0xff]  ;;  %v6809_v30 = vld [vmem:[%s6095_s9 + $0x62] sm:$0xff] }
 0x11b   : > { %4884 = vmatpush.msra.mxu3 %v1521_v41  ;;  %1859 = vmatpush.msra.mxu2 %v1520_v3  ;;  %v6812_v59 = vld [vmem:[%s6095_s9 + $0x6a] sm:$0xff]  ;;  %v1314_v24 = vsel %vm1292_vm0, %v4268_v45, %v5006_v60  ;;  %v4703_v28 = vld [vmem:[%s6095_s9 + $0xc2] sm:$0xff]  ;;  %v5090_v45 = vunpack.i.l.bf16 %v6540_v26 }
 0x11c   : > { %v5452_v2 = vpack.i.bf16 %v6812_v59, %v6809_v30 }
 0x11d   : > { %4885 = vmatpush.msra.mxu3 %v1520_v3  ;;  %1860 = vmatpush.msra.mxu2 %v1519_v42  ;;  %v4790_v3 = vld [vmem:[%s9344_s1 + $0x218] sm:$0xff] }
 0x11e   : > { %1659 = vmatmul.f32.gmra.mxu0 %v1367_v17  ;;  %1695 = vmatmul.f32.gmra.mxu1 %v1379_v58 }
 0x11f   : > { %5443 = vrot.lane.b32.xlu2 %v5442_v40, %s6002_s10  ;;  %4535 = vmatmul.msk.f32.vlgmr.msra.gmra.mxu2 %vm1292_vm0, %v4503_v51  ;;  %v1347_v40 = vsel %vm1325_vm2, %v1314_v24, %v5086_v31  ;;  %v5216_v51 = vunpack.i.h.bf16 %v6775_v63  ;;  %v4257_v31 = vld [vmem:[%s6095_s9 + $0x91] sm:$0xff] }
 0x120   : > { %5438 = vrot.lane.b32.xlu1 %v5437_v14, %s6002_s10  ;;  %5433 = vrot.lane.b32.xlu0 %v5432_v20, %s6002_s10  ;;  %v1302_v14 = vsel %vm1292_vm0, %v4256_v16, %v4976_v62  ;;  %v5447_v20 = vpack.i.bf16 %v6737_v43, %v6734_v15  ;;  %v1380_v60 = vsel %vm1358_vm1, %v1347_v40, %v5166_v13  ;;  %v4980_v15 = vunpack.i.l.bf16 %v6313_v0  ;;  %v4504_v43 = vld [vmem:[%s6095_s9 + $0x53] sm:$0xff]  ;;  %v4269_v16 = vld [vmem:[%s6095_s9 + $0x121] sm:$0xff] }
 0x121   : > { %v5279_v52 = vpop.permute.xlu2 %5278  ;;  %4886 = vmatpush.msra.mxu3 %v1519_v42  ;;  %v1335_v1 = vsel %vm1325_vm2, %v1302_v14, %v5056_v9  ;;  %3658 = vmatpush.msrb.mxu2 %v4790_v3  ;;  %v5215_v9 = vunpack.i.l.bf16 %v6775_v63  ;;  %v4384_v13 = vld [vmem:[%s6095_s9 + $0x9a] sm:$0xff]  ;;  %v6863_v14 = vld [vmem:[%s6095_s9 + $0x92] sm:$0xff] }
 0x122   : > { %v5281_v5 = vunpack.i.h.bf16 %v5279_v52  ;;  %v5280_v34 = vunpack.i.l.bf16 %v5279_v52  ;;  %v6815_v36 = vpop.permute.xlu1 %5228  ;;  %v6817_v41 = vpop.permute.xlu0 %5223  ;;  %v1368_v62 = vsel %vm1358_vm1, %v1335_v1, %v5136_v50  ;;  %v4383_v50 = vld [vmem:[%s6095_s9 + $0x92] sm:$0xff]  ;;  %v5140_v52 = vunpack.i.l.bf16 %v6583_v19  ;;  %v6866_v63 = vld [vmem:[%s6095_s9 + $0x9a] sm:$0xff] }
 0x123   : > { %v5225_v35 = vunpack.i.l.bf16 %v6817_v41  ;;  %v1303_v1 = vsel %vm1292_vm0, %v4257_v31, %v4980_v15  ;;  %v5462_v15 = vpack.i.bf16 %v6866_v63, %v6863_v14  ;;  %v5011_v31 = vunpack.i.h.bf16 %v6370_v38 }
 0x124   : > { %v6834_v17 = vsel %vm1325_vm2, %v6750_v54, %v5280_v34  ;;  %v6838_v58 = vsel %vm1325_vm2, %v6754_v25, %v5281_v5  ;;  %v5010_v54 = vunpack.i.l.bf16 %v6370_v38  ;;  %v5060_v25 = vunpack.i.l.bf16 %v6508_v6  ;;  %v4705_v38 = vld [vmem:[%s6095_s9 + $0xda] sm:$0xff] }
 0x125   : > { %9383 = vst [vmem:[#allocation21_spill] sm:$0xff] %v6838_v58  ;;  %v6843_v42 = vsel %vm1292_vm0, %v4703_v28, %v5225_v35  ;;  %v5170_v5 = vunpack.i.l.bf16 %v6647_v46 }
 0x126   : > { %1662 = vmatmul.f32.gmra.mxu0 %v1368_v62  ;;  %1698 = vmatmul.f32.gmra.mxu1 %v1380_v60  ;;  %v1336_v40 = vsel %vm1325_vm2, %v1303_v1, %v5060_v25  ;;  %v1315_v3 = vsel %vm1292_vm0, %v4269_v16, %v5010_v54  ;;  %v1400_v62 = vsel %vm1292_vm0, %v4384_v13, %v5216_v51  ;;  %v4981_v25 = vunpack.i.h.bf16 %v6313_v0  ;;  %v4258_v16 = vld [vmem:[%s6095_s9 + $0x99] sm:$0xff]  ;;  %v4270_v0 = vld [vmem:[%s6095_s9 + $0x129] sm:$0xff] }
 0x127   : > { %5458 = vrot.lane.b32.xlu2 %v6590_v37, %s6002_s10  ;;  %4536 = vmatmul.msk.f32.gmra.mxu2 %vm1292_vm0, %v4504_v43  ;;  %v1348_v60 = vsel %vm1325_vm2, %v1315_v3, %v5090_v45  ;;  %v4505_v45 = vld [vmem:[%s6095_s9 + $0x63] sm:$0xff]  ;;  %v5230_v13 = vunpack.i.l.bf16 %v6815_v36  ;;  %v5015_v3 = vunpack.i.l.bf16 %v6473_v33 }
 0x128   : > { %5453 = vrot.lane.b32.xlu1 %v5452_v2, %s6002_s10  ;;  %5448 = vrot.lane.b32.xlu0 %v5447_v20, %s6002_s10  ;;  %v4789_v2 = vld [vmem:[%s9344_s1 + $0x210] sm:$0xff]  ;;  %v1399_v20 = vsel %vm1292_vm0, %v4383_v50, %v5215_v9  ;;  %v1369_v9 = vsel %vm1358_vm1, %v1336_v40, %v5140_v52  ;;  %v1381_v51 = vsel %vm1358_vm1, %v1348_v60, %v5170_v5  ;;  %v5231_v50 = vunpack.i.h.bf16 %v6815_v36  ;;  %v4706_v5 = vld [vmem:[%s6095_s9 + $0xe2] sm:$0xff] }
 0x129   : > { %v5294_v34 = vpop.permute.xlu2 %5293  ;;  %3659 = vmatpush.msrb.mxu2 %v4789_v2  ;;  %v5091_v52 = vunpack.i.h.bf16 %v6540_v26  ;;  %v1405_v2 = vsel %vm1292_vm0, %v4705_v38, %v5230_v13  ;;  %v5145_v13 = vunpack.i.l.bf16 %v6536_v44 }
 0x12a   : > { %v5296_v37 = vunpack.i.h.bf16 %v5294_v34  ;;  %v5295_v24 = vunpack.i.l.bf16 %v5294_v34  ;;  %v6869_v28 = vpop.permute.xlu1 %5243  ;;  %v6871_v35 = vpop.permute.xlu0 %5238  ;;  %v5061_v34 = vunpack.i.h.bf16 %v6508_v6  ;;  %v4986_v6 = vunpack.i.h.bf16 %v6431_v48 }
 0x12b   : > { %v5246_v38 = vunpack.i.h.bf16 %v6869_v28 }
 0x12c   : > { %v6885_v43 = vsel %vm1325_vm2, %v1399_v20, %v5295_v24  ;;  %v6888_v54 = vsel %vm1325_vm2, %v1400_v62, %v5296_v37  ;;  %v5141_v37 = vunpack.i.h.bf16 %v6583_v19  ;;  %v5171_v24 = vunpack.i.h.bf16 %v6647_v46 }
 0x12d   : > { %v1316_v19 = vsel %vm1292_vm0, %v4270_v0, %v5011_v31  ;;  %v4985_v46 = vunpack.i.l.bf16 %v6431_v48  ;;  %v1406_v20 = vsel %vm1292_vm0, %v4706_v5, %v5231_v50  ;;  %v5065_v48 = vunpack.i.l.bf16 %v6506_v53 }
 0x12e   : > { %1665 = vmatmul.f32.gmra.mxu0 %v1369_v9  ;;  %1701 = vmatmul.f32.gmra.mxu1 %v1381_v51  ;;  %v1349_v60 = vsel %vm1325_vm2, %v1316_v19, %v5091_v52  ;;  %v4990_v50 = vunpack.i.l.bf16 %v6429_v47  ;;  %v5095_v0 = vunpack.i.l.bf16 %v6538_v57  ;;  %v4506_v52 = vld [vmem:[%s6095_s9 + $0x6b] sm:$0xff]  ;;  %v5245_v5 = vunpack.i.l.bf16 %v6869_v28  ;;  %v1518_v28 = vld [vmem:[%s9344_s1 + $0xf8] sm:$0xff] }
 0x12f   : > { %5473 = vrot.lane.b32.xlu2 %v6622_v55, %s6002_s10  ;;  %v1304_v55 = vsel %vm1292_vm0, %v4258_v16, %v4981_v25  ;;  %4537 = vmatmul.msk.f32.gmra.mxu2 %vm1292_vm0, %v4505_v45  ;;  %v4260_v25 = vld [vmem:[%s6095_s9 + $0xb1] sm:$0xff]  ;;  %v1382_v16 = vsel %vm1358_vm1, %v1349_v60, %v5171_v24  ;;  %v4271_v45 = vld [vmem:[%s6095_s9 + $0x139] sm:$0xff]  ;;  %v5146_v19 = vunpack.i.h.bf16 %v6536_v44 }
 0x130   : > { %5468 = vrot.lane.b32.xlu1 %v6624_v10, %s6002_s10  ;;  %5463 = vrot.lane.b32.xlu0 %v5462_v15, %s6002_s10  ;;  %v1337_v62 = vsel %vm1325_vm2, %v1304_v55, %v5061_v34  ;;  %v4259_v15 = vld [vmem:[%s6095_s9 + $0xa9] sm:$0xff]  ;;  %v1306_v24 = vsel %vm1292_vm0, %v4260_v25, %v4986_v6  ;;  %v5070_v55 = vunpack.i.l.bf16 %v6469_v8 }
 0x131   : > { %v5309_v36 = vpop.permute.xlu2 %5308  ;;  %v1370_v31 = vsel %vm1358_vm1, %v1337_v62, %v5141_v37  ;;  %v4788_v34 = vld [vmem:[%s9344_s1 + $0x208] sm:$0xff]  ;;  %v1305_v37 = vsel %vm1292_vm0, %v4259_v15, %v4985_v46  ;;  %1732 = vmatpush.msrb.mxu1 %v1518_v28  ;;  %v5176_v62 = vunpack.i.h.bf16 %v6562_v4 }
 0x132   : > { %v5311_v26 = vunpack.i.h.bf16 %v5309_v36  ;;  %v5310_v1 = vunpack.i.l.bf16 %v5309_v36  ;;  %v6913_v10 = vpop.permute.xlu1 %5258  ;;  %v6915_v40 = vpop.permute.xlu0 %5253  ;;  %3660 = vmatpush.msrb.mxu2 %v4788_v34  ;;  %v4395_v36 = vld [vmem:[%s6095_s9 + $0x122] sm:$0xff]  ;;  %v4396_v6 = vld [vmem:[%s6095_s9 + $0x12a] sm:$0xff]  ;;  %v4381_v34 = vld [vmem:[%s6095_s9 + $0x7a] sm:$0xff] }
 0x133   : > { %v4272_v15 = vld [vmem:[%s6095_s9 + $0x141] sm:$0xff]  ;;  %v1411_v25 = vsel %vm1292_vm0, %v4395_v36, %v5245_v5  ;;  %v5210_v5 = vunpack.i.l.bf16 %v6777_v21  ;;  %v5261_v28 = vunpack.i.h.bf16 %v6913_v10 }
 0x134   : > { %v6927_v9 = vsel %vm1325_vm2, %v1405_v2, %v5310_v1  ;;  %v6930_v51 = vsel %vm1325_vm2, %v1406_v20, %v5311_v26  ;;  %v5016_v26 = vunpack.i.h.bf16 %v6473_v33  ;;  %v5066_v1 = vunpack.i.h.bf16 %v6506_v53  ;;  %v4521_v36 = vld [vmem:[%s6095_s9 + $0x123] sm:$0xff] }
 0x135   : > { %v5096_v33 = vunpack.i.h.bf16 %v6538_v57  ;;  %v5175_v53 = vunpack.i.l.bf16 %v6562_v4  ;;  %4553 = vmatmul.msk.f32.vlgmr.msra.gmra.mxu3 %vm1292_vm0, %v4521_v36  ;;  %v1397_v36 = vsel %vm1292_vm0, %v4381_v34, %v5210_v5 }
 0x136   : > { %1668 = vmatmul.f32.gmra.mxu0 %v1370_v31  ;;  %1704 = vmatmul.f32.gmra.mxu1 %v1382_v16  ;;  %v5206_v31 = vunpack.i.h.bf16 %v6607_v12  ;;  %v5205_v16 = vunpack.i.l.bf16 %v6607_v12 }
 0x137   : > { %5488 = vrot.lane.b32.xlu2 %v6659_v29, %s6002_s10  ;;  %v1317_v29 = vsel %vm1292_vm0, %v4271_v45, %v5015_v3  ;;  %4538 = vmatmul.msk.f32.gmra.mxu2 %vm1292_vm0, %v4506_v52  ;;  %v4379_v45 = vld [vmem:[%s6095_s9 + $0x62] sm:$0xff]  ;;  %v5211_v52 = vunpack.i.h.bf16 %v6777_v21  ;;  %v1339_v21 = vsel %vm1325_vm2, %v1306_v24, %v5066_v1 }
 0x138   : > { %5483 = vrot.lane.b32.xlu1 %v6661_v18, %s6002_s10  ;;  %5478 = vrot.lane.b32.xlu0 %v6618_v39, %s6002_s10  ;;  %v1338_v18 = vsel %vm1325_vm2, %v1305_v37, %v5065_v48  ;;  %v1350_v57 = vsel %vm1325_vm2, %v1317_v29, %v5095_v0  ;;  %v1412_v48 = vsel %vm1292_vm0, %v4396_v6, %v5246_v38  ;;  %v6993_v37 = vld [vmem:[%s6095_s9 + $0x1c] sm:$0xff]  ;;  %v5260_v6 = vunpack.i.l.bf16 %v6913_v10 }
 0x139   : > { %v5324_v46 = vpop.permute.xlu2 %5323  ;;  %v1371_v44 = vsel %vm1358_vm1, %v1338_v18, %v5145_v13  ;;  %v4380_v13 = vld [vmem:[%s6095_s9 + $0x6a] sm:$0xff]  ;;  %v1383_v38 = vsel %vm1358_vm1, %v1350_v57, %v5175_v53  ;;  %v4382_v29 = vld [vmem:[%s6095_s9 + $0x82] sm:$0xff]  ;;  %v1318_v53 = vsel %vm1292_vm0, %v4272_v15, %v5016_v26  ;;  %v5100_v10 = vunpack.i.l.bf16 %v6491_v27 }
 0x13a   : > { %v5326_v39 = vunpack.i.h.bf16 %v5324_v46  ;;  %v5325_v3 = vunpack.i.l.bf16 %v5324_v46  ;;  %v6967_v2 = vpop.permute.xlu1 %5273  ;;  %v6969_v20 = vpop.permute.xlu0 %5268  ;;  %v7006_v46 = vld [vmem:[%s6095_s9 + $0x24] sm:$0xff]  ;;  %v1372_v24 = vsel %vm1358_vm1, %v1339_v21, %v5146_v19  ;;  %v1351_v26 = vsel %vm1325_vm2, %v1318_v53, %v5096_v33  ;;  %v4507_v1 = vld [vmem:[%s6095_s9 + $0x7b] sm:$0xff]  ;;  %v1517_v19 = vld [vmem:[%s9344_s1 + $0xf0] sm:$0xff] }
 0x13b   : > { %v5276_v60 = vunpack.i.h.bf16 %v6967_v2  ;;  %v4787_v18 = vld [vmem:[%s9344_s1 + $0x200] sm:$0xff]  ;;  %v9384_v57 = vld [vmem:[#allocation15_spill] sm:$0xff]  ;;  %v4794_v33 = vld [vmem:[%s9344_s1 + $0x238] sm:$0xff]  ;;  %v1395_v15 = vsel %vm1292_vm0, %v4379_v45, %v5205_v16  ;;  %v1398_v21 = vsel %vm1292_vm0, %v4382_v29, %v5211_v52  ;;  %1733 = vmatpush.msrb.mxu1 %v1517_v19 }
 0x13c   : > { %v6984_v0 = vsel %vm1325_vm2, %v1411_v25, %v5325_v3  ;;  %v6987_v4 = vsel %vm1325_vm2, %v1412_v48, %v5326_v39  ;;  %v5020_v39 = vunpack.i.l.bf16 %v6471_v32  ;;  %v4401_v3 = vld [vmem:[%s6095_s9 + $0x16a] sm:$0xff]  ;;  %v1396_v25 = vsel %vm1292_vm0, %v4380_v13, %v5206_v31  ;;  %3661 = vmatpush.msrb.mxu2 %v4787_v18  ;;  %3783 = vmatpush.msrb.mxu0 %v4794_v33  ;;  %v7070_v33 = vld [vmem:[%s6095_s9 + $0xb2] sm:$0xff] }
 0x13d   : > { %v6998_v12 = vsel %vm1325_vm2, %v6746_v22, %v5276_v60  ;;  %v4774_v22 = vld [vmem:[%s9344_s1 + $0x198] sm:$0xff]  ;;  %v5150_v60 = vunpack.i.l.bf16 %v9384_v57  ;;  %v5221_v48 = vunpack.i.h.bf16 %v6642_v49  ;;  %v1516_v45 = vld [vmem:[%s9344_s1 + $0xe8] sm:$0xff]  ;;  %v1417_v13 = vsel %vm1292_vm0, %v4401_v3, %v5260_v6 }
 0x13e   : > { %1671 = vmatmul.f32.gmra.mxu0 %v1371_v44  ;;  %1707 = vmatmul.f32.gmra.mxu1 %v1383_v38  ;;  %v4402_v44 = vld [vmem:[%s6095_s9 + $0x172] sm:$0xff]  ;;  %v2227_v38 = vld [vmem:[%s6095_s9 + $0x4] sm:$0xff]  ;;  %v5220_v18 = vunpack.i.l.bf16 %v6642_v49 }
 0x13f   : > { %5503 = vrot.lane.b32.xlu2 %v6697_v56, %s6002_s10  ;;  %v1384_v56 = vsel %vm1358_vm1, %v1351_v26, %v5176_v62  ;;  %v2228_v62 = vld [vmem:[%s6095_s9 + $0xc] sm:$0xff]  ;;  %3545 = vmatpush.msrb.mxu3 %v4774_v22 }
 0x140   : > { %5498 = vrot.lane.b32.xlu1 %v6699_v7, %s6002_s10  ;;  %5493 = vrot.lane.b32.xlu0 %v6655_v61, %s6002_s10  ;;  %v5517_v61 = vpack.i.bf16 %v7006_v46, %v6993_v37  ;;  %v1418_v37 = vsel %vm1292_vm0, %v4402_v44, %v5261_v28  ;;  %v4261_v46 = vld [vmem:[%s6095_s9 + $0xc1] sm:$0xff]  ;;  %v4773_v22 = vld [vmem:[%s9344_s1 + $0x190] sm:$0xff] }
 0x141   : > { %v5339_v7 = vpop.permute.xlu2 %5338  ;;  %4539 = vmatmul.msk.f32.gmra.mxu2 %vm1292_vm0, %v4507_v1  ;;  %v5512_v1 = vpack.i.bf16 %v2228_v62, %v2227_v38  ;;  %v4273_v19 = vld [vmem:[%s6095_s9 + $0x151] sm:$0xff]  ;;  %1734 = vmatpush.msrb.mxu1 %v1516_v45  ;;  %v1515_v28 = vld [vmem:[%s9344_s1 + $0xe0] sm:$0xff] }
 0x142   : > { %v5341_v53 = vunpack.i.h.bf16 %v5339_v7  ;;  %v5340_v26 = vunpack.i.l.bf16 %v5339_v7  ;;  %v5289_v16 = vpop.permute.xlu1 %5288  ;;  %v5284_v31 = vpop.permute.xlu0 %5283  ;;  %3546 = vmatpush.msrb.mxu3 %v4773_v22  ;;  %v7067_v44 = vld [vmem:[%s6095_s9 + $0xaa] sm:$0xff]  ;;  %v1402_v22 = vsel %vm1292_vm0, %v7070_v33, %v5221_v48 }
 0x143   : > { %v5291_v34 = vunpack.i.h.bf16 %v5289_v16  ;;  %v5290_v52 = vunpack.i.l.bf16 %v5289_v16  ;;  %v5286_v5 = vunpack.i.h.bf16 %v5284_v31  ;;  %v5285_v29 = vunpack.i.l.bf16 %v5284_v31  ;;  %v2235_v16 = vld [vmem:[%s6095_s9 + $0x64] sm:$0xff]  ;;  %v2233_v45 = vld [vmem:[%s6095_s9 + $0x4c] sm:$0xff]  ;;  %1735 = vmatpush.msrb.mxu1 %v1515_v28  ;;  %v4274_v31 = vld [vmem:[%s6095_s9 + $0x159] sm:$0xff] }
 0x144   : > { %v7061_v6 = vsel %vm1325_vm2, %v1417_v13, %v5340_v26  ;;  %v7064_v3 = vsel %vm1325_vm2, %v1418_v37, %v5341_v53  ;;  %v4991_v53 = vunpack.i.h.bf16 %v6429_v47  ;;  %v4508_v13 = vld [vmem:[%s6095_s9 + $0x83] sm:$0xff] }
 0x145   : > { %v7073_v7 = vsel %vm1325_vm2, %v1395_v15, %v5285_v29  ;;  %v7076_v38 = vsel %vm1325_vm2, %v1396_v25, %v5286_v5  ;;  %v7079_v62 = vsel %vm1325_vm2, %v1397_v36, %v5290_v52  ;;  %v7082_v26 = vsel %vm1325_vm2, %v1398_v21, %v5291_v34  ;;  %v4522_v25 = vld [vmem:[%s6095_s9 + $0x12b] sm:$0xff]  ;;  %v1514_v36 = vld [vmem:[%s9344_s1 + $0xd8] sm:$0xff] }
 0x146   : > { %9385 = vst [vmem:[#allocation15_spill] sm:$0xff] %v7073_v7  ;;  %1674 = vmatmul.f32.gmra.mxu0 %v1372_v24  ;;  %1710 = vmatmul.f32.gmra.mxu1 %v1384_v56  ;;  %v1307_v15 = vsel %vm1292_vm0, %v4261_v46, %v4990_v50  ;;  %v5021_v21 = vunpack.i.h.bf16 %v6471_v32  ;;  %v1319_v50 = vsel %vm1292_vm0, %v4273_v19, %v5020_v39  ;;  %v2236_v56 = vld [vmem:[%s6095_s9 + $0x6c] sm:$0xff]  ;;  %v5101_v34 = vunpack.i.h.bf16 %v6491_v27  ;;  %v2234_v29 = vld [vmem:[%s6095_s9 + $0x54] sm:$0xff]  ;;  %v2232_v46 = vld [vmem:[%s6095_s9 + $0x3c] sm:$0xff] }
 0x147   : > { %9386 = vst [vmem:[#allocation22_spill] sm:$0xff] %v7076_v38  ;;  %5518 = vrot.lane.b32.xlu2 %v5517_v61, %s6003_s11  ;;  %v1340_v24 = vsel %vm1325_vm2, %v1307_v15, %v5070_v55  ;;  %v7106_v37 = vld [vmem:[%s6095_s9 + $0xca] sm:$0xff]  ;;  %v5180_v61 = vunpack.i.l.bf16 %v6687_v11  ;;  %v5226_v52 = vunpack.i.h.bf16 %v6817_v41  ;;  %v1352_v32 = vsel %vm1325_vm2, %v1319_v50, %v5100_v10  ;;  %v4786_v55 = vld [vmem:[%s9344_s1 + $0x1f8] sm:$0xff]  ;;  %4554 = vmatmul.msk.f32.gmra.mxu3 %vm1292_vm0, %v4522_v25 }
 0x148   : > { %9387 = vst [vmem:[#allocation23_spill] sm:$0xff] %v7079_v62  ;;  %5513 = vrot.lane.b32.xlu1 %v5512_v1, %s6003_s11  ;;  %5508 = vrot.lane.b32.xlu0 %v6693_v23, %s6002_s10  ;;  %v1513_v39 = vld [vmem:[%s9344_s1 + $0xd0] sm:$0xff]  ;;  %v5151_v5 = vunpack.i.h.bf16 %v9384_v57  ;;  %v1373_v23 = vsel %vm1358_vm1, %v1340_v24, %v5150_v60  ;;  %v1401_v10 = vsel %vm1292_vm0, %v7067_v44, %v5220_v18  ;;  %v5181_v19 = vunpack.i.h.bf16 %v6687_v11  ;;  %v1512_v18 = vld [vmem:[%s9344_s1 + $0xc8] sm:$0xff] }
 0x149   : > { %v7124_v41 = vpop.permute.xlu2 %5353  ;;  %v2231_v27 = vld [vmem:[%s6095_s9 + $0x34] sm:$0xff]  ;;  %1736 = vmatpush.msrb.mxu1 %v1514_v36  ;;  %v7142_v25 = vpack.i.bf16 %v2236_v56, %v2235_v16  ;;  %4540 = vmatmul.msk.f32.gmra.mxu2 %vm1292_vm0, %v4508_v13  ;;  %v4262_v50 = vld [vmem:[%s6095_s9 + $0xc9] sm:$0xff]  ;;  %v1385_v16 = vsel %vm1358_vm1, %v1352_v32, %v5180_v61  ;;  %v7154_v56 = vpack.i.bf16 %v2234_v29, %v2233_v45 }
 0x14a   : > { %v9388_v1 = vld [vmem:[#allocation16_spill] sm:$0xff]  ;;  %v5304_v28 = vpop.permute.xlu1 %5303  ;;  %v5299_v15 = vpop.permute.xlu0 %5298  ;;  %3662 = vmatpush.msrb.mxu2 %v4786_v55  ;;  %v4772_v11 = vld [vmem:[%s9344_s1 + $0x188] sm:$0xff]  ;;  %v7156_v13 = vpack.i.bf16 %v2232_v46, %v2231_v27  ;;  %v1404_v55 = vsel %vm1292_vm0, %v7106_v37, %v5226_v52  ;;  %v4392_v29 = vld [vmem:[%s6095_s9 + $0xfa] sm:$0xff]  ;;  %v5240_v52 = vunpack.i.l.bf16 %v6871_v35  ;;  %v1308_v27 = vsel %vm1292_vm0, %v4262_v50, %v4991_v53 }
 0x14b   : > { %v5236_v57 = vunpack.i.h.bf16 %v9388_v1  ;;  %v5235_v60 = vunpack.i.l.bf16 %v9388_v1  ;;  %v5306_v49 = vunpack.i.h.bf16 %v5304_v28  ;;  %v5305_v36 = vunpack.i.l.bf16 %v5304_v28  ;;  %1737 = vmatpush.msrb.mxu1 %v1513_v39  ;;  %3547 = vmatpush.msrb.mxu3 %v4772_v11  ;;  %v1511_v1 = vld [vmem:[%s9344_s1 + $0xc0] sm:$0xff]  ;;  %v7164_v39 = vld [vmem:[%s6095_s9 + $0xf2] sm:$0xff]  ;;  %v4275_v7 = vld [vmem:[%s6095_s9 + $0x169] sm:$0xff] }
 0x14c   : > { %v5301_v48 = vunpack.i.h.bf16 %v5299_v15  ;;  %v5300_v24 = vunpack.i.l.bf16 %v5299_v15  ;;  %v1320_v46 = vsel %vm1292_vm0, %v4274_v31, %v5021_v21  ;;  %v9389_v15 = vld [vmem:[#allocation10_spill] sm:$0xff]  ;;  %v4509_v21 = vld [vmem:[%s6095_s9 + $0x93] sm:$0xff]  ;;  %v5241_v11 = vunpack.i.h.bf16 %v6871_v35 }
 0x14d   : > { %1738 = vmatpush.msrb.mxu1 %v1512_v18  ;;  %v7174_v61 = vsel %vm1325_vm2, %v6843_v42, %v5305_v36  ;;  %v7177_v32 = vsel %vm1325_vm2, %v1404_v55, %v5306_v49  ;;  %v1510_v42 = vld [vmem:[%s9344_s1 + $0xb8] sm:$0xff]  ;;  %v5025_v18 = vunpack.i.l.bf16 %v9389_v15  ;;  %v1353_v47 = vsel %vm1325_vm2, %v1320_v46, %v5101_v34  ;;  %v7198_v53 = vld [vmem:[%s6095_s9 + $0x60] sm:$0xff]  ;;  %v7201_v31 = vld [vmem:[%s6095_s9 + $0x68] sm:$0xff] }
 0x14e   : > { %v7167_v28 = vsel %vm1325_vm2, %v1401_v10, %v5300_v24  ;;  %v7170_v45 = vsel %vm1325_vm2, %v1402_v22, %v5301_v48  ;;  %1677 = vmatmul.f32.gmra.mxu0 %v1373_v23  ;;  %1713 = vmatmul.f32.gmra.mxu1 %v1385_v16  ;;  %v4523_v10 = vld [vmem:[%s6095_s9 + $0x13b] sm:$0xff]  ;;  %v4393_v22 = vld [vmem:[%s6095_s9 + $0x10a] sm:$0xff]  ;;  %v9390_v23 = vunpack.i.h.bf16 %v6469_v8  ;;  %v1386_v35 = vsel %vm1358_vm1, %v1353_v47, %v5181_v19 }
 0x14f   : > { %5533 = vrot.lane.b32.xlu2 %v7142_v25, %s6003_s11  ;;  %1739 = vmatpush.msrb.mxu1 %v1511_v1  ;;  %v9391_v36 = vld [vmem:[#allocation13_spill] sm:$0xff]  ;;  %v1509_v34 = vld [vmem:[%s9344_s1 + $0xb0] sm:$0xff]  ;;  %v9393_v1 = vld [vmem:[#allocation18_spill] sm:$0xff]  ;;  %v5547_v19 = vpack.i.bf16 %v7201_v31, %v7198_v53 }
 0x150   : > { %v1341_v49 = vsel %vm1325_vm2, %v1308_v27, %v9390_v23  ;;  %v5105_v48 = vunpack.i.l.bf16 %v9391_v36  ;;  %v9392_v24 = vld [vmem:[#allocation17_spill] sm:$0xff]  ;;  %5528 = vrot.lane.b32.xlu1 %v7154_v56, %s6003_s11  ;;  %5523 = vrot.lane.b32.xlu0 %v7156_v13, %s6003_s11  ;;  %v4785_v16 = vld [vmem:[%s9344_s1 + $0x1f0] sm:$0xff]  ;;  %v1408_v23 = vsel %vm1292_vm0, %v4392_v29, %v5236_v57  ;;  %v5250_v50 = vunpack.i.l.bf16 %v9393_v1 }
 0x151   : > { %v1374_v8 = vsel %vm1358_vm1, %v1341_v49, %v5151_v5  ;;  %v7219_v27 = vpop.permute.xlu2 %5368  ;;  %v4567_v46 = vld [vmem:[%s6095_s9 + $0x30] sm:$0xff]  ;;  %4555 = vmatmul.msk.f32.gmra.mxu3 %vm1292_vm0, %v4523_v10  ;;  %1740 = vmatpush.msrb.mxu1 %v1510_v42  ;;  %v1407_v5 = vsel %vm1292_vm0, %v7164_v39, %v5235_v60  ;;  %v1508_v10 = vld [vmem:[%s9344_s1 + $0xa8] sm:$0xff]  ;;  %v1409_v60 = vsel %vm1292_vm0, %v4393_v22, %v5240_v52  ;;  %v1507_v52 = vld [vmem:[%s9344_s1 + $0xa0] sm:$0xff] }
 0x152   : > { %9394 = vst [vmem:[#allocation16_spill] sm:$0xff] %v7219_v27  ;;  %v4394_v49 = vld [vmem:[%s6095_s9 + $0x112] sm:$0xff]  ;;  %v5371_v62 = vunpack.i.h.bf16 %v7219_v27  ;;  %v5319_v55 = vpop.permute.xlu1 %5318  ;;  %v5314_v38 = vpop.permute.xlu0 %5313  ;;  %4541 = vmatmul.msk.f32.gmra.mxu2 %vm1292_vm0, %v4509_v21  ;;  %v4771_v27 = vld [vmem:[%s9344_s1 + $0x180] sm:$0xff]  ;;  %v5255_v21 = vunpack.i.l.bf16 %v6915_v40  ;;  %v5537_v58 = vpack.i.bf16 %v6809_v30, %v4567_v46 }
 0x153   : > { %v5321_v42 = vunpack.i.h.bf16 %v5319_v55  ;;  %v5320_v57 = vunpack.i.l.bf16 %v5319_v55  ;;  %v5316_v29 = vunpack.i.h.bf16 %v5314_v38  ;;  %v5315_v47 = vunpack.i.l.bf16 %v5314_v38  ;;  %1741 = vmatpush.msrb.mxu1 %v1509_v34  ;;  %3663 = vmatpush.msrb.mxu2 %v4785_v16  ;;  %v4524_v46 = vld [vmem:[%s6095_s9 + $0x143] sm:$0xff] }
 0x154   : > { %3548 = vmatpush.msrb.mxu3 %v4771_v27  ;;  %v7248_v38 = vsel %vm1358_vm1, %v7082_v26, %v5371_v62  ;;  %v1410_v22 = vsel %vm1292_vm0, %v4394_v49, %v5241_v11  ;;  %v4397_v27 = vld [vmem:[%s6095_s9 + $0x13a] sm:$0xff]  ;;  %v4398_v62 = vld [vmem:[%s6095_s9 + $0x142] sm:$0xff]  ;;  %v5256_v26 = vunpack.i.h.bf16 %v6915_v40  ;;  %v1321_v11 = vsel %vm1292_vm0, %v4275_v7, %v5025_v18 }
 0x155   : > { %1742 = vmatpush.msrb.mxu1 %v1508_v10  ;;  %v7252_v34 = vsel %vm1325_vm2, %v1407_v5, %v5315_v47  ;;  %v7255_v16 = vsel %vm1325_vm2, %v1408_v23, %v5316_v29  ;;  %v7258_v30 = vsel %vm1325_vm2, %v1409_v60, %v5320_v57  ;;  %v7261_v55 = vsel %vm1325_vm2, %v1410_v22, %v5321_v42  ;;  %v1506_v5 = vld [vmem:[%s9344_s1 + $0x98] sm:$0xff] }
 0x156   : > { %1680 = vmatmul.f32.gmra.mxu0 %v1374_v8  ;;  %1716 = vmatmul.f32.gmra.mxu1 %v1386_v35  ;;  %v4399_v23 = vld [vmem:[%s6095_s9 + $0x152] sm:$0xff]  ;;  %v5026_v49 = vunpack.i.h.bf16 %v9389_v15  ;;  %v1354_v10 = vsel %vm1325_vm2, %v1321_v11, %v5105_v48  ;;  %v4510_v40 = vld [vmem:[%s6095_s9 + $0x9b] sm:$0xff]  ;;  %v5106_v35 = vunpack.i.h.bf16 %v9391_v36  ;;  %v5186_v7 = vunpack.i.h.bf16 %v9392_v24 }
 0x157   : > { %5548 = vrot.lane.b32.xlu2 %v5547_v19, %s6003_s11  ;;  %1743 = vmatpush.msrb.mxu1 %v1507_v52  ;;  %v4400_v8 = vld [vmem:[%s6095_s9 + $0x15a] sm:$0xff]  ;;  %v9395_v15 = vunpack.i.l.bf16 %v9392_v24  ;;  %v1505_v48 = vld [vmem:[%s9344_s1 + $0x90] sm:$0xff]  ;;  %v1413_v36 = vsel %vm1292_vm0, %v4397_v27, %v5250_v50  ;;  %v4784_v24 = vld [vmem:[%s9344_s1 + $0x1e8] sm:$0xff]  ;;  %v9397_v47 = vunpack.i.h.bf16 %v9393_v1  ;;  %v1415_v50 = vsel %vm1292_vm0, %v4399_v23, %v5255_v21 }
 0x158   : > { %5543 = vrot.lane.b32.xlu1 %v7156_v13, %s6002_s10  ;;  %5538 = vrot.lane.b32.xlu0 %v5537_v58, %s6004_s12  ;;  %v4770_v19 = vld [vmem:[%s9344_s1 + $0x178] sm:$0xff]  ;;  %v4569_v58 = vld [vmem:[%s6095_s9 + $0x48] sm:$0xff]  ;;  %v5270_v22 = vunpack.i.l.bf16 %v6969_v20  ;;  %v1416_v1 = vsel %vm1292_vm0, %v4400_v8, %v5256_v26 }
 0x159   : > { %v1387_v18 = vsel %vm1358_vm1, %v1354_v10, %v9395_v15  ;;  %v9396_v60 = vld [vmem:[#allocation20_spill] sm:$0xff]  ;;  %v5384_v57 = vpop.permute.xlu2 %5383  ;;  %4556 = vmatmul.msk.f32.gmra.mxu3 %vm1292_vm0, %v4524_v46  ;;  %1744 = vmatpush.msrb.mxu1 %v1506_v5  ;;  %v1414_v52 = vsel %vm1292_vm0, %v4398_v62, %v9397_v47  ;;  %v1504_v46 = vld [vmem:[%s9344_s1 + $0x88] sm:$0xff] }
 0x15a   : > { %v5266_v42 = vunpack.i.h.bf16 %v9396_v60  ;;  %v5265_v13 = vunpack.i.l.bf16 %v9396_v60  ;;  %v4568_v29 = vld [vmem:[%s6095_s9 + $0x38] sm:$0xff]  ;;  %v5386_v27 = vunpack.i.h.bf16 %v5384_v57  ;;  %v5385_v11 = vunpack.i.l.bf16 %v5384_v57  ;;  %v5334_v10 = vpop.permute.xlu1 %5333  ;;  %v5329_v15 = vpop.permute.xlu0 %5328  ;;  %4542 = vmatmul.msk.f32.gmra.mxu2 %vm1292_vm0, %v4510_v40  ;;  %3549 = vmatpush.msrb.mxu3 %v4770_v19  ;;  %v1503_v19 = vld [vmem:[%s9344_s1 + $0x80] sm:$0xff] }
 0x15b   : > { %v5336_v5 = vunpack.i.h.bf16 %v5334_v10  ;;  %v5335_v62 = vunpack.i.l.bf16 %v5334_v10  ;;  %v5331_v60 = vunpack.i.h.bf16 %v5329_v15  ;;  %v5330_v21 = vunpack.i.l.bf16 %v5329_v15  ;;  %v4276_v23 = vld [vmem:[%s6095_s9 + $0x171] sm:$0xff]  ;;  %1745 = vmatpush.msrb.mxu1 %v1505_v48  ;;  %3664 = vmatpush.msrb.mxu2 %v4784_v24  ;;  %v5901_v57 = vld [vmem:[%s6095_s9 + $0x7a] sm:$0xff]  ;;  %v4406_v10 = vld [vmem:[%s6095_s9 + $0x1a2] sm:$0xff] }
 0x15c   : > { %v5557_v47 = vpack.i.bf16 %v5901_v57, %v4569_v58  ;;  %v5552_v40 = vpack.i.bf16 %v6812_v59, %v4568_v29  ;;  %v7318_v26 = vsel %vm1358_vm1, %v7174_v61, %v5385_v11  ;;  %v7322_v8 = vsel %vm1358_vm1, %v7177_v32, %v5386_v27  ;;  %v4403_v61 = vld [vmem:[%s6095_s9 + $0x182] sm:$0xff]  ;;  %v4525_v27 = vld [vmem:[%s6095_s9 + $0x153] sm:$0xff] }
 0x15d   : > { %1746 = vmatpush.msrb.mxu1 %v1504_v46  ;;  %v7325_v48 = vsel %vm1325_vm2, %v1413_v36, %v5330_v21  ;;  %v7328_v59 = vsel %vm1325_vm2, %v1414_v52, %v5331_v60  ;;  %v7331_v58 = vsel %vm1325_vm2, %v1415_v50, %v5335_v62  ;;  %v7334_v29 = vsel %vm1325_vm2, %v1416_v1, %v5336_v5  ;;  %v4404_v36 = vld [vmem:[%s6095_s9 + $0x18a] sm:$0xff]  ;;  %v4405_v11 = vld [vmem:[%s6095_s9 + $0x19a] sm:$0xff] }
 0x15e   : > { %v5271_v24 = vunpack.i.h.bf16 %v6969_v20  ;;  %1719 = vmatmul.f32.gmra.mxu1 %v1387_v18  ;;  %v1322_v32 = vsel %vm1292_vm0, %v4276_v23, %v5026_v49  ;;  %v4511_v50 = vld [vmem:[%s6095_s9 + $0xab] sm:$0xff]  ;;  %v7360_v15 = vld [vmem:[%s6095_s9 + $0x78] sm:$0xff]  ;;  %v7363_v46 = vld [vmem:[%s6095_s9 + $0x80] sm:$0xff]  ;;  %v1420_v1 = vsel %vm1292_vm0, %v4404_v36, %v5266_v42  ;;  %v1421_v5 = vsel %vm1292_vm0, %v4405_v11, %v5270_v22 }
 0x15f   : > { %5563 = vrot.lane.b32.xlu2 %v7154_v56, %s6002_s10  ;;  %v1355_v52 = vsel %vm1325_vm2, %v1322_v32, %v5106_v35  ;;  %1747 = vmatpush.msrb.mxu1 %v1503_v19  ;;  %v4769_v49 = vld [vmem:[%s9344_s1 + $0x170] sm:$0xff]  ;;  %v5577_v57 = vpack.i.bf16 %v6863_v14, %v7198_v53  ;;  %v4783_v42 = vld [vmem:[%s9344_s1 + $0x1e0] sm:$0xff]  ;;  %v5567_v14 = vpack.i.bf16 %v7363_v46, %v7360_v15 }
 0x160   : > { %5558 = vrot.lane.b32.xlu1 %v5557_v47, %s6004_s12  ;;  %5553 = vrot.lane.b32.xlu0 %v5552_v40, %s6004_s12  ;;  %v1388_v20 = vsel %vm1358_vm1, %v1355_v52, %v5186_v7  ;;  %v7356_v18 = vld [vmem:[%s9344_s1 + $0x230] sm:$0xff]  ;;  %v1419_v7 = vsel %vm1292_vm0, %v4403_v61, %v5265_v13  ;;  %v1422_v47 = vsel %vm1292_vm0, %v4406_v10, %v5271_v24  ;;  %v5902_v22 = vld [vmem:[%s6095_s9 + $0x82] sm:$0xff] }
 0x161   : > { %v5399_v56 = vpop.permute.xlu2 %5398  ;;  %v4570_v35 = vld [vmem:[%s6095_s9 + $0x50] sm:$0xff]  ;;  %4557 = vmatmul.msk.f32.gmra.mxu3 %vm1292_vm0, %v4525_v27  ;;  %3784 = vmatpush.msrb.mxu0 %v7356_v18 }
 0x162   : > { %v5401_v62 = vunpack.i.h.bf16 %v5399_v56  ;;  %v5400_v60 = vunpack.i.l.bf16 %v5399_v56  ;;  %v5349_v21 = vpop.permute.xlu1 %5348  ;;  %v5344_v23 = vpop.permute.xlu0 %5343  ;;  %4543 = vmatmul.msk.f32.gmra.mxu2 %vm1292_vm0, %v4511_v50  ;;  %3550 = vmatpush.msrb.mxu3 %v4769_v49  ;;  %v5572_v32 = vpack.i.bf16 %v5902_v22, %v4570_v35  ;;  %v9398_v50 = vld [vmem:[#allocation11_spill] sm:$0xff]  ;;  %v4512_v49 = vld [vmem:[%s6095_s9 + $0xb3] sm:$0xff] }
 0x163   : > { %v5351_v40 = vunpack.i.h.bf16 %v5349_v21  ;;  %v5350_v13 = vunpack.i.l.bf16 %v5349_v21  ;;  %v5346_v19 = vunpack.i.h.bf16 %v5344_v23  ;;  %v5345_v61 = vunpack.i.l.bf16 %v5344_v23  ;;  %3665 = vmatpush.msrb.mxu2 %v4783_v42  ;;  %v9399_v56 = vld [vmem:[#allocation12_spill] sm:$0xff] }
 0x164   : > { %v7382_v53 = vsel %vm1358_vm1, %v7258_v30, %v5400_v60  ;;  %v7386_v24 = vsel %vm1358_vm1, %v7261_v55, %v5401_v62  ;;  %v4526_v30 = vld [vmem:[%s6095_s9 + $0x15b] sm:$0xff]  ;;  %v4768_v55 = vld [vmem:[%s9344_s1 + $0x168] sm:$0xff]  ;;  %v5030_v10 = vunpack.i.l.bf16 %v9398_v50  ;;  %v5110_v35 = vunpack.i.l.bf16 %v9399_v56  ;;  %v7413_v62 = vld [vmem:[%s6095_s9 + $0x90] sm:$0xff] }
 0x165   : > { %v7389_v27 = vsel %vm1325_vm2, %v1419_v7, %v5345_v61  ;;  %v7392_v36 = vsel %vm1325_vm2, %v1420_v1, %v5346_v19  ;;  %v7395_v11 = vsel %vm1325_vm2, %v1421_v5, %v5350_v13  ;;  %v7398_v52 = vsel %vm1325_vm2, %v1422_v47, %v5351_v40  ;;  %3551 = vmatpush.msrb.mxu3 %v4768_v55  ;;  %v4277_v7 = vld [vmem:[%s6095_s9 + $0x181] sm:$0xff]  ;;  %v7416_v60 = vld [vmem:[%s6095_s9 + $0x98] sm:$0xff] }
 0x166   : > { %1722 = vmatmul.f32.gmra.mxu1 %v1388_v20  ;;  %v9400_v1 = vld [vmem:[#allocation14_spill] sm:$0xff]  ;;  %v5031_v40 = vunpack.i.h.bf16 %v9398_v50  ;;  %v1323_v13 = vsel %vm1292_vm0, %v4277_v7, %v5030_v10  ;;  %v5592_v19 = vpack.i.bf16 %v6866_v63, %v7201_v31  ;;  %v4782_v61 = vld [vmem:[%s9344_s1 + $0x1d8] sm:$0xff]  ;;  %v5587_v22 = vpack.i.bf16 %v7416_v60, %v7413_v62  ;;  %v4527_v50 = vld [vmem:[%s6095_s9 + $0x16b] sm:$0xff] }
 0x167   : > { %5578 = vrot.lane.b32.xlu2 %v5577_v57, %s6004_s12  ;;  %v5190_v20 = vunpack.i.l.bf16 %v9400_v1  ;;  %v1356_v42 = vsel %vm1325_vm2, %v1323_v13, %v5110_v35  ;;  %3666 = vmatpush.msrb.mxu2 %v4782_v61  ;;  %v5111_v63 = vunpack.i.h.bf16 %v9399_v56  ;;  %v5191_v55 = vunpack.i.h.bf16 %v9400_v1  ;;  %v7452_v10 = vld [vmem:[%s6095_s9 + $0xa8] sm:$0xff]  ;;  %v7464_v1 = vld [vmem:[%s6095_s9 + $0x7c] sm:$0xff] }
 0x168   : > { %5573 = vrot.lane.b32.xlu1 %v5572_v32, %s6004_s12  ;;  %5568 = vrot.lane.b32.xlu0 %v5567_v14, %s6003_s11 }
 0x169   : > { %v5414_v5 = vpop.permute.xlu2 %5413  ;;  %4558 = vmatmul.msk.f32.gmra.mxu3 %vm1292_vm0, %v4526_v30  ;;  %v1389_v31 = vsel %vm1358_vm1, %v1356_v42, %v5190_v20  ;;  %v4278_v30 = vld [vmem:[%s6095_s9 + $0x189] sm:$0xff] }
 0x16a   : > { %v5416_v21 = vunpack.i.h.bf16 %v5414_v5  ;;  %v5415_v23 = vunpack.i.l.bf16 %v5414_v5  ;;  %v7419_v57 = vpop.permute.xlu1 %5363  ;;  %v7421_v47 = vpop.permute.xlu0 %5358  ;;  %4544 = vmatmul.msk.f32.gmra.mxu2 %vm1292_vm0, %v4512_v49  ;;  %v4513_v49 = vld [vmem:[%s6095_s9 + $0xc3] sm:$0xff]  ;;  %v1324_v56 = vsel %vm1292_vm0, %v4278_v30, %v5031_v40  ;;  %v5597_v30 = vpack.i.bf16 %v7067_v44, %v7360_v15 }
 0x16b   : > { %v1357_v7 = vsel %vm1325_vm2, %v1324_v56, %v5111_v63  ;;  %v7467_v20 = vld [vmem:[%s6095_s9 + $0x84] sm:$0xff]  ;;  %v4781_v63 = vld [vmem:[%s9344_s1 + $0x1d0] sm:$0xff]  ;;  %v7515_v56 = vld [vmem:[%s6095_s9 + $0x9c] sm:$0xff] }
 0x16c   : > { %v7436_v32 = vsel %vm1358_vm1, %v7331_v58, %v5415_v23  ;;  %v7440_v14 = vsel %vm1358_vm1, %v7334_v29, %v5416_v21  ;;  %v4767_v58 = vld [vmem:[%s9344_s1 + $0x160] sm:$0xff]  ;;  %v7455_v29 = vld [vmem:[%s6095_s9 + $0xb0] sm:$0xff]  ;;  %3667 = vmatpush.msrb.mxu2 %v4781_v63 }
 0x16d   : > { %9401 = vst [vmem:[#allocation10_spill] sm:$0xff] %v7436_v32  ;;  %3552 = vmatpush.msrb.mxu3 %v4767_v58  ;;  %v5903_v63 = vld [vmem:[%s6095_s9 + $0xc2] sm:$0xff] }
 0x16e   : > { %9402 = vst [vmem:[#allocation13_spill] sm:$0xff] %v7440_v14  ;;  %1725 = vmatmul.f32.gmra.mxu1 %v1389_v31  ;;  %v5602_v31 = vpack.i.bf16 %v7467_v20, %v7464_v1 }
 0x16f   : > { %5593 = vrot.lane.b32.xlu2 %v5592_v19, %s6004_s12  ;;  %v1390_v19 = vsel %vm1358_vm1, %v1357_v7, %v5191_v55 }
 0x170   : > { %5588 = vrot.lane.b32.xlu1 %v5587_v22, %s6003_s11  ;;  %5583 = vrot.lane.b32.xlu0 %v7142_v25, %s6002_s10  ;;  %v5607_v25 = vpack.i.bf16 %v7455_v29, %v7452_v10 }
 0x171   : > { %v5429_v35 = vpop.permute.xlu2 %5428  ;;  %4559 = vmatmul.msk.f32.gmra.mxu3 %vm1292_vm0, %v4527_v50 }
 0x172   : > { %v5431_v5 = vunpack.i.h.bf16 %v5429_v35  ;;  %v5430_v21 = vunpack.i.l.bf16 %v5429_v35  ;;  %v5379_v23 = vpop.permute.xlu1 %5378  ;;  %v5374_v13 = vpop.permute.xlu0 %5373  ;;  %4545 = vmatmul.msk.f32.gmra.mxu2 %vm1292_vm0, %v4513_v49  ;;  %v5355_v35 = vunpack.i.l.bf16 %v7124_v41 }
 0x173   : > { %v5381_v40 = vunpack.i.h.bf16 %v5379_v23  ;;  %v5380_v61 = vunpack.i.l.bf16 %v5379_v23  ;;  %v5376_v42 = vunpack.i.h.bf16 %v5374_v13  ;;  %v5375_v22 = vunpack.i.l.bf16 %v5374_v13 }
 0x174   : > { %v7483_v55 = vsel %vm1358_vm1, %v7395_v11, %v5430_v21  ;;  %v7487_v50 = vsel %vm1358_vm1, %v7398_v52, %v5431_v5  ;;  %v5275_v11 = vunpack.i.l.bf16 %v6967_v2  ;;  %v4528_v52 = vld [vmem:[%s6095_s9 + $0x173] sm:$0xff]  ;;  %v9405_v5 = vld [vmem:[#allocation19_spill] sm:$0xff] }
 0x175   : > { %9403 = vst [vmem:[#allocation17_spill] sm:$0xff] %v7483_v55  ;;  %v7491_v58 = vsel %vm1358_vm1, %v6885_v43, %v5375_v22  ;;  %v7495_v49 = vsel %vm1358_vm1, %v6888_v54, %v5376_v42  ;;  %v7499_v44 = vsel %vm1358_vm1, %v7167_v28, %v5380_v61  ;;  %v7503_v15 = vsel %vm1358_vm1, %v7170_v45, %v5381_v40  ;;  %v4766_v43 = vld [vmem:[%s9344_s1 + $0x158] sm:$0xff]  ;;  %v4514_v28 = vld [vmem:[%s6095_s9 + $0xcb] sm:$0xff] }
 0x176   : > { %9404 = vst [vmem:[#allocation18_spill] sm:$0xff] %v7487_v50  ;;  %1728 = vmatmul.f32.gmra.mxu1 %v1390_v19  ;;  %v7512_v54 = vld [vmem:[%s6095_s9 + $0x94] sm:$0xff]  ;;  %3553 = vmatpush.msrb.mxu3 %v4766_v43  ;;  %v1423_v21 = vsel %vm1325_vm2, %v9405_v5, %v5275_v11 }
 0x177   : > { %5608 = vrot.lane.b32.xlu2 %v5607_v25, %s6003_s11  ;;  %v5622_v23 = vpack.i.bf16 %v7515_v56, %v7512_v54  ;;  %v4765_v42 = vld [vmem:[%s9344_s1 + $0x150] sm:$0xff]  ;;  %v1455_v22 = vsel %vm1358_vm1, %v1423_v21, %v5355_v35  ;;  %v7575_v35 = vld [vmem:[%s6095_s9 + $0xc0] sm:$0xff] }
 0x178   : > { %5603 = vrot.lane.b32.xlu1 %v5602_v31, %s6002_s10  ;;  %5598 = vrot.lane.b32.xlu0 %v5597_v30, %s6004_s12  ;;  %v5617_v31 = vpack.i.bf16 %v5903_v63, %v7413_v62  ;;  %v5612_v30 = vpack.i.bf16 %v7070_v33, %v7363_v46  ;;  %v4529_v33 = vld [vmem:[%s6095_s9 + $0x183] sm:$0xff]  ;;  %v7561_v46 = vld [vmem:[%s6095_s9 + $0xd8] sm:$0xff] }
 0x179   : > { %v7521_v2 = vpop.permute.xlu2 %5443  ;;  %4560 = vmatmul.msk.f32.gmra.mxu3 %vm1292_vm0, %v4528_v52  ;;  %v5637_v5 = vpack.i.bf16 %v7561_v46, %v7464_v1  ;;  %v5632_v1 = vpack.i.bf16 %v7106_v37, %v7416_v60  ;;  %v4530_v60 = vld [vmem:[%s6095_s9 + $0x18b] sm:$0xff] }
 0x17a   : > { %v5394_v45 = vpop.permute.xlu1 %5393  ;;  %v5389_v7 = vpop.permute.xlu0 %5388  ;;  %4546 = vmatmul.msk.f32.gmra.mxu2 %vm1292_vm0, %v4514_v28  ;;  %3554 = vmatpush.msrb.mxu3 %v4765_v42  ;;  %v5356_v28 = vunpack.i.h.bf16 %v7124_v41  ;;  %v7804_v55 = vld [vmem:[%s6095_s9 + $0x110] sm:$0xff] }
 0x17b   : > { %v5396_v13 = vunpack.i.h.bf16 %v5394_v45  ;;  %v5395_v19 = vunpack.i.l.bf16 %v5394_v45  ;;  %v5391_v25 = vunpack.i.h.bf16 %v5389_v7  ;;  %v5390_v40 = vunpack.i.l.bf16 %v5389_v7  ;;  %v7529_v61 = vpop.f32.mrf.mxu1  ;;  %v7578_v45 = vld [vmem:[%s6095_s9 + $0xc8] sm:$0xff] }
 0x17c   : > { %9406 = vst [vmem:[#allocation20_spill] sm:$0xff] %v7529_v61  ;;  %v1456_v42 = vsel %vm1358_vm1, %v6998_v12, %v5356_v28  ;;  %v2172_v61 = vld [vmem:[%s6095_s9 + $0x68] sm:$0xff] }
 0x17d   : > { %v7541_v11 = vsel %vm1358_vm1, %v6927_v9, %v5390_v40  ;;  %v7545_v52 = vsel %vm1358_vm1, %v6930_v51, %v5391_v25  ;;  %v7549_v43 = vsel %vm1358_vm1, %v7252_v34, %v5395_v19  ;;  %v7553_v62 = vsel %vm1358_vm1, %v7255_v16, %v5396_v13  ;;  %v4780_v9 = vld [vmem:[%s9344_s1 + $0x1c8] sm:$0xff]  ;;  %v4515_v51 = vld [vmem:[%s6095_s9 + $0xdb] sm:$0xff] }
 0x17e   : > { %1748 = vmatmul.f32.vlgmr.msrb.gmra.mxu1 %v1455_v22  ;;  %3668 = vmatpush.msrb.mxu2 %v4780_v9  ;;  %v7570_v34 = vld [vmem:[%s9344_s1 + $0x228] sm:$0xff]  ;;  %v5627_v22 = vpack.i.bf16 %v7578_v45, %v7575_v35  ;;  %v7630_v9 = vld [vmem:[%s6095_s9 + $0xb4] sm:$0xff] }
 0x17f   : > { %5623 = vrot.lane.b32.xlu2 %v5622_v23, %s6002_s10  ;;  %3785 = vmatpush.msrb.mxu0 %v7570_v34  ;;  %v4764_v40 = vld [vmem:[%s9344_s1 + $0x148] sm:$0xff] }
 0x180   : > { %5618 = vrot.lane.b32.xlu1 %v5617_v31, %s6004_s12  ;;  %5613 = vrot.lane.b32.xlu0 %v5612_v30, %s6004_s12  ;;  %v7618_v30 = vld [vmem:[%s6095_s9 + $0xe0] sm:$0xff] }
 0x181   : > { %v7572_v16 = vpop.permute.xlu2 %5458  ;;  %4561 = vmatmul.msk.f32.gmra.mxu3 %vm1292_vm0, %v4529_v33  ;;  %v5360_v33 = vunpack.i.l.bf16 %v7421_v47 }
 0x182   : > { %v5409_v41 = vpop.permute.xlu1 %5408  ;;  %v5404_v7 = vpop.permute.xlu0 %5403  ;;  %4547 = vmatmul.msk.f32.gmra.mxu2 %vm1292_vm0, %v4515_v51  ;;  %3555 = vmatpush.msrb.mxu3 %v4764_v40 }
 0x183   : > { %v5411_v21 = vunpack.i.h.bf16 %v5409_v41  ;;  %v5410_v23 = vunpack.i.l.bf16 %v5409_v41  ;;  %v5406_v13 = vunpack.i.h.bf16 %v5404_v7  ;;  %v5405_v19 = vunpack.i.l.bf16 %v5404_v7  ;;  %v7585_v25 = vpop.f32.mrf.mxu1 }
 0x184   : > { %9407 = vst [vmem:[#allocation11_spill] sm:$0xff] %v7585_v25  ;;  %v5652_v41 = vpack.i.bf16 %v7618_v30, %v7467_v20  ;;  %v1457_v40 = vsel %vm1358_vm1, %v6834_v17, %v5360_v33  ;;  %v7678_v33 = vld [vmem:[%s6095_s9 + $0xf0] sm:$0xff] }
 0x185   : > { %v7598_v63 = vsel %vm1358_vm1, %v6984_v0, %v5405_v19  ;;  %v7602_v31 = vsel %vm1358_vm1, %v6987_v4, %v5406_v13  ;;  %v7606_v12 = vsel %vm1358_vm1, %v7325_v48, %v5410_v23  ;;  %v7610_v37 = vsel %vm1358_vm1, %v7328_v59, %v5411_v21  ;;  %v4779_v0 = vld [vmem:[%s9344_s1 + $0x1c0] sm:$0xff]  ;;  %v7627_v59 = vld [vmem:[%s6095_s9 + $0xac] sm:$0xff] }
 0x186   : > { %9408 = vst [vmem:[#allocation12_spill] sm:$0xff] %v7602_v31  ;;  %1751 = vmatmul.f32.gmra.mxu1 %v1456_v42  ;;  %3669 = vmatpush.msrb.mxu2 %v4779_v0  ;;  %v4516_v4 = vld [vmem:[%s6095_s9 + $0xe3] sm:$0xff]  ;;  %v5647_v20 = vpack.i.bf16 %v7630_v9, %v7627_v59  ;;  %v5904_v42 = vld [vmem:[%s6095_s9 + $0xda] sm:$0xff] }
 0x187   : > { %9409 = vst [vmem:[#allocation14_spill] sm:$0xff] %v7606_v12  ;;  %5638 = vrot.lane.b32.xlu2 %v5637_v5, %s6003_s11  ;;  %v4763_v19 = vld [vmem:[%s9344_s1 + $0x140] sm:$0xff] }
 0x188   : > { %9410 = vst [vmem:[#allocation19_spill] sm:$0xff] %v7610_v37  ;;  %5633 = vrot.lane.b32.xlu1 %v5632_v1, %s6004_s12  ;;  %5628 = vrot.lane.b32.xlu0 %v5627_v22, %s6003_s11  ;;  %v5642_v1 = vpack.i.bf16 %v5904_v42, %v7452_v10  ;;  %v4531_v10 = vld [vmem:[%s6095_s9 + $0x19b] sm:$0xff] }
 0x189   : > { %v7624_v48 = vpop.permute.xlu2 %5473  ;;  %4562 = vmatmul.msk.f32.gmra.mxu3 %vm1292_vm0, %v4530_v60  ;;  %v4518_v42 = vld [vmem:[%s6095_s9 + $0xfb] sm:$0xff] }
 0x18a   : > { %9411 = vst [vmem:[#allocation24_spill] sm:$0xff] %v7624_v48  ;;  %v5424_v51 = vpop.permute.xlu1 %5423  ;;  %v5419_v28 = vpop.permute.xlu0 %5418  ;;  %4548 = vmatmul.msk.f32.gmra.mxu2 %vm1292_vm0, %v4516_v4  ;;  %3556 = vmatpush.msrb.mxu3 %v4763_v19  ;;  %v4778_v4 = vld [vmem:[%s9344_s1 + $0x1b8] sm:$0xff] }
 0x18b   : > { %v5426_v7 = vunpack.i.h.bf16 %v5424_v51  ;;  %v5425_v5 = vunpack.i.l.bf16 %v5424_v51  ;;  %v5421_v21 = vunpack.i.h.bf16 %v5419_v28  ;;  %v5420_v23 = vunpack.i.l.bf16 %v5419_v28  ;;  %v7636_v13 = vpop.f32.mrf.mxu1  ;;  %3670 = vmatpush.msrb.mxu2 %v4778_v4  ;;  %v7717_v4 = vld [vmem:[%s6095_s9 + $0xc4] sm:$0xff] }
 0x18c   : > { %9412 = vst [vmem:[#allocation25_spill] sm:$0xff] %v7636_v13  ;;  %v4534_v13 = vld [vmem:[%s6095_s9 + $0x1bb] sm:$0xff] }
 0x18d   : > { %v7649_v22 = vsel %vm1358_vm1, %v7061_v6, %v5420_v23  ;;  %v7653_v60 = vsel %vm1358_vm1, %v7064_v3, %v5421_v21  ;;  %v7657_v0 = vsel %vm1358_vm1, %v7389_v27, %v5425_v5  ;;  %v7661_v17 = vsel %vm1358_vm1, %v7392_v36, %v5426_v7  ;;  %v4517_v6 = vld [vmem:[%s6095_s9 + $0xf3] sm:$0xff]  ;;  %v5905_v5 = vld [vmem:[%s6095_s9 + $0xe2] sm:$0xff] }
 0x18e   : > { %9413 = vst [vmem:[#allocation26_spill] sm:$0xff] %v7649_v22  ;;  %1754 = vmatmul.f32.gmra.mxu1 %v1457_v40  ;;  %v4762_v3 = vld [vmem:[%s9344_s1 + $0x138] sm:$0xff]  ;;  %v5361_v27 = vunpack.i.h.bf16 %v7421_v47  ;;  %v5667_v47 = vpack.i.bf16 %v7164_v39, %v7575_v35  ;;  %v5662_v7 = vpack.i.bf16 %v7678_v33, %v7512_v54  ;;  %v5657_v21 = vpack.i.bf16 %v5905_v5, %v7455_v29  ;;  %v4532_v40 = vld [vmem:[%s6095_s9 + $0x1a3] sm:$0xff]  ;;  %v4761_v39 = vld [vmem:[%s9344_s1 + $0x130] sm:$0xff]  ;;  %v7708_v54 = vpop.f32.mrf.mxu0 }
 0x18f   : > { %9414 = vst [vmem:[#allocation27_spill] sm:$0xff] %v7653_v60  ;;  %5653 = vrot.lane.b32.xlu2 %v5652_v41, %s6003_s11  ;;  %3557 = vmatpush.msrb.mxu3 %v4762_v3  ;;  %v9419_v23 = vld [vmem:[#allocation21_spill] sm:$0xff]  ;;  %v4777_v29 = vld [vmem:[%s9344_s1 + $0x1b0] sm:$0xff]  ;;  %v5365_v35 = vunpack.i.l.bf16 %v7419_v57 }
 0x190   : > { %9415 = vst [vmem:[#allocation28_spill] sm:$0xff] %v7657_v0  ;;  %5648 = vrot.lane.b32.xlu1 %v5647_v20, %s6002_s10  ;;  %5643 = vrot.lane.b32.xlu0 %v5642_v1, %s6004_s12  ;;  %v1458_v19 = vsel %vm1358_vm1, %v9419_v23, %v5361_v27  ;;  %v4708_v20 = vld [vmem:[%s6095_s9 + $0xfa] sm:$0xff]  ;;  %v9422_v23 = vld [vmem:[#allocation15_spill] sm:$0xff]  ;;  %v4599_v22 = vld [vmem:[%s6095_s9 + $0x32] sm:$0xff] }
 0x191   : > { %9416 = vst [vmem:[#allocation29_spill] sm:$0xff] %v7661_v17  ;;  %v7675_v36 = vpop.permute.xlu2 %5488  ;;  %4563 = vmatmul.msk.f32.gmra.mxu3 %vm1292_vm0, %v4531_v10  ;;  %v7714_v10 = vld [vmem:[%s6095_s9 + $0xf8] sm:$0xff]  ;;  %3671 = vmatpush.msrb.mxu2 %v4777_v29  ;;  %v7757_v29 = vld [vmem:[%s9344_s1 + $0x220] sm:$0xff] }
 0x192   : > { %9417 = vst [vmem:[#allocation30_spill] sm:$0xff] %v7675_v36  ;;  %v7681_v51 = vpop.permute.xlu1 %5438  ;;  %v7683_v28 = vpop.permute.xlu0 %5433  ;;  %4549 = vmatmul.msk.f32.gmra.mxu2 %vm1292_vm0, %v4517_v6  ;;  %v7720_v6 = vld [vmem:[%s6095_s9 + $0xcc] sm:$0xff]  ;;  %3558 = vmatpush.msrb.mxu3 %v4761_v39  ;;  %v5677_v5 = vpack.i.bf16 %v7714_v10, %v7515_v56 }
 0x193   : > { %v7686_v41 = vpop.f32.mrf.mxu1  ;;  %v4519_v56 = vld [vmem:[%s6095_s9 + $0x10b] sm:$0xff]  ;;  %3786 = vmatpush.msrb.mxu0 %v7757_v29 }
 0x194   : > { %9418 = vst [vmem:[#allocation31_spill] sm:$0xff] %v7686_v41  ;;  %v4776_v39 = vld [vmem:[%s9344_s1 + $0x1a8] sm:$0xff] }
 0x195   : > { %3672 = vmatpush.msrb.mxu2 %v4776_v39 }
 0x196   : > { %1757 = vmatmul.f32.gmra.mxu1 %v1458_v19  ;;  %v1459_v19 = vsel %vm1358_vm1, %v9422_v23, %v5365_v35  ;;  %v5366_v35 = vunpack.i.h.bf16 %v7419_v57  ;;  %v4709_v23 = vld [vmem:[%s6095_s9 + $0x10a] sm:$0xff]  ;;  %v7773_v57 = vpop.f32.mrf.mxu0 }
 0x197   : > { %5668 = vrot.lane.b32.xlu2 %v5667_v47, %s6004_s12 }
 0x198   : > { %5663 = vrot.lane.b32.xlu1 %v5662_v7, %s6003_s11  ;;  %5658 = vrot.lane.b32.xlu0 %v5657_v21, %s6004_s12  ;;  %v5682_v7 = vpack.i.bf16 %v4708_v20, %v7578_v45  ;;  %v5672_v21 = vpack.i.bf16 %v7720_v6, %v7717_v4  ;;  %v7743_v45 = vld [vmem:[%s6095_s9 + $0xdc] sm:$0xff]  ;;  %v7746_v20 = vld [vmem:[%s6095_s9 + $0xe4] sm:$0xff] }
 0x199   : > { %v7711_v1 = vpop.permute.xlu2 %5503  ;;  %4564 = vmatmul.msk.f32.gmra.mxu3 %vm1292_vm0, %v4532_v40  ;;  %v4533_v40 = vld [vmem:[%s6095_s9 + $0x1b3] sm:$0xff] }
 0x19a   : > { %9420 = vst [vmem:[#allocation21_spill] sm:$0xff] %v7711_v1  ;;  %v7723_v3 = vpop.permute.xlu1 %5453  ;;  %v7725_v27 = vpop.permute.xlu0 %5448  ;;  %4550 = vmatmul.msk.f32.gmra.mxu2 %vm1292_vm0, %v4518_v42  ;;  %v4760_v42 = vld [vmem:[%s9344_s1 + $0x128] sm:$0xff]  ;;  %v5697_v1 = vpack.i.bf16 %v7746_v20, %v7743_v45 }
 0x19b   : > { %v7728_v47 = vpop.f32.mrf.mxu1  ;;  %3559 = vmatpush.msrb.mxu3 %v4760_v42  ;;  %v5456_v25 = vunpack.i.h.bf16 %v7723_v3 }
 0x19c   : > { %9421 = vst [vmem:[#allocation32_spill] sm:$0xff] %v7728_v47  ;;  %v9426_v47 = vld [vmem:[#allocation22_spill] sm:$0xff] }
 0x19d   : > { %v1460_v41 = vsel %vm1358_vm1, %v9426_v47, %v5366_v35  ;;  %v4710_v47 = vld [vmem:[%s6095_s9 + $0x112] sm:$0xff] }
 0x19e   : > { %1760 = vmatmul.f32.gmra.mxu1 %v1459_v19  ;;  %v7764_v19 = vld [vmem:[%s6095_s9 + $0x108] sm:$0xff]  ;;  %v9427_v35 = vld [vmem:[#allocation16_spill] sm:$0xff] }
 0x19f   : > { %5683 = vrot.lane.b32.xlu2 %v5682_v7, %s6004_s12  ;;  %v5687_v39 = vpack.i.bf16 %v7764_v19, %v7627_v59  ;;  %v4520_v59 = vld [vmem:[%s6095_s9 + $0x113] sm:$0xff]  ;;  %v5370_v36 = vunpack.i.l.bf16 %v9427_v35 }
 0x1a0   : > { %5678 = vrot.lane.b32.xlu1 %v5677_v5, %s6003_s11  ;;  %5673 = vrot.lane.b32.xlu0 %v5672_v21, %s6002_s10 }
 0x1a1   : > { %v7760_v7 = vpop.permute.xlu2 %5518  ;;  %4565 = vmatmul.msk.f32.gmra.mxu3 %vm1292_vm0, %v4533_v40  ;;  %v5692_v40 = vpack.i.bf16 %v4709_v23, %v7561_v46  ;;  %v5455_v46 = vunpack.i.l.bf16 %v7723_v3  ;;  %v2171_v23 = vld [vmem:[%s6095_s9 + $0x60] sm:$0xff] }
 0x1a2   : > { %v7767_v5 = vpop.permute.xlu1 %5468  ;;  %v7769_v21 = vpop.permute.xlu0 %5463  ;;  %4551 = vmatmul.msk.f32.gmra.mxu2 %vm1292_vm0, %v4519_v56 }
 0x1a3   : > { %9423 = vst [vmem:[#allocation15_spill] sm:$0xff] %v7767_v5  ;;  %v7775_v42 = vpop.f32.mrf.mxu1  ;;  %v7782_v56 = vpop.f32.mrf.mxu2 }
 0x1a4   : > { %9424 = vst [vmem:[#allocation33_spill] sm:$0xff] %v7769_v21 }
 0x1a5   : > { %9425 = vst [vmem:[#allocation34_spill] sm:$0xff] %v7775_v42  ;;  %v4759_v42 = vld [vmem:[%s9344_s1 + $0x120] sm:$0xff] }
 0x1a6   : > { %1763 = vmatmul.f32.gmra.mxu1 %v1460_v41  ;;  %3560 = vmatpush.msrb.mxu3 %v4759_v42  ;;  %v7799_v41 = vld [vmem:[%s6095_s9 + $0x120] sm:$0xff] }
 0x1a7   : > { %5698 = vrot.lane.b32.xlu2 %v5697_v1, %s6002_s10 }
 0x1a8   : > { %5693 = vrot.lane.b32.xlu1 %v5692_v40, %s6004_s12  ;;  %5688 = vrot.lane.b32.xlu0 %v5687_v39, %s6003_s11  ;;  %v5906_v40 = vld [vmem:[%s9344_s1 + $0x238] sm:$0xff]  ;;  %v7815_v39 = vpop.f32.mrf.mxu0 }
 0x1a9   : > { %v5534_v50 = vpop.permute.xlu2 %5533  ;;  %4566 = vmatmul.msk.f32.gmra.mxu3 %vm1292_vm0, %v4534_v13  ;;  %v5712_v13 = vpack.i.bf16 %v7799_v41, %v7717_v4 }
 0x1aa   : > { %v5536_v3 = vunpack.i.h.bf16 %v5534_v50  ;;  %v5535_v1 = vunpack.i.l.bf16 %v5534_v50  ;;  %v7807_v42 = vpop.permute.xlu1 %5483  ;;  %v7809_v17 = vpop.permute.xlu0 %5478  ;;  %4552 = vmatmul.msk.f32.gmra.mxu2 %vm1292_vm0, %v4520_v59  ;;  %4887 = vmatpush.msra.mxu3 %v5906_v40  ;;  %v5707_v50 = vpack.i.bf16 %v4710_v47, %v7618_v30  ;;  %v3228_v59 = vsel %vm1292_vm0, %v2171_v23, %v5455_v46  ;;  %v9431_v47 = vld [vmem:[#allocation23_spill] sm:$0xff] }
 0x1ab   : > { %9428 = vst [vmem:[#allocation22_spill] sm:$0xff] %v7807_v42  ;;  %v7817_v35 = vpop.f32.mrf.mxu1  ;;  %v4775_v42 = vld [vmem:[%s9344_s1 + $0x1a0] sm:$0xff]  ;;  %v3229_v40 = vsel %vm1292_vm0, %v2172_v61, %v5456_v25  ;;  %v7829_v0 = vpop.f32.mrf.mxu2  ;;  %v1461_v46 = vsel %vm1358_vm1, %v9431_v47, %v5370_v36  ;;  %v7845_v61 = vld [vmem:[%s6095_s9 + $0x128] sm:$0xff]  ;;  %v7848_v25 = vld [vmem:[%s6095_s9 + $0xf4] sm:$0xff] }
 0x1ac   : > { %9429 = vst [vmem:[#allocation16_spill] sm:$0xff] %v7809_v17  ;;  %3673 = vmatpush.msrb.mxu2 %v4775_v42  ;;  %v7832_v30 = vsel %vm1325_vm2, %v3228_v59, %v5535_v1  ;;  %4888 = vmatpush.msra.mxu3 %v7356_v18  ;;  %v7836_v4 = vsel %vm1325_vm2, %v3229_v40, %v5536_v3  ;;  %v7851_v18 = vld [vmem:[%s6095_s9 + $0xfc] sm:$0xff]  ;;  %v4712_v59 = vld [vmem:[%s6095_s9 + $0x12a] sm:$0xff] }
 0x1ad   : > { %9430 = vst [vmem:[#allocation35_spill] sm:$0xff] %v7817_v35  ;;  %v5702_v35 = vpack.i.bf16 %v7804_v55, %v7630_v9  ;;  %v4711_v9 = vld [vmem:[%s6095_s9 + $0x122] sm:$0xff]  ;;  %v5727_v3 = vpack.i.bf16 %v7845_v61, %v7720_v6  ;;  %v5722_v1 = vpack.i.bf16 %v7851_v18, %v7848_v25  ;;  %v7877_v6 = vld [vmem:[%s6095_s9 + $0x138] sm:$0xff] }
 0x1ae   : > { %1766 = vmatmul.f32.gmra.mxu1 %v1461_v46  ;;  %4889 = vmatpush.msra.mxu3 %v7570_v34  ;;  %v5717_v42 = vpack.i.bf16 %v4711_v9, %v7678_v33  ;;  %v5737_v46 = vpack.i.bf16 %v7877_v6, %v7743_v45  ;;  %v5732_v9 = vpack.i.bf16 %v4712_v59, %v7714_v10  ;;  %v7905_v45 = vld [vmem:[%s6095_s9 + $0x10c] sm:$0xff]  ;;  %v7908_v10 = vld [vmem:[%s6095_s9 + $0x114] sm:$0xff] }
 0x1af   : > { %5713 = vrot.lane.b32.xlu2 %v5712_v13, %s6003_s11 }
 0x1b0   : > { %5708 = vrot.lane.b32.xlu1 %v5707_v50, %s6004_s12  ;;  %5703 = vrot.lane.b32.xlu0 %v5702_v35, %s6003_s11  ;;  %v7868_v13 = vpop.f32.mrf.mxu0  ;;  %v4727_v50 = vld [vmem:[%s6095_s9 + $0x64] sm:$0xff] }
 0x1b1   : > { %4890 = vmatpush.msra.mxu3 %v7757_v29  ;;  %v4713_v29 = vld [vmem:[%s6095_s9 + $0x13a] sm:$0xff]  ;;  %4795 = vmatmul.msk.f32.vlgmr.msrb.gmra.mxu0 %vm1292_vm0, %v4727_v50  ;;  %v4728_v50 = vld [vmem:[%s6095_s9 + $0x6c] sm:$0xff] }
 0x1b2   : > { %v7855_v34 = vpop.permute.xlu1 %5498  ;;  %v7857_v36 = vpop.permute.xlu0 %5493  ;;  %v5742_v47 = vpack.i.bf16 %v4713_v29, %v7764_v19  ;;  %v7902_v19 = vld [vmem:[%s6095_s9 + $0x140] sm:$0xff] }
 0x1b3   : > { %9432 = vst [vmem:[#allocation23_spill] sm:$0xff] %v7855_v34  ;;  %v7859_v23 = vpop.f32.mrf.mxu1  ;;  %v7866_v35 = vpop.f32.mrf.mxu2 }
 0x1b4   : > { %9433 = vst [vmem:[#allocation36_spill] sm:$0xff] %v7857_v36  ;;  %v5549_v34 = vpop.permute.xlu2 %5548  ;;  %v7944_v36 = vld [vmem:[%s6095_s9 + $0x150] sm:$0xff] }
 0x1b5   : > { %9434 = vst [vmem:[#allocation37_spill] sm:$0xff] %v7859_v23  ;;  %v5435_v23 = vunpack.i.l.bf16 %v7683_v28 }
 0x1b6   : > { %1769 = vmatmul.f32.gmra.mxu1 %v7248_v38 }
 0x1b7   : > { %5728 = vrot.lane.b32.xlu2 %v5727_v3, %s6003_s11 }
 0x1b8   : > { %5723 = vrot.lane.b32.xlu1 %v5722_v1, %s6002_s10  ;;  %5718 = vrot.lane.b32.xlu0 %v5717_v42, %s6004_s12  ;;  %v7894_v1 = vpop.f32.mrf.mxu0  ;;  %v4714_v42 = vld [vmem:[%s6095_s9 + $0x142] sm:$0xff] }
 0x1b9   : > { %4796 = vmatmul.msk.f32.gmra.mxu0 %vm1292_vm0, %v4728_v50 }
 0x1ba   : > { %v7881_v33 = vpop.permute.xlu1 %5513  ;;  %v7883_v38 = vpop.permute.xlu0 %5508 }
 0x1bb   : > { %9435 = vst [vmem:[#allocation38_spill] sm:$0xff] %v7883_v38  ;;  %v7885_v40 = vpop.f32.mrf.mxu1  ;;  %v7891_v3 = vpop.f32.mrf.mxu2  ;;  %v4729_v38 = vld [vmem:[%s6095_s9 + $0x7c] sm:$0xff] }
 0x1bc   : > { %9436 = vst [vmem:[#allocation39_spill] sm:$0xff] %v7885_v40  ;;  %v7922_v40 = vpop.f32.mrf.mxu3 }
 0x1bd   : > { %9438 = vst [vmem:[#allocation41_spill] sm:$0xff] %v7922_v40  ;;  %v4715_v40 = vld [vmem:[%s6095_s9 + $0x152] sm:$0xff] }
 0x1be   : > { %1772 = vmatmul.f32.gmra.mxu1 %v7491_v58  ;;  %v5767_v5 = vpack.i.bf16 %v4715_v40, %v7799_v41 }
 0x1bf   : > { %5743 = vrot.lane.b32.xlu2 %v5742_v47, %s6004_s12  ;;  %v5757_v47 = vpack.i.bf16 %v4714_v42, %v7804_v55  ;;  %v2163_v55 = vld [vmem:[%s6095_s9] sm:$0xff] }
 0x1c0   : > { %5738 = vrot.lane.b32.xlu1 %v5737_v46, %s6003_s11  ;;  %5733 = vrot.lane.b32.xlu0 %v5732_v9, %s6004_s12  ;;  %v5752_v46 = vpack.i.bf16 %v7902_v19, %v7746_v20  ;;  %v5747_v9 = vpack.i.bf16 %v7908_v10, %v7905_v45  ;;  %v7931_v42 = vld [vmem:[%s6095_s9 + $0x124] sm:$0xff]  ;;  %v5515_v20 = vunpack.i.l.bf16 %v7881_v33 }
 0x1c1   : > { %4797 = vmatmul.msk.f32.gmra.mxu0 %vm1292_vm0, %v4729_v38  ;;  %v5762_v38 = vpack.i.bf16 %v7944_v36, %v7848_v25  ;;  %v7966_v25 = vld [vmem:[%s6095_s9 + $0x168] sm:$0xff] }
 0x1c2   : > { %v7911_v58 = vpop.permute.xlu1 %5528  ;;  %v7913_v29 = vpop.permute.xlu0 %5523 }
 0x1c3   : > { %v7915_v59 = vpop.f32.mrf.mxu1 }
 0x1c4   : > { %9437 = vst [vmem:[#allocation40_spill] sm:$0xff] %v7915_v59  ;;  %v7925_v50 = vpop.f32.mrf.mxu2  ;;  %v7937_v59 = vld [vmem:[%s6095_s9 + $0x12c] sm:$0xff] }
 0x1c5   : > { %v5772_v32 = vpack.i.bf16 %v7937_v59, %v7931_v42 }
 0x1c6   : > { %1775 = vmatmul.f32.gmra.mxu1 %v7495_v49  ;;  %v7940_v49 = vpop.f32.mrf.mxu0 }
 0x1c7   : > { %5758 = vrot.lane.b32.xlu2 %v5757_v47, %s6004_s12  ;;  %v5550_v47 = vunpack.i.l.bf16 %v5549_v34 }
 0x1c8   : > { %5753 = vrot.lane.b32.xlu1 %v5752_v46, %s6003_s11  ;;  %5748 = vrot.lane.b32.xlu0 %v5747_v9, %s6002_s10  ;;  %v3220_v9 = vsel %vm1292_vm0, %v2163_v55, %v5435_v23 }
 0x1c9   : > { %v3252_v37 = vsel %vm1325_vm2, %v3220_v9, %v5515_v20 }
 0x1ca   : > { %v5544_v60 = vpop.permute.xlu1 %5543  ;;  %v5539_v17 = vpop.permute.xlu0 %5538 }
 0x1cb   : > { %v5545_v48 = vunpack.i.l.bf16 %v5544_v60  ;;  %v5540_v14 = vunpack.i.l.bf16 %v5539_v17  ;;  %v7948_v46 = vpop.f32.mrf.mxu1  ;;  %v5541_v12 = vunpack.i.h.bf16 %v5539_v17  ;;  %v2164_v17 = vld [vmem:[%s6095_s9 + $0x8] sm:$0xff] }
 0x1cc   : > { %9439 = vst [vmem:[#allocation42_spill] sm:$0xff] %v7948_v46  ;;  %v5436_v46 = vunpack.i.h.bf16 %v7683_v28 }
 0x1cd   : > { %v3284_v31 = vsel %vm1358_vm1, %v3252_v37, %v5540_v14  ;;  %v3316_v21 = vsel %vm1292_vm0, %v4599_v22, %v5545_v48  ;;  %v7968_v14 = vpop.f32.mrf.mxu3  ;;  %v5516_v37 = vunpack.i.h.bf16 %v7881_v33  ;;  %v5546_v48 = vunpack.i.h.bf16 %v5544_v60  ;;  %v4730_v22 = vld [vmem:[%s6095_s9 + $0x84] sm:$0xff] }
 0x1ce   : > { %1778 = vmatmul.f32.gmra.mxu1 %v7499_v44  ;;  %3561 = vmatmul.f32.vlgmr.msrb.gmra.mxu3 %v3284_v31  ;;  %v3348_v23 = vsel %vm1325_vm2, %v3316_v21, %v5550_v47  ;;  %v4716_v44 = vld [vmem:[%s6095_s9 + $0x15a] sm:$0xff]  ;;  %v7974_v31 = vpop.f32.mrf.mxu2  ;;  %v3221_v40 = vsel %vm1292_vm0, %v2164_v17, %v5436_v46  ;;  %v5551_v33 = vunpack.i.h.bf16 %v5549_v34  ;;  %v7988_v47 = vpop.f32.mrf.mxu0 }
 0x1cf   : > { %5773 = vrot.lane.b32.xlu2 %v5772_v32, %s6002_s10  ;;  %v3380_v41 = vsel %vm1358_vm1, %v3348_v23, %v5541_v12  ;;  %v7978_v32 = vld [vmem:[%s6095_s9 + $0x158] sm:$0xff]  ;;  %4798 = vmatmul.msk.f32.gmra.mxu0 %vm1292_vm0, %v4730_v22  ;;  %v5782_v20 = vpack.i.bf16 %v4716_v44, %v7845_v61  ;;  %v5564_v46 = vpop.permute.xlu2 %5563  ;;  %v5440_v61 = vunpack.i.l.bf16 %v7681_v51 }
 0x1d0   : > { %5768 = vrot.lane.b32.xlu1 %v5767_v5, %s6004_s12  ;;  %5763 = vrot.lane.b32.xlu0 %v5762_v38, %s6003_s11  ;;  %v4600_v12 = vld [vmem:[%s6095_s9 + $0x3a] sm:$0xff]  ;;  %v5787_v5 = vpack.i.bf16 %v7966_v25, %v7905_v45  ;;  %v3253_v38 = vsel %vm1325_vm2, %v3221_v40, %v5516_v37  ;;  %v5777_v23 = vpack.i.bf16 %v7978_v32, %v7851_v18  ;;  %v5565_v17 = vunpack.i.l.bf16 %v5564_v46  ;;  %v4601_v37 = vld [vmem:[%s6095_s9 + $0x4a] sm:$0xff] }
 0x1d1   : > { %3674 = vmatmul.f32.vlgmr.msrb.gmra.mxu2 %v3380_v41  ;;  %v3317_v34 = vsel %vm1292_vm0, %v4600_v12, %v5546_v48  ;;  %v2165_v45 = vld [vmem:[%s6095_s9 + $0x18] sm:$0xff]  ;;  %v5520_v48 = vunpack.i.l.bf16 %v7760_v7  ;;  %v8013_v40 = vld [vmem:[%s6095_s9 + $0x144] sm:$0xff] }
 0x1d2   : > { %v5559_v28 = vpop.permute.xlu1 %5558  ;;  %v5554_v21 = vpop.permute.xlu0 %5553  ;;  %v3349_v18 = vsel %vm1325_vm2, %v3317_v34, %v5551_v33  ;;  %v4731_v22 = vld [vmem:[%s6095_s9 + $0x94] sm:$0xff]  ;;  %v4717_v33 = vld [vmem:[%s6095_s9 + $0x16a] sm:$0xff] }
 0x1d3   : > { %v5555_v60 = vunpack.i.l.bf16 %v5554_v21  ;;  %v7983_v55 = vpop.f32.mrf.mxu1  ;;  %v5556_v9 = vunpack.i.h.bf16 %v5554_v21  ;;  %v5560_v12 = vunpack.i.l.bf16 %v5559_v28  ;;  %v8010_v21 = vld [vmem:[%s6095_s9 + $0x13c] sm:$0xff] }
 0x1d4   : > { %9440 = vst [vmem:[#allocation43_spill] sm:$0xff] %v7983_v55 }
 0x1d5   : > { %v3285_v41 = vsel %vm1358_vm1, %v3253_v38, %v5555_v60  ;;  %v3381_v44 = vsel %vm1358_vm1, %v3349_v18, %v5556_v9  ;;  %v8016_v60 = vpop.f32.mrf.mxu3  ;;  %v3318_v38 = vsel %vm1292_vm0, %v4601_v37, %v5565_v17  ;;  %v5792_v17 = vpack.i.bf16 %v4717_v33, %v7877_v6  ;;  %v2166_v6 = vld [vmem:[%s6095_s9 + $0x20] sm:$0xff] }
 0x1d6   : > { %1781 = vmatmul.f32.gmra.mxu1 %v7503_v15  ;;  %3564 = vmatmul.f32.gmra.mxu3 %v3285_v41  ;;  %v8006_v15 = vld [vmem:[%s6095_s9 + $0x170] sm:$0xff]  ;;  %9441 = vst [vmem:[#allocation44_spill] sm:$0xff] %v8016_v60  ;;  %v3222_v41 = vsel %vm1292_vm0, %v2165_v45, %v5440_v61  ;;  %v5566_v61 = vunpack.i.h.bf16 %v5564_v46  ;;  %v5441_v45 = vunpack.i.h.bf16 %v7681_v51  ;;  %v4719_v46 = vld [vmem:[%s6095_s9 + $0x182] sm:$0xff] }
 0x1d7   : > { %5788 = vrot.lane.b32.xlu2 %v5787_v5, %s6003_s11  ;;  %4799 = vmatmul.msk.f32.gmra.mxu0 %vm1292_vm0, %v4731_v22  ;;  %v5561_v5 = vunpack.i.h.bf16 %v5559_v28  ;;  %v5802_v18 = vpack.i.bf16 %v8006_v15, %v7908_v10  ;;  %v3254_v55 = vsel %vm1325_vm2, %v3222_v41, %v5520_v48  ;;  %v5797_v28 = vpack.i.bf16 %v8013_v40, %v8010_v21  ;;  %v4602_v48 = vld [vmem:[%s6095_s9 + $0x52] sm:$0xff] }
 0x1d8   : > { %5783 = vrot.lane.b32.xlu1 %v5782_v20, %s6004_s12  ;;  %5778 = vrot.lane.b32.xlu0 %v5777_v23, %s6003_s11  ;;  %v8020_v23 = vpop.f32.mrf.mxu2  ;;  %v3286_v37 = vsel %vm1358_vm1, %v3254_v55, %v5560_v12  ;;  %v5521_v55 = vunpack.i.h.bf16 %v7760_v7  ;;  %v4732_v12 = vld [vmem:[%s6095_s9 + $0x9c] sm:$0xff]  ;;  %v4718_v51 = vld [vmem:[%s6095_s9 + $0x172] sm:$0xff]  ;;  %v3223_v7 = vsel %vm1292_vm0, %v2166_v6, %v5441_v45 }
 0x1d9   : > { %3677 = vmatmul.f32.gmra.mxu2 %v3381_v44 }
 0x1da   : > { %v5569_v20 = vpop.permute.xlu0 %5568  ;;  %v5574_v44 = vpop.permute.xlu1 %5573 }
 0x1db   : > { %v5570_v9 = vunpack.i.l.bf16 %v5569_v20  ;;  %v8022_v34 = vpop.f32.mrf.mxu1  ;;  %v5575_v33 = vunpack.i.l.bf16 %v5574_v44 }
 0x1dc   : > { %9442 = vst [vmem:[#allocation45_spill] sm:$0xff] %v8022_v34  ;;  %v8033_v34 = vpop.f32.mrf.mxu0 }
 0x1dd   : > { %v3350_v22 = vsel %vm1325_vm2, %v3318_v38, %v5570_v9  ;;  %v5571_v38 = vunpack.i.h.bf16 %v5569_v20  ;;  %v3319_v9 = vsel %vm1292_vm0, %v4602_v48, %v5566_v61  ;;  %v3255_v20 = vsel %vm1325_vm2, %v3223_v7, %v5521_v55  ;;  %v8089_v7 = vld [vmem:[%s6095_s9 + $0x154] sm:$0xff] }
 0x1de   : > { %1784 = vmatmul.f32.gmra.mxu1 %v7318_v26  ;;  %3567 = vmatmul.f32.gmra.mxu3 %v3286_v37  ;;  %v3382_v10 = vsel %vm1358_vm1, %v3350_v22, %v5561_v5  ;;  %v8046_v26 = vpop.permute.xlu2 %5578  ;;  %v8049_v5 = vld [vmem:[%s6095_s9 + $0x180] sm:$0xff]  ;;  %v5807_v22 = vpack.i.bf16 %v4718_v51, %v7902_v19  ;;  %v5445_v61 = vunpack.i.l.bf16 %v7521_v2  ;;  %v2167_v19 = vld [vmem:[%s6095_s9 + $0x30] sm:$0xff] }
 0x1df   : > { %5803 = vrot.lane.b32.xlu2 %v5802_v18, %s6003_s11  ;;  %4800 = vmatmul.msk.f32.gmra.mxu0 %vm1292_vm0, %v4732_v12  ;;  %v5817_v18 = vpack.i.bf16 %v4719_v46, %v7944_v36  ;;  %v5812_v37 = vpack.i.bf16 %v8049_v5, %v7931_v42  ;;  %v3287_v36 = vsel %vm1358_vm1, %v3255_v20, %v5575_v33  ;;  %v4720_v12 = vld [vmem:[%s6095_s9 + $0x18a] sm:$0xff] }
 0x1e0   : > { %5798 = vrot.lane.b32.xlu1 %v5797_v28, %s6002_s10  ;;  %5793 = vrot.lane.b32.xlu0 %v5792_v17, %s6004_s12  ;;  %v8058_v28 = vpop.f32.mrf.mxu3  ;;  %v5576_v17 = vunpack.i.h.bf16 %v5574_v44  ;;  %v3351_v6 = vsel %vm1325_vm2, %v3319_v9, %v5571_v38  ;;  %v5525_v44 = vunpack.i.l.bf16 %v7913_v29  ;;  %v4733_v33 = vld [vmem:[%s6095_s9 + $0xac] sm:$0xff]  ;;  %v5580_v38 = vunpack.i.l.bf16 %v8046_v26 }
 0x1e1   : > { %3680 = vmatmul.f32.gmra.mxu2 %v3382_v10  ;;  %9444 = vst [vmem:[#allocation47_spill] sm:$0xff] %v8058_v28  ;;  %v8064_v10 = vpop.f32.mrf.mxu2  ;;  %v3224_v51 = vsel %vm1292_vm0, %v2167_v19, %v5445_v61  ;;  %v8086_v9 = vld [vmem:[%s6095_s9 + $0x188] sm:$0xff]  ;;  %v5832_v61 = vpack.i.bf16 %v4720_v12, %v7978_v32  ;;  %v2168_v12 = vld [vmem:[%s6095_s9 + $0x38] sm:$0xff] }
 0x1e2   : > { %v5584_v45 = vpop.permute.xlu0 %5583  ;;  %v8070_v48 = vpop.permute.xlu1 %5588  ;;  %v3383_v46 = vsel %vm1358_vm1, %v3351_v6, %v5576_v17  ;;  %v3256_v20 = vsel %vm1325_vm2, %v3224_v51, %v5525_v44  ;;  %v5907_v17 = vld [vmem:[%s6095_s9 + $0x62] sm:$0xff]  ;;  %v5581_v6 = vunpack.i.h.bf16 %v8046_v26  ;;  %v5827_v19 = vpack.i.bf16 %v8086_v9, %v7937_v59 }
 0x1e3   : > { %v8054_v41 = vpop.f32.mrf.mxu1  ;;  %v5585_v55 = vunpack.i.l.bf16 %v5584_v45  ;;  %v3288_v44 = vsel %vm1358_vm1, %v3256_v20, %v5580_v38  ;;  %v5586_v51 = vunpack.i.h.bf16 %v5584_v45  ;;  %v5446_v59 = vunpack.i.h.bf16 %v7521_v2  ;;  %v8119_v38 = vld [vmem:[%s6095_s9 + $0x16c] sm:$0xff]  ;;  %v8128_v2 = vld [vmem:[%s6095_s9 + $0x174] sm:$0xff] }
 0x1e4   : > { %9443 = vst [vmem:[#allocation46_spill] sm:$0xff] %v8054_v41  ;;  %v8075_v42 = vpop.f32.mrf.mxu0  ;;  %v4734_v20 = vld [vmem:[%s6095_s9 + $0xb4] sm:$0xff] }
 0x1e6   : > { %1787 = vmatmul.f32.gmra.mxu1 %v7322_v8  ;;  %3570 = vmatmul.f32.gmra.mxu3 %v3287_v36  ;;  %v5590_v8 = vunpack.i.l.bf16 %v8070_v48 }
 0x1e7   : > { %5818 = vrot.lane.b32.xlu2 %v5817_v18, %s6004_s12  ;;  %v8092_v18 = vld [vmem:[%s6095_s9 + $0x15c] sm:$0xff]  ;;  %4801 = vmatmul.msk.f32.gmra.mxu0 %vm1292_vm0, %v4733_v33 }
 0x1e8   : > { %5813 = vrot.lane.b32.xlu1 %v5812_v37, %s6003_s11  ;;  %5808 = vrot.lane.b32.xlu0 %v5807_v22, %s6004_s12  ;;  %v3320_v37 = vsel %vm1292_vm0, %v5907_v17, %v5585_v55  ;;  %v5594_v22 = vpop.permute.xlu2 %5593  ;;  %v8108_v55 = vpop.f32.mrf.mxu3 }
 0x1e9   : > { %3683 = vmatmul.f32.gmra.mxu2 %v3383_v46  ;;  %v5822_v46 = vpack.i.bf16 %v8092_v18, %v8089_v7  ;;  %v3352_v33 = vsel %vm1325_vm2, %v3320_v37, %v5590_v8  ;;  %9446 = vst [vmem:[#allocation49_spill] sm:$0xff] %v8108_v55  ;;  %v8111_v32 = vpop.f32.mrf.mxu2  ;;  %v5526_v8 = vunpack.i.h.bf16 %v7913_v29  ;;  %v5595_v17 = vunpack.i.l.bf16 %v5594_v22 }
 0x1ea   : > { %v8114_v26 = vpop.permute.xlu0 %5598  ;;  %v8122_v45 = vpop.permute.xlu1 %5603  ;;  %v5591_v37 = vunpack.i.h.bf16 %v8070_v48  ;;  %v5596_v48 = vunpack.i.h.bf16 %v5594_v22 }
 0x1eb   : > { %v8098_v36 = vpop.f32.mrf.mxu1 }
 0x1ec   : > { %9445 = vst [vmem:[#allocation48_spill] sm:$0xff] %v8098_v36  ;;  %v8137_v29 = vpop.f32.mrf.mxu0  ;;  %v5908_v36 = vld [vmem:[%s6095_s9 + $0x6a] sm:$0xff] }
 0x1ee   : > { %1790 = vmatmul.f32.gmra.mxu1 %v7541_v11  ;;  %3573 = vmatmul.f32.gmra.mxu3 %v3288_v44  ;;  %v3384_v11 = vsel %vm1358_vm1, %v3352_v33, %v5581_v6  ;;  %v8134_v44 = vld [vmem:[%s6095_s9 + $0x198] sm:$0xff]  ;;  %v3225_v6 = vsel %vm1292_vm0, %v2168_v12, %v5446_v59  ;;  %v5847_v33 = vpack.i.bf16 %v8128_v2, %v8119_v38  ;;  %v5450_v59 = vunpack.i.l.bf16 %v7725_v27 }
 0x1ef   : > { %5833 = vrot.lane.b32.xlu2 %v5832_v61, %s6004_s12  ;;  %v4721_v61 = vld [vmem:[%s6095_s9 + $0x19a] sm:$0xff]  ;;  %4802 = vmatmul.msk.f32.gmra.mxu0 %vm1292_vm0, %v4734_v20  ;;  %v5837_v20 = vpack.i.bf16 %v8134_v44, %v8010_v21  ;;  %v5605_v12 = vunpack.i.l.bf16 %v8122_v45  ;;  %v2169_v21 = vld [vmem:[%s6095_s9 + $0x48] sm:$0xff] }
 0x1f0   : > { %5828 = vrot.lane.b32.xlu1 %v5827_v19, %s6003_s11  ;;  %5823 = vrot.lane.b32.xlu0 %v5822_v46, %s6002_s10  ;;  %v3321_v19 = vsel %vm1292_vm0, %v5908_v36, %v5586_v51  ;;  %v5842_v41 = vpack.i.bf16 %v4721_v61, %v7966_v25  ;;  %v8150_v55 = vpop.permute.xlu2 %5608  ;;  %v5530_v25 = vunpack.i.l.bf16 %v7911_v58  ;;  %v8160_v22 = vpop.f32.mrf.mxu3 }
 0x1f1   : > { %3686 = vmatmul.f32.gmra.mxu2 %v3384_v11  ;;  %v3257_v11 = vsel %vm1325_vm2, %v3225_v6, %v5526_v8  ;;  %v3353_v51 = vsel %vm1325_vm2, %v3321_v19, %v5591_v37  ;;  %9448 = vst [vmem:[#allocation51_spill] sm:$0xff] %v8160_v22  ;;  %v8166_v37 = vpop.f32.mrf.mxu2  ;;  %v5610_v61 = vunpack.i.l.bf16 %v8150_v55  ;;  %v5600_v19 = vunpack.i.l.bf16 %v8114_v26 }
 0x1f2   : > { %v3289_v36 = vsel %vm1358_vm1, %v3257_v11, %v5595_v17  ;;  %v3385_v8 = vsel %vm1358_vm1, %v3353_v51, %v5596_v48  ;;  %v4691_v17 = vld [vmem:[%s6095_s9 + $0x1b0] sm:$0xff]  ;;  %v8171_v6 = vpop.permute.xlu0 %5613  ;;  %v8175_v11 = vld [vmem:[%s6095_s9 + $0x1a0] sm:$0xff]  ;;  %v3226_v48 = vsel %vm1292_vm0, %v2169_v21, %v5450_v59 }
 0x1f3   : > { %v8141_v46 = vpop.f32.mrf.mxu1  ;;  %v5862_v22 = vpack.i.bf16 %v4691_v17, %v8089_v7  ;;  %v4659_v17 = vld [vmem:[%s6095_s9 + $0x184] sm:$0xff] }
 0x1f4   : > { %9447 = vst [vmem:[#allocation50_spill] sm:$0xff] %v8141_v46  ;;  %v3258_v46 = vsel %vm1325_vm2, %v3226_v48, %v5530_v25  ;;  %v8185_v28 = vpop.f32.mrf.mxu0  ;;  %v5606_v25 = vunpack.i.h.bf16 %v8122_v45  ;;  %v4692_v45 = vld [vmem:[%s6095_s9 + $0x1b8] sm:$0xff] }
 0x1f5   : > { %v3290_v7 = vsel %vm1358_vm1, %v3258_v46, %v5600_v19  ;;  %v5615_v19 = vunpack.i.l.bf16 %v8171_v6 }
 0x1f6   : > { %1793 = vmatmul.f32.gmra.mxu1 %v7545_v52  ;;  %3576 = vmatmul.f32.gmra.mxu3 %v3289_v36  ;;  %v4735_v52 = vld [vmem:[%s6095_s9 + $0xc4] sm:$0xff] }
 0x1f7   : > { %5848 = vrot.lane.b32.xlu2 %v5847_v33, %s6002_s10  ;;  %v4722_v33 = vld [vmem:[%s6095_s9 + $0x1a2] sm:$0xff]  ;;  %4803 = vmatmul.msk.f32.gmra.mxu0 %vm1292_vm0, %v4735_v52  ;;  %v8192_v52 = vld [vmem:[%s9345_s2] ss:$0 sm:$0xff] }
 0x1f8   : > { %5843 = vrot.lane.b32.xlu1 %v5842_v41, %s6004_s12  ;;  %5838 = vrot.lane.b32.xlu0 %v5837_v20, %s6003_s11  ;;  %v8178_v41 = vpop.permute.xlu1 %5618  ;;  %v5909_v20 = vld [vmem:[%s6095_s9 + $0x7a] sm:$0xff]  ;;  %v5857_v59 = vpack.i.bf16 %v4722_v33, %v8006_v15  ;;  %v8212_v46 = vpop.permute.xlu2 %5623 }
 0x1f9   : > { %3689 = vmatmul.f32.gmra.mxu2 %v3385_v8  ;;  %v3322_v36 = vsel %vm1292_vm0, %v5909_v20, %v5605_v12  ;;  %v5601_v8 = vunpack.i.h.bf16 %v8114_v26  ;;  %v5852_v12 = vpack.i.bf16 %v8175_v11, %v8013_v40  ;;  %v5451_v26 = vunpack.i.h.bf16 %v7725_v27  ;;  %v8208_v15 = vld [vmem:[%s9346_s3] ss:$0 sm:$0xff]  ;;  %v2170_v27 = vld [vmem:[%s6095_s9 + $0x50] sm:$0xff]  ;;  %v8228_v33 = vpop.f32.mrf.mxu3 }
 0x1fa   : > { %v5531_v40 = vunpack.i.h.bf16 %v7911_v58  ;;  %v4736_v58 = vld [vmem:[%s6095_s9 + $0xcc] sm:$0xff] }
 0x1fb   : > { %v1749_v51 = vpop.f32.mrf.mxu1  ;;  %v3227_v20 = vsel %vm1292_vm0, %v2170_v27, %v5451_v26 }
 0x1fc   : > { %v1750_v60 = vadd.f32 %v1749_v51, %v7708_v54  ;;  %v3354_v54 = vsel %vm1325_vm2, %v3322_v36, %v5610_v61  ;;  %v5611_v61 = vunpack.i.h.bf16 %v8150_v55  ;;  %v5910_v36 = vld [vmem:[%s6095_s9 + $0x82] sm:$0xff] }
 0x1fd   : > { %v3323_v51 = vsel %vm1292_vm0, %v5910_v36, %v5606_v25 }
 0x1fe   : > { %v1863_v21 = vadd.f32 %v7782_v56, %v1750_v60  ;;  %1796 = vmatmul.f32.gmra.mxu1 %v7549_v43  ;;  %3579 = vmatmul.f32.gmra.mxu3 %v3290_v7  ;;  %v3386_v43 = vsel %vm1358_vm1, %v3354_v54, %v5601_v8  ;;  %v4660_v60 = vld [vmem:[%s6095_s9 + $0x18c] sm:$0xff]  ;;  %v8235_v8 = vpop.f32.mrf.mxu2  ;;  %v5877_v7 = vpack.i.bf16 %v4692_v45, %v8092_v18  ;;  %v5625_v18 = vunpack.i.l.bf16 %v8212_v46 }
 0x1ff   : > { %5863 = vrot.lane.b32.xlu2 %v5862_v22, %s6003_s11  ;;  %v4723_v22 = vld [vmem:[%s6095_s9 + $0x1b2] sm:$0xff]  ;;  %4804 = vmatmul.msk.f32.gmra.mxu0 %vm1292_vm0, %v4736_v58  ;;  %v5872_v54 = vpack.i.bf16 %v4660_v60, %v4659_v17  ;;  %v3355_v58 = vsel %vm1325_vm2, %v3323_v51, %v5611_v61  ;;  %v4737_v17 = vld [vmem:[%s6095_s9 + $0xdc] sm:$0xff]  ;;  %v4725_v60 = vld [vmem:[%s6095_s9 + $0x1ca] sm:$0xff] }
 0x200   : > { %v1962_v56 = vmul.f32 %v8192_v52, %v1863_v21  ;;  %5858 = vrot.lane.b32.xlu1 %v5857_v59, %s6004_s12  ;;  %5853 = vrot.lane.b32.xlu0 %v5852_v12, %s6003_s11  ;;  %v8237_v59 = vpop.permute.xlu0 %5628  ;;  %v3259_v12 = vsel %vm1325_vm2, %v3227_v20, %v5531_v40  ;;  %v5616_v21 = vunpack.i.h.bf16 %v8171_v6  ;;  %v5867_v25 = vpack.i.bf16 %v4723_v22, %v8049_v5  ;;  %v8248_v40 = vpop.f32.mrf.mxu0  ;;  %v4693_v5 = vld [vmem:[%s6095_s9 + $0x1c8] sm:$0xff] }
 0x201   : > { %3692 = vmatmul.f32.gmra.mxu2 %v3386_v43  ;;  %v3291_v43 = vsel %vm1358_vm1, %v3259_v12, %v5615_v19  ;;  %v8267_v61 = vpop.permute.xlu2 %5638  ;;  %v4724_v19 = vld [vmem:[%s6095_s9 + $0x1ba] sm:$0xff]  ;;  %v5887_v51 = vpack.i.bf16 %v4693_v5, %v8119_v38  ;;  %v5892_v12 = vpack.i.bf16 %v4725_v60, %v8134_v44  ;;  %v4738_v5 = vld [vmem:[%s6095_s9 + $0xe4] sm:$0xff] }
 0x202   : > { %v1998_v48 = vadd.f32 %v8208_v15, %v1962_v56  ;;  %v8242_v56 = vpop.permute.xlu1 %5633  ;;  %v3387_v45 = vsel %vm1358_vm1, %v3355_v58, %v5616_v21 }
 0x203   : > { %v1752_v55 = vpop.f32.mrf.mxu1 }
 0x204   : > { %v2030_v26 = vmax.f32 %v1998_v48, 0.0  ;;  %v1753_v27 = vadd.f32 %v1752_v55, %v7773_v57  ;;  %v5911_v48 = vld [vmem:[%s6095_s9 + $0x92] sm:$0xff]  ;;  %v8277_v55 = vpop.f32.mrf.mxu3 }
 0x205   : > { %v3324_v20 = vsel %vm1292_vm0, %v5911_v48, %v5625_v18  ;;  %v5626_v18 = vunpack.i.h.bf16 %v8212_v46 }
 0x206   : > { %2062 = vst.msk [vmem:[%s8253_s30] sm:$0xff] %vm1292_vm0, %v2030_v26  ;;  %v1866_v57 = vadd.f32 %v7829_v0, %v1753_v27  ;;  %1799 = vmatmul.f32.gmra.mxu1 %v7553_v62  ;;  %3582 = vmatmul.f32.gmra.mxu3 %v3291_v43  ;;  %v5620_v0 = vunpack.i.l.bf16 %v8178_v41  ;;  %v5630_v62 = vunpack.i.l.bf16 %v8237_v59  ;;  %v5882_v27 = vpack.i.bf16 %v4724_v19, %v8086_v9 }
 0x207   : > { %5878 = vrot.lane.b32.xlu2 %v5877_v7, %s6003_s11  ;;  %4805 = vmatmul.msk.f32.gmra.mxu0 %vm1292_vm0, %v4737_v17  ;;  %v5621_v7 = vunpack.i.h.bf16 %v8178_v41  ;;  %v2094_v44 = vsel %vm1292_vm0, %v2030_v26, 0.0 }
 0x208   : > { %v1963_v6 = vmul.f32 %v8192_v52, %v1866_v57  ;;  %5873 = vrot.lane.b32.xlu1 %v5872_v54, %s6002_s10  ;;  %5868 = vrot.lane.b32.xlu0 %v5867_v25, %s6004_s12  ;;  %v8283_v25 = vpop.f32.mrf.mxu2  ;;  %v8285_v43 = vpop.permute.xlu0 %5643  ;;  %v3292_v58 = vsel %vm1358_vm1, %v7832_v30, %v5620_v0  ;;  %v3356_v38 = vsel %vm1325_vm2, %v3324_v20, %v5630_v62  ;;  %v5636_v62 = vunpack.i.h.bf16 %v8242_v56 }
 0x209   : > { %3695 = vmatmul.f32.gmra.mxu2 %v3387_v45  ;;  %v8300_v57 = vpop.f32.mrf.mxu0  ;;  %v3388_v26 = vsel %vm1358_vm1, %v3356_v38, %v5621_v7  ;;  %v5912_v45 = vld [vmem:[%s6095_s9 + $0x9a] sm:$0xff]  ;;  %v8313_v60 = vpop.permute.xlu2 %5653 }
 0x20a   : > { %v1999_v22 = vadd.f32 %v8208_v15, %v1963_v6  ;;  %v8292_v41 = vpop.permute.xlu1 %5648  ;;  %v3325_v17 = vsel %vm1292_vm0, %v5912_v45, %v5626_v18  ;;  %v4739_v38 = vld [vmem:[%s6095_s9 + $0xf4] sm:$0xff]  ;;  %v5641_v18 = vunpack.i.h.bf16 %v8267_v61 }
 0x20b   : > { %v1755_v36 = vpop.f32.mrf.mxu1  ;;  %v5651_v45 = vunpack.i.h.bf16 %v8292_v41 }
 0x20c   : > { %v2031_v54 = vmax.f32 %v1999_v22, 0.0  ;;  %v1756_v21 = vadd.f32 %v1755_v36, %v7815_v39  ;;  %v8320_v20 = vpop.f32.mrf.mxu3  ;;  %v5650_v36 = vunpack.i.l.bf16 %v8292_v41 }
 0x20e   : > { %2063 = vst.msk [vmem:[%s8253_s30 + $0x8] sm:$0xff] %vm1292_vm0, %v2031_v54  ;;  %v2095_v39 = vsel %vm1292_vm0, %v2031_v54, 0.0  ;;  %v1869_v9 = vadd.f32 %v7866_v35, %v1756_v21  ;;  %1802 = vmatmul.f32.gmra.mxu1 %v7382_v53  ;;  %3585 = vmatmul.f32.gmra.mxu3 %v3292_v58  ;;  %v5635_v35 = vunpack.i.l.bf16 %v8242_v56  ;;  %v5631_v53 = vunpack.i.h.bf16 %v8237_v59  ;;  %v4609_v54 = vld [vmem:[%s6095_s9 + $0xaa] sm:$0xff]  ;;  %v2173_v58 = vld [vmem:[%s6095_s9 + $0x78] sm:$0xff] }
 0x20f   : > { %v2096_v30 = vadd.f32 %v2095_v39, %v2094_v44  ;;  %5893 = vrot.lane.b32.xlu2 %v5892_v12, %s6004_s12  ;;  %4806 = vmatmul.msk.f32.gmra.mxu0 %vm1292_vm0, %v4738_v5  ;;  %v5640_v21 = vunpack.i.l.bf16 %v8267_v61  ;;  %v5645_v44 = vunpack.i.l.bf16 %v8285_v43 }
 0x210   : > { %v1964_v46 = vmul.f32 %v8192_v52, %v1869_v9  ;;  %5888 = vrot.lane.b32.xlu1 %v5887_v51, %s6003_s11  ;;  %5883 = vrot.lane.b32.xlu0 %v5882_v27, %s6004_s12  ;;  %v3293_v59 = vsel %vm1358_vm1, %v7836_v4, %v5635_v35  ;;  %v3357_v48 = vsel %vm1325_vm2, %v3325_v17, %v5631_v53  ;;  %v5460_v4 = vunpack.i.l.bf16 %v7572_v16  ;;  %v8331_v12 = vpop.permute.xlu0 %5658 }
 0x211   : > { %3698 = vmatmul.f32.gmra.mxu2 %v3388_v26  ;;  %v3326_v9 = vsel %vm1292_vm0, %v4609_v54, %v5650_v36  ;;  %v8356_v35 = vpop.permute.xlu2 %5668 }
 0x212   : > { %v2000_v6 = vadd.f32 %v8208_v15, %v1964_v46  ;;  %v8337_v27 = vpop.permute.xlu1 %5663  ;;  %v5646_v46 = vunpack.i.h.bf16 %v8285_v43 }
 0x213   : > { %v1758_v0 = vpop.f32.mrf.mxu1 }
 0x214   : > { %v2032_v19 = vmax.f32 %v2000_v6, 0.0  ;;  %v1759_v22 = vadd.f32 %v1758_v0, %v7868_v13  ;;  %v8328_v13 = vpop.f32.mrf.mxu2  ;;  %v3358_v6 = vsel %vm1325_vm2, %v3326_v9, %v5641_v18  ;;  %v9449_v18 = vld [vmem:[#allocation33_spill] sm:$0xff] }
 0x215   : > { %v3390_v41 = vsel %vm1358_vm1, %v3358_v6, %v5646_v46  ;;  %v9450_v46 = vld [vmem:[#allocation12_spill] sm:$0xff] }
 0x216   : > { %2064 = vst.msk [vmem:[%s8253_s30 + $0x10] sm:$0xff] %vm1292_vm0, %v2032_v19  ;;  %v2097_v51 = vsel %vm1292_vm0, %v2032_v19, 0.0  ;;  %v1872_v56 = vadd.f32 %v7891_v3, %v1759_v22  ;;  %1805 = vmatmul.f32.gmra.mxu1 %v7386_v24  ;;  %3588 = vmatmul.f32.gmra.mxu3 %v3293_v59  ;;  %v3389_v24 = vsel %vm1358_vm1, %v3357_v48, %v5636_v62  ;;  %v4610_v62 = vld [vmem:[%s6095_s9 + $0xb2] sm:$0xff]  ;;  %v8368_v19 = vpop.f32.mrf.mxu3  ;;  %v5655_v22 = vunpack.i.l.bf16 %v8313_v60  ;;  %v2174_v48 = vld [vmem:[%s6095_s9 + $0x80] sm:$0xff] }
 0x217   : > { %v2098_v7 = vadd.f32 %v2097_v51, %v2096_v30  ;;  %2802 = vrot.lane.b32.xlu2 %v8175_v11, %s6004_s12  ;;  %4807 = vmatmul.msk.f32.gmra.mxu0 %vm1292_vm0, %v4739_v38  ;;  %v8348_v11 = vpop.f32.mrf.mxu0  ;;  %v4740_v51 = vld [vmem:[%s6095_s9 + $0xfc] sm:$0xff] }
 0x218   : > { %v1965_v3 = vmul.f32 %v8192_v52, %v1872_v56  ;;  %2674 = vrot.lane.b32.xlu1 %v8128_v2, %s6003_s11  ;;  %v3230_v2 = vsel %vm1292_vm0, %v2173_v58, %v5460_v4  ;;  %v8379_v56 = vpop.permute.xlu0 %5673 }
 0x219   : > { %3701 = vmatmul.f32.gmra.mxu2 %v3389_v24  ;;  %v3262_v5 = vsel %vm1325_vm2, %v3230_v2, %v5640_v21  ;;  %v5675_v2 = vunpack.i.l.bf16 %v8379_v56 }
 0x21a   : > { %v2001_v39 = vadd.f32 %v8208_v15, %v1965_v3  ;;  %v3294_v53 = vsel %vm1358_vm1, %v3262_v5, %v5645_v44  ;;  %v5465_v44 = vunpack.i.l.bf16 %v9449_v18 }
 0x21b   : > { %v1761_v30 = vpop.f32.mrf.mxu1 }
 0x21c   : > { %v2033_v26 = vmax.f32 %v2001_v39, 0.0  ;;  %v1762_v61 = vadd.f32 %v1761_v30, %v7894_v1  ;;  %v5461_v1 = vunpack.i.h.bf16 %v7572_v16  ;;  %v8374_v36 = vpop.f32.mrf.mxu2  ;;  %v8382_v16 = vpop.permute.xlu1 %5678  ;;  %v5665_v30 = vunpack.i.l.bf16 %v8337_v27 }
 0x21e   : > { %2065 = vst.msk [vmem:[%s8253_s30 + $0x18] sm:$0xff] %vm1292_vm0, %v2033_v26  ;;  %v2099_v17 = vsel %vm1292_vm0, %v2033_v26, 0.0  ;;  %v1875_v43 = vadd.f32 %v7925_v50, %v1762_v61  ;;  %1808 = vmatmul.f32.gmra.mxu1 %v7598_v63  ;;  %3591 = vmatmul.f32.gmra.mxu3 %v3294_v53  ;;  %v5656_v50 = vunpack.i.h.bf16 %v8313_v60  ;;  %v5660_v63 = vunpack.i.l.bf16 %v8331_v12  ;;  %v2175_v26 = vld [vmem:[%s6095_s9 + $0x90] sm:$0xff]  ;;  %v8403_v61 = vpop.permute.xlu2 %5683  ;;  %v4611_v53 = vld [vmem:[%s6095_s9 + $0xc2] sm:$0xff] }
 0x21f   : > { %v2100_v0 = vadd.f32 %v2099_v17, %v2098_v7  ;;  %4808 = vmatmul.msk.f32.gmra.mxu0 %vm1292_vm0, %v4740_v51  ;;  %v3327_v7 = vsel %vm1292_vm0, %v4610_v62, %v5651_v45  ;;  %v3231_v21 = vsel %vm1292_vm0, %v2174_v48, %v5461_v1  ;;  %v8387_v3 = vpop.f32.mrf.mxu0  ;;  %v5661_v60 = vunpack.i.h.bf16 %v8331_v12  ;;  %v8409_v17 = vld [vmem:[%s6095_s9 + $0x19c] sm:$0xff] }
 0x220   : > { %v1966_v59 = vmul.f32 %v8192_v52, %v1875_v43  ;;  %v3263_v38 = vsel %vm1325_vm2, %v3231_v21, %v5655_v22  ;;  %v3359_v9 = vsel %vm1325_vm2, %v3327_v7, %v5656_v50  ;;  %v4741_v43 = vld [vmem:[%s6095_s9 + $0x10c] sm:$0xff]  ;;  %v5670_v1 = vunpack.i.l.bf16 %v8356_v35  ;;  %v8415_v22 = vpop.f32.mrf.mxu3  ;;  %2928 = vrot.lane.b32.xlu0 %v8409_v17, %s6002_s10 }
 0x221   : > { %3704 = vmatmul.f32.gmra.mxu2 %v3390_v41  ;;  %v3295_v39 = vsel %vm1358_vm1, %v3263_v38, %v5660_v63  ;;  %v3391_v45 = vsel %vm1358_vm1, %v3359_v9, %v5661_v60  ;;  %v5666_v62 = vunpack.i.h.bf16 %v8337_v27  ;;  %v3328_v41 = vsel %vm1292_vm0, %v4611_v53, %v5675_v2  ;;  %v8425_v27 = vpop.permute.xlu0 %5688  ;;  %v4612_v9 = vld [vmem:[%s6095_s9 + $0xca] sm:$0xff] }
 0x222   : > { %v2002_v4 = vadd.f32 %v8208_v15, %v1966_v59  ;;  %v5671_v50 = vunpack.i.h.bf16 %v8356_v35  ;;  %v5676_v38 = vunpack.i.h.bf16 %v8379_v56  ;;  %v5685_v56 = vunpack.i.l.bf16 %v8403_v61 }
 0x223   : > { %v1764_v54 = vpop.f32.mrf.mxu1  ;;  %v3360_v60 = vsel %vm1325_vm2, %v3328_v41, %v5666_v62 }
 0x224   : > { %v2034_v24 = vmax.f32 %v2002_v4, 0.0  ;;  %v1765_v58 = vadd.f32 %v1764_v54, %v7940_v49  ;;  %v8422_v48 = vpop.f32.mrf.mxu2  ;;  %v8428_v63 = vpop.permute.xlu1 %5693  ;;  %v5466_v54 = vunpack.i.h.bf16 %v9449_v18  ;;  %v2176_v18 = vld [vmem:[%s6095_s9 + $0x98] sm:$0xff]  ;;  %v3392_v2 = vsel %vm1358_vm1, %v3360_v60, %v5671_v50  ;;  %v9453_v60 = vld [vmem:[#allocation19_spill] sm:$0xff] }
 0x225   : > { %v3329_v53 = vsel %vm1292_vm0, %v4612_v9, %v5676_v38  ;;  %v4743_v9 = vld [vmem:[%s6095_s9 + $0x124] sm:$0xff] }
 0x226   : > { %2066 = vst.msk [vmem:[%s8253_s30 + $0x20] sm:$0xff] %vm1292_vm0, %v2034_v24  ;;  %v2101_v12 = vsel %vm1292_vm0, %v2034_v24, 0.0  ;;  %v1878_v49 = vadd.f32 %v7974_v31, %v1765_v58  ;;  %1811 = vmatmul.f32.gmra.mxu1 %v9450_v46  ;;  %3594 = vmatmul.f32.gmra.mxu3 %v3295_v39  ;;  %v3232_v31 = vsel %vm1292_vm0, %v2175_v26, %v5465_v44  ;;  %v5680_v58 = vunpack.i.l.bf16 %v8382_v16 }
 0x227   : > { %v2102_v5 = vadd.f32 %v2101_v12, %v2100_v0  ;;  %v3264_v59 = vsel %vm1325_vm2, %v3232_v31, %v5665_v30  ;;  %4809 = vmatmul.msk.f32.gmra.mxu0 %vm1292_vm0, %v4741_v43  ;;  %v8434_v24 = vpop.f32.mrf.mxu0  ;;  %v4742_v12 = vld [vmem:[%s6095_s9 + $0x114] sm:$0xff]  ;;  %v5681_v46 = vunpack.i.h.bf16 %v8382_v16 }
 0x228   : > { %v1967_v6 = vmul.f32 %v8192_v52, %v1878_v49  ;;  %v3296_v21 = vsel %vm1358_vm1, %v3264_v59, %v5670_v1  ;;  %v8449_v49 = vpop.permute.xlu2 %5698  ;;  %v8460_v43 = vpop.f32.mrf.mxu3  ;;  %v4694_v16 = vld [vmem:[%s6095_s9 + $0x1d0] sm:$0xff]  ;;  %v5686_v1 = vunpack.i.h.bf16 %v8403_v61 }
 0x229   : > { %3707 = vmatmul.f32.gmra.mxu2 %v3391_v45  ;;  %3058 = vrot.lane.b32.xlu1 %v4694_v16, %s6003_s11  ;;  %v8469_v41 = vpop.permute.xlu0 %5703  ;;  %v3361_v50 = vsel %vm1325_vm2, %v3329_v53, %v5681_v46  ;;  %v5700_v61 = vunpack.i.l.bf16 %v8449_v49 }
 0x22a   : > { %v2003_v0 = vadd.f32 %v8208_v15, %v1967_v6  ;;  %v8458_v6 = vld [vmem:[%s6095_s9 + $0x1a4] sm:$0xff] }
 0x22b   : > { %v1767_v51 = vpop.f32.mrf.mxu1  ;;  %2930 = vrot.lane.b32.xlu0 %v8458_v6, %s6002_s10 }
 0x22c   : > { %v2035_v4 = vmax.f32 %v2003_v0, 0.0  ;;  %v1768_v7 = vadd.f32 %v1767_v51, %v7988_v47  ;;  %v9451_v47 = vld [vmem:[#allocation14_spill] sm:$0xff]  ;;  %v9452_v0 = vld [vmem:[#allocation15_spill] sm:$0xff] }
 0x22d   : > { %v5470_v59 = vunpack.i.l.bf16 %v9452_v0  ;;  %v5471_v53 = vunpack.i.h.bf16 %v9452_v0  ;;  %v2178_v0 = vld [vmem:[%s6095_s9 + $0xb0] sm:$0xff] }
 0x22e   : > { %2067 = vst.msk [vmem:[%s8253_s30 + $0x28] sm:$0xff] %vm1292_vm0, %v2035_v4  ;;  %v2103_v35 = vsel %vm1292_vm0, %v2035_v4, 0.0  ;;  %v1881_v44 = vadd.f32 %v8020_v23, %v1768_v7  ;;  %1814 = vmatmul.f32.gmra.mxu1 %v9451_v47  ;;  %3597 = vmatmul.f32.gmra.mxu3 %v3296_v21  ;;  %v3233_v23 = vsel %vm1292_vm0, %v2176_v18, %v5466_v54  ;;  %v8473_v4 = vpop.f32.mrf.mxu2  ;;  %v5690_v7 = vunpack.i.l.bf16 %v8425_v27  ;;  %v8477_v54 = vpop.permute.xlu1 %5708 }
 0x22f   : > { %v2104_v39 = vadd.f32 %v2103_v35, %v2102_v5  ;;  %v3265_v5 = vsel %vm1325_vm2, %v3233_v23, %v5680_v58  ;;  %4810 = vmatmul.msk.f32.gmra.mxu0 %vm1292_vm0, %v4742_v12  ;;  %v2177_v58 = vld [vmem:[%s6095_s9 + $0xa8] sm:$0xff]  ;;  %v8485_v38 = vpop.f32.mrf.mxu0  ;;  %v3393_v18 = vsel %vm1358_vm1, %v3361_v50, %v5686_v1 }
 0x230   : > { %v1968_v30 = vmul.f32 %v8192_v52, %v1881_v44  ;;  %v3297_v51 = vsel %vm1358_vm1, %v3265_v5, %v5685_v56  ;;  %v4613_v44 = vld [vmem:[%s6095_s9 + $0xda] sm:$0xff]  ;;  %v8498_v46 = vpop.permute.xlu2 %5713  ;;  %v8505_v1 = vpop.f32.mrf.mxu3 }
 0x231   : > { %3710 = vmatmul.f32.gmra.mxu2 %v3392_v2  ;;  %v5691_v2 = vunpack.i.h.bf16 %v8425_v27  ;;  %v8517_v50 = vpop.permute.xlu0 %5718 }
 0x232   : > { %v2004_v26 = vadd.f32 %v8208_v15, %v1968_v30  ;;  %v5695_v30 = vunpack.i.l.bf16 %v8428_v63 }
 0x233   : > { %v1770_v45 = vpop.f32.mrf.mxu1 }
 0x234   : > { %v2036_v62 = vmax.f32 %v2004_v26, 0.0  ;;  %v1771_v31 = vadd.f32 %v1770_v45, %v8033_v34  ;;  %v5696_v26 = vunpack.i.h.bf16 %v8428_v63 }
 0x236   : > { %2068 = vst.msk [vmem:[%s8253_s30 + $0x30] sm:$0xff] %vm1292_vm0, %v2036_v62  ;;  %v2105_v34 = vsel %vm1292_vm0, %v2036_v62, 0.0  ;;  %v1884_v21 = vadd.f32 %v8064_v10, %v1771_v31  ;;  %1817 = vmatmul.f32.gmra.mxu1 %v9453_v60  ;;  %3600 = vmatmul.f32.gmra.mxu3 %v3297_v51  ;;  %v3234_v10 = vsel %vm1292_vm0, %v2177_v58, %v5470_v59  ;;  %v5701_v62 = vunpack.i.h.bf16 %v8449_v49  ;;  %v9454_v59 = vld [vmem:[#allocation10_spill] sm:$0xff]  ;;  %v8520_v49 = vpop.permute.xlu1 %5723  ;;  %v8524_v60 = vpop.f32.mrf.mxu2  ;;  %v4744_v58 = vld [vmem:[%s6095_s9 + $0x12c] sm:$0xff] }
 0x237   : > { %v2106_v35 = vadd.f32 %v2105_v34, %v2104_v39  ;;  %v3266_v56 = vsel %vm1325_vm2, %v3234_v10, %v5690_v7  ;;  %v3330_v39 = vsel %vm1292_vm0, %v4613_v44, %v5700_v61  ;;  %4811 = vmatmul.msk.f32.gmra.mxu0 %vm1292_vm0, %v4743_v9  ;;  %v5705_v31 = vunpack.i.l.bf16 %v8469_v41  ;;  %v8515_v51 = vpop.f32.mrf.mxu0  ;;  %v4614_v7 = vld [vmem:[%s6095_s9 + $0xe2] sm:$0xff] }
 0x238   : > { %v1969_v47 = vmul.f32 %v8192_v52, %v1884_v21  ;;  %v3298_v45 = vsel %vm1358_vm1, %v3266_v56, %v5695_v30  ;;  %v3362_v16 = vsel %vm1325_vm2, %v3330_v39, %v5691_v2  ;;  %v5706_v44 = vunpack.i.h.bf16 %v8469_v41  ;;  %v8536_v56 = vpop.permute.xlu2 %5728 }
 0x239   : > { %3713 = vmatmul.f32.gmra.mxu2 %v3393_v18  ;;  %v3394_v21 = vsel %vm1358_vm1, %v3362_v16, %v5696_v26  ;;  %v3331_v9 = vsel %vm1292_vm0, %v4614_v7, %v5701_v62  ;;  %v5711_v2 = vunpack.i.h.bf16 %v8477_v54  ;;  %v8549_v16 = vpop.f32.mrf.mxu3  ;;  %v4615_v62 = vld [vmem:[%s6095_s9 + $0xf2] sm:$0xff]  ;;  %v5720_v7 = vunpack.i.l.bf16 %v8517_v50 }
 0x23a   : > { %v2005_v12 = vadd.f32 %v8208_v15, %v1969_v47  ;;  %v3235_v47 = vsel %vm1292_vm0, %v2178_v0, %v5471_v53  ;;  %v3363_v39 = vsel %vm1325_vm2, %v3331_v9, %v5706_v44  ;;  %v4745_v0 = vld [vmem:[%s6095_s9 + $0x13c] sm:$0xff] }
 0x23b   : > { %v1773_v23 = vpop.f32.mrf.mxu1  ;;  %v3267_v18 = vsel %vm1325_vm2, %v3235_v47, %v5705_v31  ;;  %v5715_v31 = vunpack.i.l.bf16 %v8498_v46 }
 0x23c   : > { %v2037_v5 = vmax.f32 %v2005_v12, 0.0  ;;  %v1774_v27 = vadd.f32 %v1773_v23, %v8075_v42  ;;  %v5725_v23 = vunpack.i.l.bf16 %v8520_v49 }
 0x23e   : > { %2069 = vst.msk [vmem:[%s8253_s30 + $0x38] sm:$0xff] %vm1292_vm0, %v2037_v5  ;;  %v2107_v63 = vsel %vm1292_vm0, %v2037_v5, 0.0  ;;  %v1887_v42 = vadd.f32 %v8111_v32, %v1774_v27  ;;  %1820 = vmatmul.f32.gmra.mxu1 %v9454_v59  ;;  %3603 = vmatmul.f32.gmra.mxu3 %v3298_v45  ;;  %v5710_v32 = vunpack.i.l.bf16 %v8477_v54  ;;  %v9455_v5 = vld [vmem:[#allocation13_spill] sm:$0xff]  ;;  %v9456_v27 = vld [vmem:[#allocation24_spill] sm:$0xff] }
 0x23f   : > { %v2108_v61 = vadd.f32 %v2107_v63, %v2106_v35  ;;  %4812 = vmatmul.msk.f32.gmra.mxu0 %vm1292_vm0, %v4744_v58  ;;  %v5475_v53 = vunpack.i.l.bf16 %v9456_v27  ;;  %v2179_v59 = vld [vmem:[%s6095_s9 + $0xc0] sm:$0xff]  ;;  %v8564_v58 = vpop.f32.mrf.mxu2 }
 0x240   : > { %v1970_v34 = vmul.f32 %v8192_v52, %v1887_v42  ;;  %v3299_v41 = vsel %vm1358_vm1, %v3267_v18, %v5710_v32  ;;  %v3395_v42 = vsel %vm1358_vm1, %v3363_v39, %v5711_v2  ;;  %v3332_v32 = vsel %vm1292_vm0, %v4615_v62, %v5725_v23  ;;  %v2180_v62 = vld [vmem:[%s6095_s9 + $0xc8] sm:$0xff] }
 0x241   : > { %3716 = vmatmul.f32.gmra.mxu2 %v3394_v21  ;;  %v3236_v47 = vsel %vm1292_vm0, %v2179_v59, %v5475_v53  ;;  %v5476_v23 = vunpack.i.h.bf16 %v9456_v27  ;;  %v5913_v27 = vld [vmem:[%s6095_s9 + $0xfa] sm:$0xff] }
 0x242   : > { %v2006_v35 = vadd.f32 %v8208_v15, %v1970_v34  ;;  %v8559_v34 = vpop.permute.xlu0 %5733  ;;  %v3268_v9 = vsel %vm1325_vm2, %v3236_v47, %v5715_v31  ;;  %v4746_v31 = vld [vmem:[%s6095_s9 + $0x144] sm:$0xff] }
 0x243   : > { %v1776_v30 = vpop.f32.mrf.mxu1  ;;  %v3300_v2 = vsel %vm1358_vm1, %v3268_v9, %v5720_v7  ;;  %v3237_v7 = vsel %vm1292_vm0, %v2180_v62, %v5476_v23 }
 0x244   : > { %v2038_v10 = vmax.f32 %v2006_v35, 0.0  ;;  %v1777_v12 = vadd.f32 %v1776_v30, %v8137_v29  ;;  %v8546_v29 = vpop.f32.mrf.mxu0  ;;  %v4726_v30 = vld [vmem:[%s6095_s9 + $0x1d2] sm:$0xff] }
 0x245   : > { %3186 = vrot.lane.b32.xlu2 %v4726_v30, %s6004_s12  ;;  %v8610_v30 = vld [vmem:[%s9345_s2 + $0x1] ss:$0 sm:$0xff]  ;;  %s227_s12 = scalar_lea.vmem [#allocation4], %s8198_s17 }
 0x246   : > { %2070 = vst.msk [vmem:[%s8253_s30 + $0x40] sm:$0xff] %vm1292_vm0, %v2038_v10  ;;  %v2109_v26 = vsel %vm1292_vm0, %v2038_v10, 0.0  ;;  %v1890_v54 = vadd.f32 %v8166_v37, %v1777_v12  ;;  %1823 = vmatmul.f32.gmra.mxu1 %v9455_v5  ;;  %3606 = vmatmul.f32.gmra.mxu3 %v3299_v41  ;;  %v5716_v37 = vunpack.i.h.bf16 %v8498_v46  ;;  %v5721_v46 = vunpack.i.h.bf16 %v8517_v50 }
 0x247   : > { %v2110_v45 = vadd.f32 %v2109_v26, %v2108_v61  ;;  %v8561_v61 = vpop.permute.xlu1 %5738  ;;  %4813 = vmatmul.msk.f32.gmra.mxu0 %vm1292_vm0, %v4745_v0  ;;  %v5726_v12 = vunpack.i.h.bf16 %v8520_v49  ;;  %v8585_v26 = vpop.permute.xlu2 %5743  ;;  %v5730_v5 = vunpack.i.l.bf16 %v8536_v56 }
 0x248   : > { %v1971_v63 = vmul.f32 %v8192_v52, %v1890_v54  ;;  %v3364_v10 = vsel %vm1325_vm2, %v3332_v32, %v5716_v37 }
 0x249   : > { %3719 = vmatmul.f32.gmra.mxu2 %v3395_v42  ;;  %v3396_v53 = vsel %vm1358_vm1, %v3364_v10, %v5721_v46  ;;  %v3333_v0 = vsel %vm1292_vm0, %v5913_v27, %v5726_v12  ;;  %v3269_v46 = vsel %vm1325_vm2, %v3237_v7, %v5730_v5  ;;  %v5740_v10 = vunpack.i.l.bf16 %v8561_v61 }
 0x24a   : > { %v2007_v21 = vadd.f32 %v8208_v15, %v1971_v63  ;;  %v5735_v63 = vunpack.i.l.bf16 %v8559_v34 }
 0x24b   : > { %v1779_v44 = vpop.f32.mrf.mxu1 }
 0x24c   : > { %v2039_v35 = vmax.f32 %v2007_v21, 0.0  ;;  %v1780_v18 = vadd.f32 %v1779_v44, %v8185_v28  ;;  %v9457_v28 = vld [vmem:[#allocation26_spill] sm:$0xff]  ;;  %v8582_v39 = vpop.f32.mrf.mxu0  ;;  %v5736_v21 = vunpack.i.h.bf16 %v8559_v34 }
 0x24e   : > { %2071 = vst.msk [vmem:[%s8253_s30 + $0x48] sm:$0xff] %vm1292_vm0, %v2039_v35  ;;  %v2111_v50 = vsel %vm1292_vm0, %v2039_v35, 0.0  ;;  %v1893_v41 = vadd.f32 %v8235_v8, %v1780_v18  ;;  %1826 = vmatmul.f32.gmra.mxu1 %v9457_v28  ;;  %3609 = vmatmul.f32.gmra.mxu3 %v3300_v2  ;;  %v5731_v8 = vunpack.i.h.bf16 %v8536_v56  ;;  %v9458_v35 = vld [vmem:[#allocation16_spill] sm:$0xff]  ;;  %v3301_v2 = vsel %vm1358_vm1, %v3269_v46, %v5735_v63 }
 0x24f   : > { %v2112_v54 = vadd.f32 %v2111_v50, %v2110_v45  ;;  %4814 = vmatmul.msk.f32.gmra.mxu0 %vm1292_vm0, %v4746_v31  ;;  %v8598_v45 = vpop.permute.xlu0 %5748  ;;  %v8602_v56 = vpop.permute.xlu1 %5753  ;;  %v5480_v18 = vunpack.i.l.bf16 %v9458_v35  ;;  %v2181_v28 = vld [vmem:[%s6095_s9 + $0xd8] sm:$0xff] }
 0x250   : > { %v1972_v49 = vmul.f32 %v8192_v52, %v1893_v41  ;;  %v3365_v34 = vsel %vm1325_vm2, %v3333_v0, %v5731_v8  ;;  %v9459_v41 = vld [vmem:[#allocation27_spill] sm:$0xff]  ;;  %v5745_v8 = vunpack.i.l.bf16 %v8585_v26  ;;  %v8634_v63 = vpop.permute.xlu2 %5758 }
 0x251   : > { %3722 = vmatmul.f32.gmra.mxu2 %v3396_v53  ;;  %v3562_v42 = vpop.f32.mrf.mxu3  ;;  %v8628_v53 = vld [vmem:[%s9346_s3 + $0x1] ss:$0 sm:$0xff]  ;;  %v3397_v31 = vsel %vm1358_vm1, %v3365_v34, %v5736_v21 }
 0x252   : > { %v2008_v59 = vadd.f32 %v8208_v15, %v1972_v49 }
 0x253   : > { %v1782_v37 = vpop.f32.mrf.mxu1 }
 0x254   : > { %v2040_v32 = vmax.f32 %v2008_v59, 0.0  ;;  %v1783_v44 = vadd.f32 %v1782_v37, %v8248_v40  ;;  %v3675_v47 = vpop.f32.mrf.mxu2  ;;  %v5750_v40 = vunpack.i.l.bf16 %v8598_v45  ;;  %v8622_v23 = vpop.f32.mrf.mxu0  ;;  %v3238_v59 = vsel %vm1292_vm0, %v2181_v28, %v5480_v18  ;;  %v5914_v37 = vld [vmem:[%s6095_s9 + $0x10a] sm:$0xff]  ;;  %v2182_v28 = vld [vmem:[%s6095_s9 + $0xe0] sm:$0xff] }
 0x255   : > { %v3676_v9 = vadd.f32 %v3675_v47, %v3562_v42  ;;  %v5741_v42 = vunpack.i.h.bf16 %v8561_v61  ;;  %v3270_v0 = vsel %vm1325_vm2, %v3238_v59, %v5740_v10  ;;  %v5481_v61 = vunpack.i.h.bf16 %v9458_v35 }
 0x256   : > { %2072 = vst.msk [vmem:[%s8253_s30 + $0x50] sm:$0xff] %vm1292_vm0, %v2040_v32  ;;  %v2113_v12 = vsel %vm1292_vm0, %v2040_v32, 0.0  ;;  %v1896_v50 = vadd.f32 %v8283_v25, %v1783_v44  ;;  %1829 = vmatmul.f32.gmra.mxu1 %v9459_v41  ;;  %3612 = vmatmul.f32.gmra.mxu3 %v3301_v2  ;;  %v4747_v25 = vld [vmem:[%s6095_s9 + $0x154] sm:$0xff]  ;;  %v3334_v7 = vsel %vm1292_vm0, %v5914_v37, %v5750_v40  ;;  %v5746_v44 = vunpack.i.h.bf16 %v8585_v26 }
 0x257   : > { %v2114_v5 = vadd.f32 %v2113_v12, %v2112_v54  ;;  %v3789_v49 = vadd.f32 %v8485_v38, %v3676_v9  ;;  %4815 = vmatmul.msk.f32.gmra.mxu0 %vm1292_vm0, %v4747_v25  ;;  %v8648_v9 = vpop.permute.xlu0 %5763  ;;  %v3302_v10 = vsel %vm1358_vm1, %v3270_v0, %v5745_v8  ;;  %v3366_v40 = vsel %vm1325_vm2, %v3334_v7, %v5741_v42  ;;  %v8654_v26 = vpop.permute.xlu1 %5768  ;;  %v9460_v41 = vld [vmem:[#allocation28_spill] sm:$0xff]  ;;  %v4748_v8 = vld [vmem:[%s6095_s9 + $0x15c] sm:$0xff] }
 0x258   : > { %v1973_v62 = vmul.f32 %v8192_v52, %v1896_v50  ;;  %v5755_v12 = vunpack.i.l.bf16 %v8602_v56  ;;  %v5751_v35 = vunpack.i.h.bf16 %v8598_v45  ;;  %v3398_v25 = vsel %vm1358_vm1, %v3366_v40, %v5746_v44  ;;  %v8679_v37 = vpop.permute.xlu2 %5773 }
 0x259   : > { %v3889_v54 = vmul.f32 %v8610_v30, %v3789_v49  ;;  %3725 = vmatmul.f32.gmra.mxu2 %v3397_v31  ;;  %v3565_v38 = vpop.f32.mrf.mxu3  ;;  %v5760_v42 = vunpack.i.l.bf16 %v8634_v63  ;;  %v3239_v59 = vsel %vm1292_vm0, %v2182_v28, %v5481_v61  ;;  %v5761_v61 = vunpack.i.h.bf16 %v8634_v63 }
 0x25a   : > { %v2009_v27 = vadd.f32 %v8208_v15, %v1973_v62 }
 0x25b   : > { %v3926_v21 = vadd.f32 %v8628_v53, %v3889_v54  ;;  %v1785_v32 = vpop.f32.mrf.mxu1 }
 0x25c   : > { %v2041_v47 = vmax.f32 %v2009_v27, 0.0  ;;  %v1786_v46 = vadd.f32 %v1785_v32, %v8300_v57  ;;  %v3678_v18 = vpop.f32.mrf.mxu2  ;;  %v8662_v49 = vpop.f32.mrf.mxu0  ;;  %v3271_v27 = vsel %vm1325_vm2, %v3239_v59, %v5755_v12  ;;  %v5775_v12 = vunpack.i.l.bf16 %v8679_v37 }
 0x25d   : > { %v3958_v2 = vmax.f32 %v3926_v21, 0.0  ;;  %v3679_v34 = vadd.f32 %v3678_v18, %v3565_v38  ;;  %v9461_v21 = vld [vmem:[#allocation22_spill] sm:$0xff]  ;;  %v5766_v59 = vunpack.i.h.bf16 %v8648_v9 }
 0x25e   : > { %2073 = vst.msk [vmem:[%s8253_s30 + $0x58] sm:$0xff] %vm1292_vm0, %v2041_v47  ;;  %v2115_v57 = vsel %vm1292_vm0, %v2041_v47, 0.0  ;;  %v1899_v50 = vadd.f32 %v8328_v13, %v1786_v46  ;;  %1832 = vmatmul.f32.gmra.mxu1 %v9460_v41  ;;  %3615 = vmatmul.f32.gmra.mxu3 %v3302_v10  ;;  %v5756_v13 = vunpack.i.h.bf16 %v8602_v56  ;;  %v5485_v32 = vunpack.i.l.bf16 %v9461_v21 }
 0x25f   : > { %v2116_v62 = vadd.f32 %v2115_v57, %v2114_v5  ;;  %4829 = vst.msk [vmem:[%s8253_s30 + $0x100] sm:$0xff] %vm1292_vm0, %v3958_v2  ;;  %v3792_v45 = vadd.f32 %v8515_v51, %v3679_v34  ;;  %v5915_v51 = vld [vmem:[%s6095_s9 + $0x112] sm:$0xff]  ;;  %4816 = vmatmul.msk.f32.gmra.mxu0 %vm1292_vm0, %v4748_v8  ;;  %v3303_v10 = vsel %vm1358_vm1, %v3271_v27, %v5760_v42  ;;  %v8697_v28 = vpop.permute.xlu0 %5778 }
 0x260   : > { %v1974_v31 = vmul.f32 %v8192_v52, %v1899_v50  ;;  %v3335_v0 = vsel %vm1292_vm0, %v5915_v51, %v5751_v35  ;;  %v5765_v35 = vunpack.i.l.bf16 %v8648_v9  ;;  %v9462_v50 = vld [vmem:[#allocation29_spill] sm:$0xff]  ;;  %v4749_v27 = vld [vmem:[%s6095_s9 + $0x16c] sm:$0xff] }
 0x261   : > { %v3890_v54 = vmul.f32 %v8610_v30, %v3792_v45  ;;  %3728 = vmatmul.f32.gmra.mxu2 %v3398_v25  ;;  %v3568_v38 = vpop.f32.mrf.mxu3  ;;  %v3367_v40 = vsel %vm1325_vm2, %v3335_v0, %v5756_v13  ;;  %v4023_v45 = vsel %vm1292_vm0, %v3958_v2, 0.0  ;;  %v5916_v0 = vld [vmem:[%s6095_s9 + $0x122] sm:$0xff] }
 0x262   : > { %v2010_v5 = vadd.f32 %v8208_v15, %v1974_v31 }
 0x263   : > { %v3927_v56 = vadd.f32 %v8628_v53, %v3890_v54  ;;  %v1788_v7 = vpop.f32.mrf.mxu1  ;;  %v3399_v54 = vsel %vm1358_vm1, %v3367_v40, %v5761_v61  ;;  %v5771_v61 = vunpack.i.h.bf16 %v8654_v26  ;;  %v5776_v40 = vunpack.i.h.bf16 %v8679_v37 }
 0x264   : > { %v2042_v44 = vmax.f32 %v2010_v5, 0.0  ;;  %v1789_v47 = vadd.f32 %v1788_v7, %v8348_v11  ;;  %v3681_v46 = vpop.f32.mrf.mxu2  ;;  %v2183_v11 = vld [vmem:[%s6095_s9 + $0xf0] sm:$0xff]  ;;  %v8695_v41 = vpop.f32.mrf.mxu0  ;;  %v5486_v7 = vunpack.i.h.bf16 %v9461_v21  ;;  %v5780_v21 = vunpack.i.l.bf16 %v8697_v28 }
 0x265   : > { %v3959_v18 = vmax.f32 %v3927_v56, 0.0  ;;  %v3682_v34 = vadd.f32 %v3681_v46, %v3568_v38  ;;  %v5770_v38 = vunpack.i.l.bf16 %v8654_v26  ;;  %v3240_v5 = vsel %vm1292_vm0, %v2183_v11, %v5485_v32 }
 0x266   : > { %2074 = vst.msk [vmem:[%s8253_s30 + $0x60] sm:$0xff] %vm1292_vm0, %v2042_v44  ;;  %v2117_v57 = vsel %vm1292_vm0, %v2042_v44, 0.0  ;;  %v1902_v63 = vadd.f32 %v8374_v36, %v1789_v47  ;;  %1835 = vmatmul.f32.gmra.mxu1 %v9462_v50  ;;  %3618 = vmatmul.f32.gmra.mxu3 %v3303_v10  ;;  %v8704_v36 = vpop.permute.xlu1 %5783  ;;  %v3272_v51 = vsel %vm1325_vm2, %v3240_v5, %v5765_v35  ;;  %v8722_v47 = vpop.permute.xlu2 %5788  ;;  %v2184_v35 = vld [vmem:[%s6095_s9 + $0xf8] sm:$0xff]  ;;  %v5919_v5 = vld [vmem:[%s6095_s9 + $0x12a] sm:$0xff] }
 0x267   : > { %v2118_v31 = vadd.f32 %v2117_v57, %v2116_v62  ;;  %4830 = vst.msk [vmem:[%s8253_s30 + $0x108] sm:$0xff] %vm1292_vm0, %v3959_v18  ;;  %v4024_v25 = vsel %vm1292_vm0, %v3959_v18, 0.0  ;;  %v3795_v8 = vadd.f32 %v8546_v29, %v3682_v34  ;;  %4817 = vmatmul.msk.f32.gmra.mxu0 %vm1292_vm0, %v4749_v27  ;;  %v3304_v34 = vsel %vm1358_vm1, %v3272_v51, %v5770_v38  ;;  %v4750_v38 = vld [vmem:[%s6095_s9 + $0x174] sm:$0xff] }
 0x268   : > { %v4025_v42 = vadd.f32 %v4024_v25, %v4023_v45  ;;  %v1975_v13 = vmul.f32 %v8192_v52, %v1902_v63  ;;  %v3336_v52 = vsel %vm1292_vm0, %v5916_v0, %v5775_v12  ;;  %v9463_v12 = vld [vmem:[#allocation17_spill] sm:$0xff]  ;;  %v5785_v25 = vunpack.i.l.bf16 %v8704_v36 }
 0x269   : > { %v3891_v2 = vmul.f32 %v8610_v30, %v3795_v8  ;;  %3731 = vmatmul.f32.gmra.mxu2 %v3399_v54  ;;  %v3571_v62 = vpop.f32.mrf.mxu3  ;;  %v3368_v10 = vsel %vm1325_vm2, %v3336_v52, %v5766_v59  ;;  %v5781_v8 = vunpack.i.h.bf16 %v8697_v28  ;;  %v3241_v54 = vsel %vm1292_vm0, %v2184_v35, %v5486_v7 }
 0x26a   : > { %v2011_v29 = vadd.f32 %v8208_v15, %v1975_v13  ;;  %v8749_v13 = vpop.permute.xlu0 %5793  ;;  %v3273_v28 = vsel %vm1325_vm2, %v3241_v54, %v5780_v21  ;;  %v3337_v27 = vsel %vm1292_vm0, %v5919_v5, %v5776_v40  ;;  %v5786_v0 = vunpack.i.h.bf16 %v8704_v36 }
 0x26b   : > { %v3928_v56 = vadd.f32 %v8628_v53, %v3891_v2  ;;  %v1791_v9 = vpop.f32.mrf.mxu1  ;;  %v8759_v2 = vld [vmem:[%s9346_s3] ss:$0 sm:$0xff] }
 0x26c   : > { %v2043_v32 = vmax.f32 %v2011_v29, 0.0  ;;  %v1792_v44 = vadd.f32 %v1791_v9, %v8387_v3  ;;  %v3684_v15 = vpop.f32.mrf.mxu2  ;;  %v8738_v50 = vpop.f32.mrf.mxu0 }
 0x26d   : > { %v3960_v46 = vmax.f32 %v3928_v56, 0.0  ;;  %v3685_v18 = vadd.f32 %v3684_v15, %v3571_v62 }
 0x26e   : > { %2075 = vst.msk [vmem:[%s8253_s30 + $0x68] sm:$0xff] %vm1292_vm0, %v2043_v32  ;;  %v2119_v26 = vsel %vm1292_vm0, %v2043_v32, 0.0  ;;  %v1905_v3 = vadd.f32 %v8422_v48, %v1792_v44  ;;  %1838 = vmatmul.f32.gmra.mxu1 %v9463_v12  ;;  %3621 = vmatmul.f32.gmra.mxu3 %v3304_v34  ;;  %v8743_v48 = vld [vmem:[%s9345_s2] ss:$0 sm:$0xff]  ;;  %v8754_v59 = vpop.permute.xlu1 %5798  ;;  %v3305_v32 = vsel %vm1358_vm1, %v3273_v28, %v5785_v25 }
 0x26f   : > { %v2120_v57 = vadd.f32 %v2119_v26, %v2118_v31  ;;  %4831 = vst.msk [vmem:[%s8253_s30 + $0x110] sm:$0xff] %vm1292_vm0, %v3960_v46  ;;  %v4026_v63 = vsel %vm1292_vm0, %v3960_v46, 0.0  ;;  %v3798_v37 = vadd.f32 %v8582_v39, %v3685_v18  ;;  %v3400_v31 = vsel %vm1358_vm1, %v3368_v10, %v5771_v61  ;;  %4818 = vmatmul.msk.f32.gmra.mxu0 %vm1292_vm0, %v4750_v38  ;;  %v9464_v18 = vld [vmem:[#allocation18_spill] sm:$0xff]  ;;  %v8778_v10 = vpop.permute.xlu2 %5803 }
 0x270   : > { %v4027_v11 = vadd.f32 %v4026_v63, %v4025_v42  ;;  %v1976_v45 = vmul.f32 %v8743_v48, %v1905_v3  ;;  %v3369_v44 = vsel %vm1325_vm2, %v3337_v27, %v5781_v8  ;;  %v5800_v15 = vunpack.i.l.bf16 %v8754_v59  ;;  %v4751_v8 = vld [vmem:[%s6095_s9 + $0x184] sm:$0xff]  ;;  %v9466_v27 = vld [vmem:[#allocation20_spill] sm:$0xff] }
 0x271   : > { %v3892_v39 = vmul.f32 %v8610_v30, %v3798_v37  ;;  %3734 = vmatmul.f32.gmra.mxu2 %v3400_v31  ;;  %v3574_v42 = vpop.f32.mrf.mxu3  ;;  %v3401_v63 = vsel %vm1358_vm1, %v3369_v44, %v5786_v0  ;;  %v2185_v37 = vld [vmem:[%s6095_s9 + $0x108] sm:$0xff] }
 0x272   : > { %v2012_v62 = vadd.f32 %v8759_v2, %v1976_v45  ;;  %v5791_v45 = vunpack.i.h.bf16 %v8722_v47 }
 0x273   : > { %v3929_v29 = vadd.f32 %v8628_v53, %v3892_v39  ;;  %v1794_v51 = vpop.f32.mrf.mxu1  ;;  %v5920_v39 = vld [vmem:[%s6095_s9 + $0x13a] sm:$0xff] }
 0x274   : > { %v2044_v52 = vmax.f32 %v2012_v62, 0.0  ;;  %v1795_v56 = vadd.f32 %v1794_v51, %v8434_v24  ;;  %v3687_v9 = vpop.f32.mrf.mxu2  ;;  %v9465_v24 = vld [vmem:[#allocation30_spill] sm:$0xff]  ;;  %v8784_v3 = vpop.f32.mrf.mxu0  ;;  %v5796_v62 = vunpack.i.h.bf16 %v8749_v13 }
 0x275   : > { %v3961_v7 = vmax.f32 %v3929_v29, 0.0  ;;  %v3688_v61 = vadd.f32 %v3687_v9, %v3574_v42  ;;  %v5490_v34 = vunpack.i.l.bf16 %v9465_v24  ;;  %v3338_v42 = vsel %vm1292_vm0, %v5920_v39, %v5800_v15 }
 0x276   : > { %2076 = vst.msk [vmem:[%s8253_s30 + $0x70] sm:$0xff] %vm1292_vm0, %v2044_v52  ;;  %v2121_v46 = vsel %vm1292_vm0, %v2044_v52, 0.0  ;;  %v1908_v36 = vadd.f32 %v8473_v4, %v1795_v56  ;;  %1841 = vmatmul.f32.gmra.mxu1 %v9464_v18  ;;  %3624 = vmatmul.f32.gmra.mxu3 %v3305_v32  ;;  %v5790_v4 = vunpack.i.l.bf16 %v8722_v47  ;;  %v8803_v28 = vpop.permute.xlu1 %5813  ;;  %v5491_v44 = vunpack.i.h.bf16 %v9465_v24 }
 0x277   : > { %v2122_v40 = vadd.f32 %v2121_v46, %v2120_v57  ;;  %4832 = vst.msk [vmem:[%s8253_s30 + $0x118] sm:$0xff] %vm1292_vm0, %v3961_v7  ;;  %v4028_v21 = vsel %vm1292_vm0, %v3961_v7, 0.0  ;;  %v3801_v26 = vadd.f32 %v8622_v23, %v3688_v61  ;;  %v5795_v57 = vunpack.i.l.bf16 %v8749_v13  ;;  %4819 = vmatmul.msk.f32.gmra.mxu0 %vm1292_vm0, %v4751_v8 }
 0x278   : > { %v4029_v12 = vadd.f32 %v4028_v21, %v4027_v11  ;;  %v1977_v35 = vmul.f32 %v8743_v48, %v1908_v36  ;;  %v8798_v11 = vpop.permute.xlu0 %5808  ;;  %v3242_v38 = vsel %vm1292_vm0, %v2185_v37, %v5490_v34  ;;  %v3370_v7 = vsel %vm1325_vm2, %v3338_v42, %v5791_v45  ;;  %v5921_v37 = vld [vmem:[%s6095_s9 + $0x142] sm:$0xff]  ;;  %v4752_v45 = vld [vmem:[%s6095_s9 + $0x18c] sm:$0xff] }
 0x279   : > { %v3893_v31 = vmul.f32 %v8610_v30, %v3801_v26  ;;  %3737 = vmatmul.f32.gmra.mxu2 %v3401_v63  ;;  %v3577_v25 = vpop.f32.mrf.mxu3  ;;  %v3274_v0 = vsel %vm1325_vm2, %v3242_v38, %v5790_v4  ;;  %v5801_v61 = vunpack.i.h.bf16 %v8754_v59  ;;  %v5805_v59 = vunpack.i.l.bf16 %v8778_v10  ;;  %v2186_v26 = vld [vmem:[%s6095_s9 + $0x110] sm:$0xff] }
 0x27a   : > { %v2013_v23 = vadd.f32 %v8759_v2, %v1977_v35  ;;  %v3306_v9 = vsel %vm1358_vm1, %v3274_v0, %v5795_v57  ;;  %v5806_v24 = vunpack.i.h.bf16 %v8778_v10  ;;  %v5810_v4 = vunpack.i.l.bf16 %v8798_v11  ;;  %v9467_v57 = vld [vmem:[#allocation36_spill] sm:$0xff]  ;;  %v9468_v42 = vld [vmem:[#allocation11_spill] sm:$0xff] }
 0x27b   : > { %v3930_v54 = vadd.f32 %v8628_v53, %v3893_v31  ;;  %v1797_v47 = vpop.f32.mrf.mxu1  ;;  %v5495_v31 = vunpack.i.l.bf16 %v9467_v57  ;;  %v3243_v10 = vsel %vm1292_vm0, %v2186_v26, %v5491_v44  ;;  %v5815_v0 = vunpack.i.l.bf16 %v8803_v28 }
 0x27c   : > { %v2045_v5 = vmax.f32 %v2013_v23, 0.0  ;;  %v1798_v29 = vadd.f32 %v1797_v47, %v9466_v27  ;;  %v3690_v51 = vpop.f32.mrf.mxu2  ;;  %v8819_v18 = vpop.f32.mrf.mxu0  ;;  %v5811_v23 = vunpack.i.h.bf16 %v8798_v11  ;;  %v3275_v38 = vsel %vm1325_vm2, %v3243_v10, %v5805_v59 }
 0x27d   : > { %v3962_v52 = vmax.f32 %v3930_v54, 0.0  ;;  %v3691_v56 = vadd.f32 %v3690_v51, %v3577_v25 }
 0x27e   : > { %2077 = vst.msk [vmem:[%s8253_s30 + $0x78] sm:$0xff] %vm1292_vm0, %v2045_v5  ;;  %v2123_v13 = vsel %vm1292_vm0, %v2045_v5, 0.0  ;;  %v1911_v32 = vadd.f32 %v8524_v60, %v1798_v29  ;;  %3627 = vmatmul.f32.gmra.mxu3 %v3306_v9  ;;  %v3402_v60 = vsel %vm1358_vm1, %v3370_v7, %v5796_v62  ;;  %v3307_v29 = vsel %vm1358_vm1, %v3275_v38, %v5810_v4  ;;  %v2187_v7 = vld [vmem:[%s6095_s9 + $0x120] sm:$0xff] }
 0x27f   : > { %v2124_v15 = vadd.f32 %v2123_v13, %v2122_v40  ;;  %4833 = vst.msk [vmem:[%s8253_s30 + $0x120] sm:$0xff] %vm1292_vm0, %v3962_v52  ;;  %v4030_v46 = vsel %vm1292_vm0, %v3962_v52, 0.0  ;;  %v3804_v36 = vadd.f32 %v8662_v49, %v3691_v56  ;;  %v8826_v40 = vpop.permute.xlu2 %5818  ;;  %4820 = vmatmul.msk.f32.gmra.mxu0 %vm1292_vm0, %v4752_v45  ;;  %v8846_v52 = vpop.permute.xlu1 %5828  ;;  %v3244_v26 = vsel %vm1292_vm0, %v2187_v7, %v5495_v31  ;;  %v9469_v45 = vld [vmem:[#allocation25_spill] sm:$0xff] }
 0x280   : > { %v4031_v34 = vadd.f32 %v4030_v46, %v4029_v12  ;;  %v1978_v21 = vmul.f32 %v8743_v48, %v1911_v32  ;;  %v3339_v12 = vsel %vm1292_vm0, %v5921_v37, %v5801_v61  ;;  %v8841_v62 = vpop.permute.xlu0 %5823  ;;  %v5821_v37 = vunpack.i.h.bf16 %v8826_v40 }
 0x281   : > { %v3894_v35 = vmul.f32 %v8610_v30, %v3804_v36  ;;  %3740 = vmatmul.f32.gmra.mxu2 %v3402_v60  ;;  %v3580_v49 = vpop.f32.mrf.mxu3  ;;  %v3371_v51 = vsel %vm1325_vm2, %v3339_v12, %v5806_v24  ;;  %v5825_v11 = vunpack.i.l.bf16 %v8841_v62  ;;  %v5831_v7 = vunpack.i.h.bf16 %v8846_v52 }
 0x282   : > { %v2014_v63 = vadd.f32 %v8759_v2, %v1978_v21  ;;  %v3403_v36 = vsel %vm1358_vm1, %v3371_v51, %v5811_v23  ;;  %v5820_v21 = vunpack.i.l.bf16 %v8826_v40  ;;  %v9470_v40 = vld [vmem:[#allocation41_spill] sm:$0xff] }
 0x283   : > { %v3931_v25 = vadd.f32 %v8628_v53, %v3894_v35  ;;  %v1800_v8 = vpop.f32.mrf.mxu1 }
 0x284   : > { %v2046_v39 = vmax.f32 %v2014_v63, 0.0  ;;  %v1801_v54 = vadd.f32 %v1800_v8, %v9468_v42  ;;  %v3693_v47 = vpop.f32.mrf.mxu2  ;;  %v8860_v59 = vpop.f32.mrf.mxu0  ;;  %v5830_v42 = vunpack.i.l.bf16 %v8846_v52  ;;  %v9471_v52 = vld [vmem:[#allocation23_spill] sm:$0xff] }
 0x285   : > { %v3963_v5 = vmax.f32 %v3931_v25, 0.0  ;;  %v3694_v27 = vadd.f32 %v3693_v47, %v3580_v49  ;;  %v2188_v47 = vld [vmem:[%s6095_s9 + $0x128] sm:$0xff] }
 0x286   : > { %2078 = vst.msk [vmem:[%s8253_s30 + $0x80] sm:$0xff] %vm1292_vm0, %v2046_v39  ;;  %v2125_v56 = vsel %vm1292_vm0, %v2046_v39, 0.0  ;;  %v1914_v9 = vadd.f32 %v8564_v58, %v1801_v54  ;;  %3630 = vmatmul.f32.gmra.mxu3 %v3307_v29  ;;  %v5816_v58 = vunpack.i.h.bf16 %v8803_v28  ;;  %v5496_v28 = vunpack.i.h.bf16 %v9467_v57 }
 0x287   : > { %v2126_v61 = vadd.f32 %v2125_v56, %v2124_v15  ;;  %4834 = vst.msk [vmem:[%s8253_s30 + $0x128] sm:$0xff] %vm1292_vm0, %v3963_v5  ;;  %v4032_v13 = vsel %vm1292_vm0, %v3963_v5, 0.0  ;;  %v3807_v32 = vadd.f32 %v8695_v41, %v3694_v27  ;;  %v3276_v41 = vsel %vm1325_vm2, %v3244_v26, %v5815_v0  ;;  %v8870_v35 = vpop.permute.xlu2 %5833  ;;  %4821 = vmatmul.msk.f32.gmra.mxu0 %vm1292_vm0, %v8409_v17  ;;  %v8893_v51 = vpop.permute.xlu1 %5843 }
 0x288   : > { %v4033_v44 = vadd.f32 %v4032_v13, %v4031_v34  ;;  %v1979_v46 = vmul.f32 %v8743_v48, %v1914_v9  ;;  %v5922_v34 = vld [vmem:[%s6095_s9 + $0x152] sm:$0xff]  ;;  %v3308_v23 = vsel %vm1358_vm1, %v3276_v41, %v5820_v21  ;;  %v5826_v17 = vunpack.i.h.bf16 %v8841_v62  ;;  %v8887_v38 = vpop.permute.xlu0 %5838 }
 0x289   : > { %v3895_v15 = vmul.f32 %v8610_v30, %v3807_v32  ;;  %3743 = vmatmul.f32.gmra.mxu2 %v3403_v36  ;;  %v3583_v60 = vpop.f32.mrf.mxu3  ;;  %v3340_v4 = vsel %vm1292_vm0, %v5922_v34, %v5825_v11  ;;  %v5835_v9 = vunpack.i.l.bf16 %v8870_v35  ;;  %v3245_v32 = vsel %vm1292_vm0, %v2188_v47, %v5496_v28 }
 0x28a   : > { %v2015_v24 = vadd.f32 %v8759_v2, %v1979_v46  ;;  %v3372_v39 = vsel %vm1325_vm2, %v3340_v4, %v5816_v58  ;;  %v5923_v46 = vld [vmem:[%s6095_s9 + $0x15a] sm:$0xff] }
 0x28b   : > { %v3932_v49 = vadd.f32 %v8628_v53, %v3895_v15  ;;  %v1803_v63 = vpop.f32.mrf.mxu1  ;;  %v3404_v11 = vsel %vm1358_vm1, %v3372_v39, %v5821_v37  ;;  %v3341_v36 = vsel %vm1292_vm0, %v5923_v46, %v5826_v17  ;;  %v5500_v15 = vunpack.i.l.bf16 %v9471_v52 }
 0x28c   : > { %v2047_v12 = vmax.f32 %v2015_v24, 0.0  ;;  %v1804_v31 = vadd.f32 %v1803_v63, %v9469_v45  ;;  %v3696_v25 = vpop.f32.mrf.mxu2  ;;  %v8897_v56 = vpop.f32.mrf.mxu0  ;;  %v9472_v24 = vld [vmem:[#allocation31_spill] sm:$0xff]  ;;  %v3373_v37 = vsel %vm1325_vm2, %v3341_v36, %v5831_v7  ;;  %v5501_v7 = vunpack.i.h.bf16 %v9471_v52 }
 0x28d   : > { %v3964_v8 = vmax.f32 %v3932_v49, 0.0  ;;  %v3697_v10 = vadd.f32 %v3696_v25, %v3583_v60  ;;  %v5836_v60 = vunpack.i.h.bf16 %v8870_v35 }
 0x28e   : > { %2079 = vst.msk [vmem:[%s8253_s30 + $0x88] sm:$0xff] %vm1292_vm0, %v2047_v12  ;;  %v2127_v57 = vsel %vm1292_vm0, %v2047_v12, 0.0  ;;  %v1917_v54 = vadd.f32 %v9470_v40, %v1804_v31  ;;  %3633 = vmatmul.f32.gmra.mxu3 %v3308_v23  ;;  %v5840_v12 = vunpack.i.l.bf16 %v8887_v38  ;;  %v2189_v31 = vld [vmem:[%s6095_s9 + $0x138] sm:$0xff] }
 0x28f   : > { %v2128_v5 = vadd.f32 %v2127_v57, %v2126_v61  ;;  %4835 = vst.msk [vmem:[%s8253_s30 + $0x130] sm:$0xff] %vm1292_vm0, %v3964_v8  ;;  %v4034_v27 = vsel %vm1292_vm0, %v3964_v8, 0.0  ;;  %v3810_v29 = vadd.f32 %v8738_v50, %v3697_v10  ;;  %4822 = vmatmul.msk.f32.gmra.mxu0 %vm1292_vm0, %v8458_v6  ;;  %v8913_v4 = vpop.permute.xlu2 %5848  ;;  %v5841_v57 = vunpack.i.h.bf16 %v8887_v38 }
 0x290   : > { %v4035_v62 = vadd.f32 %v4034_v27, %v4033_v44  ;;  %v1980_v0 = vmul.f32 %v8743_v48, %v1917_v54  ;;  %v3277_v44 = vsel %vm1325_vm2, %v3245_v32, %v5830_v42  ;;  %v5850_v6 = vunpack.i.l.bf16 %v8913_v4  ;;  %v8934_v40 = vpop.permute.xlu0 %5853  ;;  %v9473_v32 = vld [vmem:[#allocation32_spill] sm:$0xff] }
 0x291   : > { %v3896_v61 = vmul.f32 %v8610_v30, %v3810_v29  ;;  %3746 = vmatmul.f32.gmra.mxu2 %v3404_v11  ;;  %v3586_v13 = vpop.f32.mrf.mxu3  ;;  %v3309_v28 = vsel %vm1358_vm1, %v3277_v44, %v5835_v9  ;;  %v3405_v42 = vsel %vm1358_vm1, %v3373_v37, %v5836_v60  ;;  %v4755_v11 = vld [vmem:[%s6095_s9 + $0x1b4] sm:$0xff]  ;;  %v5855_v60 = vunpack.i.l.bf16 %v8934_v40 }
 0x292   : > { %v2016_v50 = vadd.f32 %v8759_v2, %v1980_v0 }
 0x293   : > { %v3933_v21 = vadd.f32 %v8628_v53, %v3896_v61  ;;  %v1806_v58 = vpop.f32.mrf.mxu1  ;;  %v5846_v61 = vunpack.i.h.bf16 %v8893_v51 }
 0x294   : > { %v2048_v26 = vmax.f32 %v2016_v50, 0.0  ;;  %v1807_v41 = vadd.f32 %v1806_v58, %v9472_v24  ;;  %v3699_v34 = vpop.f32.mrf.mxu2  ;;  %v8930_v17 = vpop.f32.mrf.mxu0  ;;  %v2190_v24 = vld [vmem:[%s6095_s9 + $0x140] sm:$0xff] }
 0x295   : > { %v3965_v49 = vmax.f32 %v3933_v21, 0.0  ;;  %v3700_v63 = vadd.f32 %v3699_v34, %v3586_v13 }
 0x296   : > { %2080 = vst.msk [vmem:[%s8253_s30 + $0x90] sm:$0xff] %vm1292_vm0, %v2048_v26  ;;  %v2129_v35 = vsel %vm1292_vm0, %v2048_v26, 0.0  ;;  %v1920_v45 = vadd.f32 %v7968_v14, %v1807_v41  ;;  %3636 = vmatmul.f32.gmra.mxu3 %v3309_v28  ;;  %v5845_v14 = vunpack.i.l.bf16 %v8893_v51  ;;  %v9474_v51 = vld [vmem:[#allocation44_spill] sm:$0xff] }
 0x297   : > { %v2130_v25 = vadd.f32 %v2129_v35, %v2128_v5  ;;  %4836 = vst.msk [vmem:[%s8253_s30 + $0x138] sm:$0xff] %vm1292_vm0, %v3965_v49  ;;  %v4036_v8 = vsel %vm1292_vm0, %v3965_v49, 0.0  ;;  %v3813_v10 = vadd.f32 %v8784_v3, %v3700_v63  ;;  %v3246_v3 = vsel %vm1292_vm0, %v2189_v31, %v5500_v15  ;;  %v8938_v5 = vpop.permute.xlu1 %5858  ;;  %4823 = vmatmul.msk.f32.gmra.mxu0 %vm1292_vm0, %v4755_v11  ;;  %v8959_v41 = vpop.permute.xlu2 %5863 }
 0x298   : > { %v4037_v23 = vadd.f32 %v4036_v8, %v4035_v62  ;;  %v1981_v39 = vmul.f32 %v8743_v48, %v1920_v45  ;;  %v3278_v29 = vsel %vm1325_vm2, %v3246_v3, %v5840_v12  ;;  %v5924_v62 = vld [vmem:[%s6095_s9 + $0x16a] sm:$0xff]  ;;  %v5851_v15 = vunpack.i.h.bf16 %v8913_v4  ;;  %v9475_v3 = vld [vmem:[#allocation34_spill] sm:$0xff] }
 0x299   : > { %v3897_v54 = vmul.f32 %v8610_v30, %v3813_v10  ;;  %3749 = vmatmul.f32.gmra.mxu2 %v3405_v42  ;;  %v3589_v47 = vpop.f32.mrf.mxu3  ;;  %v3342_v0 = vsel %vm1292_vm0, %v5924_v62, %v5850_v6  ;;  %v3310_v21 = vsel %vm1358_vm1, %v3278_v29, %v5845_v14  ;;  %v5860_v12 = vunpack.i.l.bf16 %v8938_v5  ;;  %v5925_v10 = vld [vmem:[%s6095_s9 + $0x172] sm:$0xff]  ;;  %v8978_v42 = vpop.permute.xlu0 %5868 }
 0x29a   : > { %v2017_v27 = vadd.f32 %v8759_v2, %v1981_v39  ;;  %v3374_v58 = vsel %vm1325_vm2, %v3342_v0, %v5841_v57  ;;  %v5856_v35 = vunpack.i.h.bf16 %v8934_v40  ;;  %v4756_v39 = vld [vmem:[%s6095_s9 + $0x1bc] sm:$0xff]  ;;  %v5861_v40 = vunpack.i.h.bf16 %v8938_v5 }
 0x29b   : > { %v3934_v38 = vadd.f32 %v8628_v53, %v3897_v54  ;;  %v1809_v9 = vpop.f32.mrf.mxu1  ;;  %v3406_v37 = vsel %vm1358_vm1, %v3374_v58, %v5846_v61 }
 0x29c   : > { %v2049_v13 = vmax.f32 %v2017_v27, 0.0  ;;  %v1810_v50 = vadd.f32 %v1809_v9, %v9473_v32  ;;  %v3702_v44 = vpop.f32.mrf.mxu2  ;;  %v8967_v6 = vpop.f32.mrf.mxu0 }
 0x29d   : > { %v3966_v46 = vmax.f32 %v3934_v38, 0.0  ;;  %v3703_v36 = vadd.f32 %v3702_v44, %v3589_v47 }
 0x29e   : > { %2081 = vst.msk [vmem:[%s8253_s30 + $0x98] sm:$0xff] %vm1292_vm0, %v2049_v13  ;;  %v2131_v52 = vsel %vm1292_vm0, %v2049_v13, 0.0  ;;  %v1923_v26 = vadd.f32 %v9474_v51, %v1810_v50  ;;  %3639 = vmatmul.f32.gmra.mxu3 %v3310_v21  ;;  %v9477_v13 = vld [vmem:[#allocation21_spill] sm:$0xff]  ;;  %v5866_v51 = vunpack.i.h.bf16 %v8959_v41 }
 0x29f   : > { %v2132_v34 = vadd.f32 %v2131_v52, %v2130_v25  ;;  %4837 = vst.msk [vmem:[%s8253_s30 + $0x140] sm:$0xff] %vm1292_vm0, %v3966_v46  ;;  %v4038_v49 = vsel %vm1292_vm0, %v3966_v46, 0.0  ;;  %v3816_v4 = vadd.f32 %v8819_v18, %v3703_v36  ;;  %v3247_v25 = vsel %vm1292_vm0, %v2190_v24, %v5501_v7  ;;  %4824 = vmatmul.msk.f32.gmra.mxu0 %vm1292_vm0, %v4756_v39  ;;  %v8983_v54 = vpop.permute.xlu1 %5873  ;;  %v9476_v7 = vld [vmem:[#allocation47_spill] sm:$0xff] }
 0x2a0   : > { %v4039_v63 = vadd.f32 %v4038_v49, %v4037_v23  ;;  %v1982_v28 = vmul.f32 %v8743_v48, %v1923_v26  ;;  %v3279_v18 = vsel %vm1325_vm2, %v3247_v25, %v5855_v60  ;;  %v3343_v23 = vsel %vm1292_vm0, %v5925_v10, %v5851_v15  ;;  %v2191_v60 = vld [vmem:[%s6095_s9 + $0x150] sm:$0xff]  ;;  %v9005_v26 = vpop.permute.xlu2 %5878 }
 0x2a1   : > { %v3898_v45 = vmul.f32 %v8610_v30, %v3816_v4  ;;  %3752 = vmatmul.f32.gmra.mxu2 %v3406_v37  ;;  %v3592_v31 = vpop.f32.mrf.mxu3  ;;  %v3311_v11 = vsel %vm1358_vm1, %v3279_v18, %v5860_v12  ;;  %v3375_v38 = vsel %vm1325_vm2, %v3343_v23, %v5856_v35  ;;  %v5875_v9 = vunpack.i.l.bf16 %v8983_v54  ;;  %v5926_v4 = vld [vmem:[%s6095_s9 + $0x182] sm:$0xff]  ;;  %v5884_v10 = vpop.permute.xlu0 %5883 }
 0x2a2   : > { %v2018_v8 = vadd.f32 %v8759_v2, %v1982_v28  ;;  %v5505_v32 = vunpack.i.l.bf16 %v9477_v13  ;;  %v5865_v36 = vunpack.i.l.bf16 %v8959_v41  ;;  %v3407_v15 = vsel %vm1358_vm1, %v3375_v38, %v5861_v40  ;;  %v4757_v28 = vld [vmem:[%s6095_s9 + $0x1cc] sm:$0xff] }
 0x2a3   : > { %v3935_v14 = vadd.f32 %v8628_v53, %v3898_v45  ;;  %v1812_v57 = vpop.f32.mrf.mxu1  ;;  %v5870_v24 = vunpack.i.l.bf16 %v8978_v42  ;;  %v5871_v35 = vunpack.i.h.bf16 %v8978_v42  ;;  %v5876_v40 = vunpack.i.h.bf16 %v8983_v54 }
 0x2a4   : > { %v2050_v47 = vmax.f32 %v2018_v8, 0.0  ;;  %v1813_v27 = vadd.f32 %v1812_v57, %v9475_v3  ;;  %v3705_v29 = vpop.f32.mrf.mxu2  ;;  %v9002_v52 = vpop.f32.mrf.mxu0  ;;  %v3248_v41 = vsel %vm1292_vm0, %v2191_v60, %v5505_v32  ;;  %v9479_v3 = vld [vmem:[#allocation49_spill] sm:$0xff]  ;;  %v5880_v54 = vunpack.i.l.bf16 %v9005_v26 }
 0x2a5   : > { %v3967_v62 = vmax.f32 %v3935_v14, 0.0  ;;  %v3706_v0 = vadd.f32 %v3705_v29, %v3592_v31  ;;  %v9478_v31 = vld [vmem:[#allocation35_spill] sm:$0xff]  ;;  %v3280_v18 = vsel %vm1325_vm2, %v3248_v41, %v5865_v36  ;;  %v5506_v29 = vunpack.i.h.bf16 %v9477_v13 }
 0x2a6   : > { %2082 = vst.msk [vmem:[%s8253_s30 + $0xa0] sm:$0xff] %vm1292_vm0, %v2050_v47  ;;  %v2133_v5 = vsel %vm1292_vm0, %v2050_v47, 0.0  ;;  %v1926_v61 = vadd.f32 %v9476_v7, %v1813_v27  ;;  %3642 = vmatmul.f32.gmra.mxu3 %v3311_v11  ;;  %v3312_v14 = vsel %vm1358_vm1, %v3280_v18, %v5870_v24  ;;  %v2192_v7 = vld [vmem:[%s6095_s9 + $0x158] sm:$0xff]  ;;  %v5881_v13 = vunpack.i.h.bf16 %v9005_v26  ;;  %v5927_v36 = vld [vmem:[%s6095_s9 + $0x18a] sm:$0xff] }
 0x2a7   : > { %v2134_v50 = vadd.f32 %v2133_v5, %v2132_v34  ;;  %4838 = vst.msk [vmem:[%s8253_s30 + $0x148] sm:$0xff] %vm1292_vm0, %v3967_v62  ;;  %v4040_v44 = vsel %vm1292_vm0, %v3967_v62, 0.0  ;;  %v3819_v46 = vadd.f32 %v8860_v59, %v3706_v0  ;;  %4825 = vmatmul.msk.f32.gmra.mxu0 %vm1292_vm0, %v4757_v28  ;;  %v9022_v47 = vpop.permute.xlu1 %5888  ;;  %v5885_v32 = vunpack.i.l.bf16 %v5884_v10  ;;  %v2193_v18 = vld [vmem:[%s6095_s9 + $0x168] sm:$0xff] }
 0x2a8   : > { %v4041_v21 = vadd.f32 %v4040_v44, %v4039_v63  ;;  %v1983_v58 = vmul.f32 %v8743_v48, %v1926_v61  ;;  %v3344_v63 = vsel %vm1292_vm0, %v5926_v4, %v5875_v9  ;;  %v3249_v26 = vsel %vm1292_vm0, %v2192_v7, %v5506_v29 }
 0x2a9   : > { %v3899_v34 = vmul.f32 %v8610_v30, %v3819_v46  ;;  %3755 = vmatmul.f32.gmra.mxu2 %v3407_v15  ;;  %v3595_v59 = vpop.f32.mrf.mxu3  ;;  %v3376_v57 = vsel %vm1325_vm2, %v3344_v63, %v5866_v51  ;;  %v5886_v24 = vunpack.i.h.bf16 %v5884_v10  ;;  %v3281_v63 = vsel %vm1325_vm2, %v3249_v26, %v5880_v54  ;;  %v5928_v54 = vld [vmem:[%s6095_s9 + $0x19a] sm:$0xff]  ;;  %v2194_v26 = vld [vmem:[%s6095_s9 + $0x170] sm:$0xff] }
 0x2aa   : > { %v2019_v49 = vadd.f32 %v8759_v2, %v1983_v58  ;;  %v3408_v5 = vsel %vm1358_vm1, %v3376_v57, %v5871_v35  ;;  %v9480_v58 = vld [vmem:[#allocation38_spill] sm:$0xff]  ;;  %v2929_v35 = vpop.permute.xlu0 %2928 }
 0x2ab   : > { %v3936_v37 = vadd.f32 %v8628_v53, %v3899_v34  ;;  %v1815_v12 = vpop.f32.mrf.mxu1  ;;  %v5510_v15 = vunpack.i.l.bf16 %v9480_v58 }
 0x2ac   : > { %v2051_v45 = vmax.f32 %v2019_v49, 0.0  ;;  %v1816_v25 = vadd.f32 %v1815_v12, %v9478_v31  ;;  %v3708_v8 = vpop.f32.mrf.mxu2  ;;  %v9037_v61 = vpop.f32.mrf.mxu0  ;;  %v3313_v12 = vsel %vm1358_vm1, %v3281_v63, %v5885_v32  ;;  %v5929_v63 = vld [vmem:[%s6095_s9 + $0x1a2] sm:$0xff] }
 0x2ad   : > { %v3968_v23 = vmax.f32 %v3936_v37, 0.0  ;;  %v3709_v39 = vadd.f32 %v3708_v8, %v3595_v59  ;;  %v9481_v59 = vld [vmem:[#allocation37_spill] sm:$0xff] }
 0x2ae   : > { %2083 = vst.msk [vmem:[%s8253_s30 + $0xa8] sm:$0xff] %vm1292_vm0, %v2051_v45  ;;  %v2135_v42 = vsel %vm1292_vm0, %v2051_v45, 0.0  ;;  %v1929_v27 = vadd.f32 %v9479_v3, %v1816_v25  ;;  %3645 = vmatmul.f32.gmra.mxu3 %v3312_v14  ;;  %v5890_v45 = vunpack.i.l.bf16 %v9022_v47  ;;  %v9482_v25 = vld [vmem:[#allocation51_spill] sm:$0xff] }
 0x2af   : > { %v2136_v62 = vadd.f32 %v2135_v42, %v2134_v50  ;;  %4839 = vst.msk [vmem:[%s8253_s30 + $0x150] sm:$0xff] %vm1292_vm0, %v3968_v23  ;;  %v4042_v0 = vsel %vm1292_vm0, %v3968_v23, 0.0  ;;  %v3822_v11 = vadd.f32 %v8897_v56, %v3709_v39  ;;  %v9040_v50 = vpop.permute.xlu2 %5893  ;;  %v2675_v14 = vpop.permute.xlu1 %2674 }
 0x2b0   : > { %v4043_v38 = vadd.f32 %v4042_v0, %v4041_v21  ;;  %v1984_v9 = vmul.f32 %v8743_v48, %v1929_v27  ;;  %v3345_v21 = vsel %vm1292_vm0, %v5927_v36, %v5876_v40  ;;  %v5891_v27 = vunpack.i.h.bf16 %v9022_v47 }
 0x2b1   : > { %v3900_v44 = vmul.f32 %v8610_v30, %v3822_v11  ;;  %3758 = vmatmul.f32.gmra.mxu2 %v3408_v5  ;;  %v3598_v46 = vpop.f32.mrf.mxu3  ;;  %v3377_v41 = vsel %vm1325_vm2, %v3345_v21, %v5881_v13  ;;  %v5895_v29 = vunpack.i.l.bf16 %v9040_v50  ;;  %v3250_v11 = vsel %vm1292_vm0, %v2193_v18, %v5510_v15 }
 0x2b2   : > { %v2020_v56 = vadd.f32 %v8759_v2, %v1984_v9  ;;  %v3409_v42 = vsel %vm1358_vm1, %v3377_v41, %v5886_v24  ;;  %v3282_v9 = vsel %vm1325_vm2, %v3250_v11, %v5890_v45  ;;  %v5511_v13 = vunpack.i.h.bf16 %v9480_v58 }
 0x2b3   : > { %v3937_v60 = vadd.f32 %v8628_v53, %v3900_v44  ;;  %v1818_v51 = vpop.f32.mrf.mxu1  ;;  %v9483_v44 = vld [vmem:[#allocation39_spill] sm:$0xff]  ;;  %v3314_v15 = vsel %vm1358_vm1, %v3282_v9, %v5895_v29 }
 0x2b4   : > { %v2052_v34 = vmax.f32 %v2020_v56, 0.0  ;;  %v1819_v49 = vadd.f32 %v1818_v51, %v9481_v59  ;;  %v3711_v4 = vpop.f32.mrf.mxu2  ;;  %v9065_v3 = vpop.f32.mrf.mxu0 }
 0x2b5   : > { %v3969_v28 = vmax.f32 %v3937_v60, 0.0  ;;  %v3712_v37 = vadd.f32 %v3711_v4, %v3598_v46  ;;  %v2931_v51 = vpop.permute.xlu0 %2930 }
 0x2b6   : > { %2084 = vst.msk [vmem:[%s8253_s30 + $0xb0] sm:$0xff] %vm1292_vm0, %v2052_v34  ;;  %v2137_v31 = vsel %vm1292_vm0, %v2052_v34, 0.0  ;;  %v1932_v8 = vadd.f32 %v9482_v25, %v1819_v49  ;;  %3648 = vmatmul.f32.gmra.mxu3 %v3313_v12  ;;  %v3251_v12 = vsel %vm1292_vm0, %v2194_v26, %v5511_v13  ;;  %v9108_v25 = vld [vmem:[%s9346_s3 + $0x1] ss:$0 sm:$0xff] }
 0x2b7   : > { %v2138_v10 = vadd.f32 %v2137_v31, %v2136_v62  ;;  %4840 = vst.msk [vmem:[%s8253_s30 + $0x158] sm:$0xff] %vm1292_vm0, %v3969_v28  ;;  %v4044_v23 = vsel %vm1292_vm0, %v3969_v28, 0.0  ;;  %v3825_v39 = vadd.f32 %v8930_v17, %v3712_v37  ;;  %v2803_v5 = vpop.permute.xlu2 %2802  ;;  %v3347_v28 = vsel %vm1292_vm0, %v5929_v63, %v2931_v51  ;;  %v3059_v37 = vpop.permute.xlu1 %3058 }
 0x2b8   : > { %v4045_v57 = vadd.f32 %v4044_v23, %v4043_v38  ;;  %v1985_v40 = vmul.f32 %v8743_v48, %v1932_v8  ;;  %v3346_v38 = vsel %vm1292_vm0, %v5928_v54, %v2929_v35  ;;  %v3283_v35 = vsel %vm1325_vm2, %v3251_v12, %v2675_v14 }
 0x2b9   : > { %v3901_v62 = vmul.f32 %v8610_v30, %v3825_v39  ;;  %3761 = vmatmul.f32.gmra.mxu2 %v3409_v42  ;;  %v3601_v0 = vpop.f32.mrf.mxu3  ;;  %v5896_v30 = vunpack.i.h.bf16 %v9040_v50  ;;  %v3378_v60 = vsel %vm1325_vm2, %v3346_v38, %v5891_v27  ;;  %v3315_v29 = vsel %vm1358_vm1, %v3283_v35, %v2803_v5 }
 0x2ba   : > { %v2021_v17 = vadd.f32 %v8759_v2, %v1985_v40 }
 0x2bb   : > { %v3938_v47 = vadd.f32 %v8628_v53, %v3901_v62  ;;  %v1821_v7 = vpop.f32.mrf.mxu1  ;;  %v3410_v4 = vsel %vm1358_vm1, %v3378_v60, %v5896_v30 }
 0x2bc   : > { %v2053_v32 = vmax.f32 %v2021_v17, 0.0  ;;  %v1822_v46 = vadd.f32 %v1821_v7, %v9483_v44  ;;  %v3714_v56 = vpop.f32.mrf.mxu2  ;;  %v9103_v31 = vpop.f32.mrf.mxu0 }
 0x2bd   : > { %v3970_v36 = vmax.f32 %v3938_v47, 0.0  ;;  %v3715_v21 = vadd.f32 %v3714_v56, %v3601_v0 }
 0x2be   : > { %2085 = vst.msk [vmem:[%s8253_s30 + $0xb8] sm:$0xff] %vm1292_vm0, %v2053_v32  ;;  %v2139_v53 = vsel %vm1292_vm0, %v2053_v32, 0.0  ;;  %v1935_v58 = vadd.f32 %v8228_v33, %v1822_v46  ;;  %3651 = vmatmul.f32.gmra.mxu3 %v3314_v15  ;;  %v9098_v33 = vld [vmem:[%s9345_s2 + $0x1] ss:$0 sm:$0xff]  ;;  %v4758_v32 = vld [vmem:[%s6095_s9 + $0x1d4] sm:$0xff]  ;;  %v9485_v46 = vld [vmem:[#allocation42_spill] sm:$0xff] }
 0x2bf   : > { %v2140_v50 = vadd.f32 %v2139_v53, %v2138_v10  ;;  %4841 = vst.msk [vmem:[%s8253_s30 + $0x160] sm:$0xff] %vm1292_vm0, %v3970_v36  ;;  %v4046_v24 = vsel %vm1292_vm0, %v3970_v36, 0.0  ;;  %v3828_v34 = vadd.f32 %v8967_v6, %v3715_v21  ;;  %v3379_v10 = vsel %vm1325_vm2, %v3347_v28, %v3059_v37  ;;  %v3187_v23 = vpop.permute.xlu2 %3186  ;;  %v9486_v28 = vld [vmem:[#allocation43_spill] sm:$0xff] }
 0x2c0   : > { %v4047_v59 = vadd.f32 %v4046_v24, %v4045_v57  ;;  %v1986_v49 = vmul.f32 %v8743_v48, %v1935_v58  ;;  %v9484_v57 = vld [vmem:[#allocation40_spill] sm:$0xff]  ;;  %v3411_v11 = vsel %vm1358_vm1, %v3379_v10, %v3187_v23 }
 0x2c1   : > { %v3902_v41 = vmul.f32 %v9098_v33, %v3828_v34  ;;  %3764 = vmatmul.f32.gmra.mxu2 %v3410_v4  ;;  %v3604_v6 = vpop.f32.mrf.mxu3 }
 0x2c2   : > { %v2022_v45 = vadd.f32 %v8759_v2, %v1986_v49 }
 0x2c3   : > { %v3939_v8 = vadd.f32 %v9108_v25, %v3902_v41  ;;  %v1824_v18 = vpop.f32.mrf.mxu1 }
 0x2c4   : > { %v2054_v39 = vmax.f32 %v2022_v45, 0.0  ;;  %v1825_v40 = vadd.f32 %v1824_v18, %v9484_v57  ;;  %v3717_v14 = vpop.f32.mrf.mxu2 }
 0x2c5   : > { %v3971_v42 = vmax.f32 %v3939_v8, 0.0  ;;  %v3718_v27 = vadd.f32 %v3717_v14, %v3604_v6 }
 0x2c6   : > { %2086 = vst.msk [vmem:[%s8253_s30 + $0xc0] sm:$0xff] %vm1292_vm0, %v2054_v39  ;;  %v2141_v62 = vsel %vm1292_vm0, %v2054_v39, 0.0  ;;  %v1938_v0 = vadd.f32 %v8277_v55, %v1825_v40  ;;  %3654 = vmatmul.f32.gmra.mxu3 %v3315_v29  ;;  %v9487_v29 = vld [vmem:[#allocation45_spill] sm:$0xff] }
 0x2c7   : > { %v2142_v17 = vadd.f32 %v2141_v62, %v2140_v50  ;;  %4842 = vst.msk [vmem:[%s8253_s30 + $0x168] sm:$0xff] %vm1292_vm0, %v3971_v42  ;;  %v4048_v54 = vsel %vm1292_vm0, %v3971_v42, 0.0  ;;  %v3831_v38 = vadd.f32 %v9002_v52, %v3718_v27  ;;  %v9129_v52 = vpop.f32.mrf.mxu0 }
 0x2c8   : > { %v4049_v9 = vadd.f32 %v4048_v54, %v4047_v59  ;;  %v1987_v5 = vmul.f32 %v8743_v48, %v1938_v0 }
 0x2c9   : > { %v3903_v47 = vmul.f32 %v9098_v33, %v3831_v38  ;;  %3767 = vmatmul.f32.gmra.mxu2 %v3411_v11  ;;  %v3607_v7 = vpop.f32.mrf.mxu3 }
 0x2ca   : > { %v2023_v55 = vadd.f32 %v8759_v2, %v1987_v5 }
 0x2cb   : > { %v3940_v13 = vadd.f32 %v9108_v25, %v3903_v47  ;;  %v1827_v30 = vpop.f32.mrf.mxu1 }
 0x2cc   : > { %v2055_v44 = vmax.f32 %v2023_v55, 0.0  ;;  %v1828_v56 = vadd.f32 %v1827_v30, %v9485_v46  ;;  %v3720_v36 = vpop.f32.mrf.mxu2 }
 0x2cd   : > { %v3972_v21 = vmax.f32 %v3940_v13, 0.0  ;;  %v3721_v15 = vadd.f32 %v3720_v36, %v3607_v7 }
 0x2ce   : > { %2087 = vst.msk [vmem:[%s8253_s30 + $0xc8] sm:$0xff] %vm1292_vm0, %v2055_v44  ;;  %v2143_v60 = vsel %vm1292_vm0, %v2055_v44, 0.0  ;;  %v1941_v51 = vadd.f32 %v8320_v20, %v1828_v56  ;;  %4826 = vmatmul.msk.f32.vlgmr.msra.gmra.mxu3 %vm1292_vm0, %v4758_v32  ;;  %v9488_v56 = vld [vmem:[#allocation46_spill] sm:$0xff] }
 0x2cf   : > { %v2144_v26 = vadd.f32 %v2143_v60, %v2142_v17  ;;  %4843 = vst.msk [vmem:[%s8253_s30 + $0x170] sm:$0xff] %vm1292_vm0, %v3972_v21  ;;  %v4050_v53 = vsel %vm1292_vm0, %v3972_v21, 0.0  ;;  %v3834_v58 = vadd.f32 %v9037_v61, %v3721_v15  ;;  %v9149_v45 = vpop.f32.mrf.mxu0 }
 0x2d0   : > { %v4051_v50 = vadd.f32 %v4050_v53, %v4049_v9  ;;  %v1988_v24 = vmul.f32 %v8743_v48, %v1941_v51 }
 0x2d1   : > { %v3904_v34 = vmul.f32 %v9098_v33, %v3834_v58  ;;  %v3610_v59 = vpop.f32.mrf.mxu3 }
 0x2d2   : > { %v2024_v49 = vadd.f32 %v8759_v2, %v1988_v24 }
 0x2d3   : > { %v3941_v20 = vadd.f32 %v9108_v25, %v3904_v34  ;;  %v1830_v4 = vpop.f32.mrf.mxu1 }
 0x2d4   : > { %v2056_v63 = vmax.f32 %v2024_v49, 0.0  ;;  %v1831_v37 = vadd.f32 %v1830_v4, %v9486_v28  ;;  %v3723_v12 = vpop.f32.mrf.mxu2  ;;  %v9489_v28 = vld [vmem:[#allocation48_spill] sm:$0xff] }
 0x2d5   : > { %v3973_v41 = vmax.f32 %v3941_v20, 0.0  ;;  %v3724_v6 = vadd.f32 %v3723_v12, %v3610_v59 }
 0x2d6   : > { %2088 = vst.msk [vmem:[%s8253_s30 + $0xd0] sm:$0xff] %vm1292_vm0, %v2056_v63  ;;  %v2145_v61 = vsel %vm1292_vm0, %v2056_v63, 0.0  ;;  %v1944_v35 = vadd.f32 %v8368_v19, %v1831_v37 }
 0x2d7   : > { %v2146_v8 = vadd.f32 %v2145_v61, %v2144_v26  ;;  %4844 = vst.msk [vmem:[%s8253_s30 + $0x178] sm:$0xff] %vm1292_vm0, %v3973_v41  ;;  %v4052_v18 = vsel %vm1292_vm0, %v3973_v41, 0.0  ;;  %v3837_v10 = vadd.f32 %v9065_v3, %v3724_v6  ;;  %v3848_v55 = vpop.f32.mrf.mxu0 }
 0x2d8   : > { %v4053_v23 = vadd.f32 %v4052_v18, %v4051_v50  ;;  %v1989_v39 = vmul.f32 %v8743_v48, %v1944_v35 }
 0x2d9   : > { %v3905_v57 = vmul.f32 %v9098_v33, %v3837_v10  ;;  %v3613_v40 = vpop.f32.mrf.mxu3  ;;  %v5932_v10 = vld [vmem:[%s9345_s2] ss:$0 sm:$0xff] }
 0x2da   : > { %v2025_v14 = vadd.f32 %v8759_v2, %v1989_v39 }
 0x2db   : > { %v3942_v19 = vadd.f32 %v9108_v25, %v3905_v57  ;;  %v1833_v42 = vpop.f32.mrf.mxu1 }
 0x2dc   : > { %v2057_v27 = vmax.f32 %v2025_v14, 0.0  ;;  %v1834_v62 = vadd.f32 %v1833_v42, %v9487_v29  ;;  %v3726_v0 = vpop.f32.mrf.mxu2  ;;  %v9490_v42 = vld [vmem:[#allocation50_spill] sm:$0xff] }
 0x2dd   : > { %v3974_v11 = vmax.f32 %v3942_v19, 0.0  ;;  %v3727_v17 = vadd.f32 %v3726_v0, %v3613_v40 }
 0x2de   : > { %2089 = vst.msk [vmem:[%s8253_s30 + $0xd8] sm:$0xff] %vm1292_vm0, %v2057_v27  ;;  %v2147_v3 = vsel %vm1292_vm0, %v2057_v27, 0.0  ;;  %v1947_v54 = vadd.f32 %v8415_v22, %v1834_v62 }
 0x2df   : > { %v2148_v38 = vadd.f32 %v2147_v3, %v2146_v8  ;;  %4845 = vst.msk [vmem:[%s8253_s30 + $0x180] sm:$0xff] %vm1292_vm0, %v3974_v11  ;;  %v4054_v9 = vsel %vm1292_vm0, %v3974_v11, 0.0  ;;  %v3840_v5 = vadd.f32 %v9103_v31, %v3727_v17  ;;  %v3851_v20 = vpop.f32.mrf.mxu0 }
 0x2e0   : > { %v4055_v47 = vadd.f32 %v4054_v9, %v4053_v23  ;;  %v1990_v7 = vmul.f32 %v8743_v48, %v1947_v54 }
 0x2e1   : > { %v3906_v13 = vmul.f32 %v9098_v33, %v3840_v5  ;;  %v3616_v30 = vpop.f32.mrf.mxu3 }
 0x2e2   : > { %v2026_v32 = vadd.f32 %v8759_v2, %v1990_v7  ;;  %v5933_v7 = vld [vmem:[%s9346_s3] ss:$0 sm:$0xff] }
 0x2e3   : > { %v3943_v22 = vadd.f32 %v9108_v25, %v3906_v13  ;;  %v1836_v44 = vpop.f32.mrf.mxu1 }
 0x2e4   : > { %v2058_v46 = vmax.f32 %v2026_v32, 0.0  ;;  %v1837_v36 = vadd.f32 %v1836_v44, %v9488_v56  ;;  %v3729_v21 = vpop.f32.mrf.mxu2 }
 0x2e5   : > { %v3975_v15 = vmax.f32 %v3943_v22, 0.0  ;;  %v3730_v60 = vadd.f32 %v3729_v21, %v3616_v30 }
 0x2e6   : > { %2090 = vst.msk [vmem:[%s8253_s30 + $0xe0] sm:$0xff] %vm1292_vm0, %v2058_v46  ;;  %v2149_v31 = vsel %vm1292_vm0, %v2058_v46, 0.0  ;;  %v1950_v51 = vadd.f32 %v8460_v43, %v1837_v36 }
 0x2e7   : > { %v2150_v26 = vadd.f32 %v2149_v31, %v2148_v38  ;;  %4846 = vst.msk [vmem:[%s8253_s30 + $0x188] sm:$0xff] %vm1292_vm0, %v3975_v15  ;;  %v4056_v53 = vsel %vm1292_vm0, %v3975_v15, 0.0  ;;  %v3843_v58 = vadd.f32 %v9129_v52, %v3730_v60 }
 0x2e8   : > { %v4057_v50 = vadd.f32 %v4056_v53, %v4055_v47  ;;  %v1991_v24 = vmul.f32 %v8743_v48, %v1950_v51 }
 0x2e9   : > { %v3907_v34 = vmul.f32 %v9098_v33, %v3843_v58  ;;  %v3619_v59 = vpop.f32.mrf.mxu3 }
 0x2ea   : > { %v2027_v49 = vadd.f32 %v8759_v2, %v1991_v24 }
 0x2eb   : > { %v3944_v43 = vadd.f32 %v9108_v25, %v3907_v34  ;;  %v1839_v4 = vpop.f32.mrf.mxu1 }
 0x2ec   : > { %v2059_v63 = vmax.f32 %v2027_v49, 0.0  ;;  %v1840_v37 = vadd.f32 %v1839_v4, %v9489_v28  ;;  %v3732_v12 = vpop.f32.mrf.mxu2 }
 0x2ed   : > { %v3976_v41 = vmax.f32 %v3944_v43, 0.0  ;;  %v3733_v6 = vadd.f32 %v3732_v12, %v3619_v59 }
 0x2ee   : > { %2091 = vst.msk [vmem:[%s8253_s30 + $0xe8] sm:$0xff] %vm1292_vm0, %v2059_v63  ;;  %v2151_v48 = vsel %vm1292_vm0, %v2059_v63, 0.0  ;;  %v1953_v52 = vadd.f32 %v8505_v1, %v1840_v37 }
 0x2ef   : > { %v2152_v61 = vadd.f32 %v2151_v48, %v2150_v26  ;;  %4847 = vst.msk [vmem:[%s8253_s30 + $0x190] sm:$0xff] %vm1292_vm0, %v3976_v41  ;;  %v4058_v35 = vsel %vm1292_vm0, %v3976_v41, 0.0  ;;  %v3846_v8 = vadd.f32 %v9149_v45, %v3733_v6  ;;  %v3854_v45 = vpop.f32.mrf.mxu0 }
 0x2f0   : > { %v4059_v18 = vadd.f32 %v4058_v35, %v4057_v50  ;;  %v1992_v23 = vmul.f32 %v5932_v10, %v1953_v52 }
 0x2f1   : > { %v3908_v39 = vmul.f32 %v9098_v33, %v3846_v8  ;;  %v3622_v57 = vpop.f32.mrf.mxu3 }
 0x2f2   : > { %v2028_v1 = vadd.f32 %v8759_v2, %v1992_v23 }
 0x2f3   : > { %v3945_v40 = vadd.f32 %v9108_v25, %v3908_v39  ;;  %v1842_v14 = vpop.f32.mrf.mxu1 }
 0x2f4   : > { %v2060_v19 = vmax.f32 %v2028_v1, 0.0  ;;  %v1843_v27 = vadd.f32 %v1842_v14, %v9490_v42  ;;  %v3735_v29 = vpop.f32.mrf.mxu2 }
 0x2f5   : > { %v3977_v62 = vmax.f32 %v3945_v40, 0.0  ;;  %v3736_v0 = vadd.f32 %v3735_v29, %v3622_v57 }
 0x2f6   : > { %2092 = vst.msk [vmem:[%s8253_s30 + $0xf0] sm:$0xff] %vm1292_vm0, %v2060_v19  ;;  %v2153_v11 = vsel %vm1292_vm0, %v2060_v19, 0.0  ;;  %v1956_v17 = vadd.f32 %v8549_v16, %v1843_v27 }
 0x2f7   : > { %v2154_v3 = vadd.f32 %v2153_v11, %v2152_v61  ;;  %4848 = vst.msk [vmem:[%s8253_s30 + $0x198] sm:$0xff] %vm1292_vm0, %v3977_v62  ;;  %v4060_v2 = vsel %vm1292_vm0, %v3977_v62, 0.0  ;;  %v3849_v54 = vadd.f32 %v3848_v55, %v3736_v0  ;;  %v3857_v46 = vpop.f32.mrf.mxu0 }
 0x2f8   : > { %v4061_v38 = vadd.f32 %v4060_v2, %v4059_v18  ;;  %v1993_v9 = vmul.f32 %v5932_v10, %v1956_v17 }
 0x2f9   : > { %v3909_v5 = vmul.f32 %v9098_v33, %v3849_v54  ;;  %v3625_v47 = vpop.f32.mrf.mxu3 }
 0x2fa   : > { %v2029_v13 = vadd.f32 %v5933_v7, %v1993_v9 }
 0x2fb   : > { %v3946_v16 = vadd.f32 %v9108_v25, %v3909_v5 }
 0x2fc   : > { %v2061_v30 = vmax.f32 %v2029_v13, 0.0  ;;  %v3738_v32 = vpop.f32.mrf.mxu2 }
 0x2fd   : > { %v3978_v22 = vmax.f32 %v3946_v16, 0.0  ;;  %v3739_v44 = vadd.f32 %v3738_v32, %v3625_v47 }
 0x2fe   : > { %2093 = vst.msk [vmem:[%s8253_s30 + $0xf8] sm:$0xff] %vm1292_vm0, %v2061_v30  ;;  %v2155_v55 = vsel %vm1292_vm0, %v2061_v30, 0.0 }
 0x2ff   : > { %v9216_v56 = vadd.f32 %v2155_v55, %v2154_v3  ;;  %4849 = vst.msk [vmem:[%s8253_s30 + $0x1a0] sm:$0xff] %vm1292_vm0, %v3978_v22  ;;  %v4062_v36 = vsel %vm1292_vm0, %v3978_v22, 0.0  ;;  %v3852_v21 = vadd.f32 %v3851_v20, %v3739_v44  ;;  %v3860_v59 = vpop.f32.mrf.mxu0 }
 0x300   : > { %v4063_v15 = vadd.f32 %v4062_v36, %v4061_v38 }
 0x301   : > { %v3910_v60 = vmul.f32 %v9098_v33, %v3852_v21  ;;  %v3628_v31 = vpop.f32.mrf.mxu3 }
 0x303   : > { %v3947_v51 = vadd.f32 %v9108_v25, %v3910_v60 }
 0x304   : > { %v3741_v26 = vpop.f32.mrf.mxu2 }
 0x305   : > { %v3979_v53 = vmax.f32 %v3947_v51, 0.0  ;;  %v3742_v58 = vadd.f32 %v3741_v26, %v3628_v31 }
 0x307   : > { %4850 = vst.msk [vmem:[%s8253_s30 + $0x1a8] sm:$0xff] %vm1292_vm0, %v3979_v53  ;;  %v4064_v50 = vsel %vm1292_vm0, %v3979_v53, 0.0  ;;  %v3855_v24 = vadd.f32 %v3854_v45, %v3742_v58  ;;  %v3863_v6 = vpop.f32.mrf.mxu0 }
 0x308   : > { %v9226_v34 = vadd.f32 %v4064_v50, %v4063_v15 }
 0x309   : > { %v3911_v49 = vmul.f32 %v9098_v33, %v3855_v24  ;;  %v3631_v20 = vpop.f32.mrf.mxu3 }
 0x30b   : > { %v9230_v43 = vadd.f32 %v9108_v25, %v3911_v49 }
 0x30c   : > { %v3744_v4 = vpop.f32.mrf.mxu2 }
 0x30d   : > { %v3980_v63 = vmax.f32 %v9230_v43, 0.0  ;;  %v3745_v28 = vadd.f32 %v3744_v4, %v3631_v20 }
 0x30f   : > { %4851 = vst.msk [vmem:[%s8253_s30 + $0x1b0] sm:$0xff] %vm1292_vm0, %v3980_v63  ;;  %v3858_v37 = vadd.f32 %v3857_v46, %v3745_v28  ;;  %v3866_v57 = vpop.f32.mrf.mxu0  ;;  %v4066_v20 = vsel %vm1292_vm0, %v3980_v63, 0.0 }
 0x311   : > { %v3912_v12 = vmul.f32 %v9098_v33, %v3858_v37  ;;  %v3634_v41 = vpop.f32.mrf.mxu3  ;;  %v4067_v37 = vadd.f32 %v4066_v20, %v9226_v34 }
 0x313   : > { %v3949_v48 = vadd.f32 %v9108_v25, %v3912_v12 }
 0x314   : > { %v3747_v52 = vpop.f32.mrf.mxu2 }
 0x315   : > { %v3981_v61 = vmax.f32 %v3949_v48, 0.0  ;;  %v3748_v35 = vadd.f32 %v3747_v52, %v3634_v41 }
 0x317   : > { %4852 = vst.msk [vmem:[%s8253_s30 + $0x1b8] sm:$0xff] %vm1292_vm0, %v3981_v61  ;;  %v3861_v8 = vadd.f32 %v3860_v59, %v3748_v35  ;;  %v3869_v0 = vpop.f32.mrf.mxu0  ;;  %v4068_v28 = vsel %vm1292_vm0, %v3981_v61, 0.0 }
 0x318   : > { %v4069_v48 = vadd.f32 %v4068_v28, %v4067_v37 }
 0x319   : > { %v3913_v18 = vmul.f32 %v9098_v33, %v3861_v8  ;;  %v3637_v10 = vpop.f32.mrf.mxu3 }
 0x31b   : > { %v3950_v23 = vadd.f32 %v9108_v25, %v3913_v18 }
 0x31c   : > { %v3750_v39 = vpop.f32.mrf.mxu2 }
 0x31d   : > { %v3982_v1 = vmax.f32 %v3950_v23, 0.0  ;;  %v3751_v40 = vadd.f32 %v3750_v39, %v3637_v10 }
 0x31f   : > { %4853 = vst.msk [vmem:[%s8253_s30 + $0x1c0] sm:$0xff] %vm1292_vm0, %v3982_v1  ;;  %v3864_v14 = vadd.f32 %v3863_v6, %v3751_v40  ;;  %v3872_v47 = vpop.f32.mrf.mxu0  ;;  %v4070_v6 = vsel %vm1292_vm0, %v3982_v1, 0.0  ;;  %v2157_v40 = vrot.slane %v9216_v56, 4 }
 0x320   : > { %v4071_v35 = vadd.f32 %v4070_v6, %v4069_v48 }
 0x321   : > { %v3914_v19 = vmul.f32 %v9098_v33, %v3864_v14  ;;  %v3640_v42 = vpop.f32.mrf.mxu3 }
 0x323   : > { %v3951_v27 = vadd.f32 %v9108_v25, %v3914_v19 }
 0x324   : > { %v3753_v29 = vpop.f32.mrf.mxu2 }
 0x325   : > { %v3983_v45 = vmax.f32 %v3951_v27, 0.0  ;;  %v3754_v62 = vadd.f32 %v3753_v29, %v3640_v42 }
 0x327   : > { %4854 = vst.msk [vmem:[%s8253_s30 + $0x1c8] sm:$0xff] %vm1292_vm0, %v3983_v45  ;;  %v3867_v11 = vadd.f32 %v3866_v57, %v3754_v62  ;;  %v3875_v36 = vpop.f32.mrf.mxu0  ;;  %v4072_v43 = vsel %vm1292_vm0, %v3983_v45, 0.0  ;;  %v2158_v62 = vadd.f32 %v2157_v40, %v9216_v56 }
 0x328   : > { %v4073_v10 = vadd.f32 %v4072_v43, %v4071_v35 }
 0x329   : > { %v3915_v17 = vmul.f32 %v9098_v33, %v3867_v11  ;;  %v3643_v3 = vpop.f32.mrf.mxu3 }
 0x32b   : > { %v3952_v2 = vadd.f32 %v9108_v25, %v3915_v17 }
 0x32c   : > { %v3756_v54 = vpop.f32.mrf.mxu2 }
 0x32d   : > { %v3984_v38 = vmax.f32 %v3952_v2, 0.0  ;;  %v3757_v9 = vadd.f32 %v3756_v54, %v3643_v3  ;;  %v2159_v2 = vrot.slane %v2158_v62, 2 }
 0x32f   : > { %4855 = vst.msk [vmem:[%s8253_s30 + $0x1d0] sm:$0xff] %vm1292_vm0, %v3984_v38  ;;  %v3870_v5 = vadd.f32 %v3869_v0, %v3757_v9  ;;  %v3878_v24 = vpop.f32.mrf.mxu0  ;;  %v4074_v18 = vsel %vm1292_vm0, %v3984_v38, 0.0  ;;  %v2160_v38 = vadd.f32 %v2159_v2, %v2158_v62 }
 0x330   : > { %v4075_v23 = vadd.f32 %v4074_v18, %v4073_v10 }
 0x331   : > { %v3916_v7 = vmul.f32 %v9098_v33, %v3870_v5  ;;  %v3646_v13 = vpop.f32.mrf.mxu3 }
 0x333   : > { %v3953_v16 = vadd.f32 %v9108_v25, %v3916_v7 }
 0x334   : > { %v3759_v30 = vpop.f32.mrf.mxu2 }
 0x335   : > { %v3985_v32 = vmax.f32 %v3953_v16, 0.0  ;;  %v3760_v22 = vadd.f32 %v3759_v30, %v3646_v13 }
 0x337   : > { %4856 = vst.msk [vmem:[%s8253_s30 + $0x1d8] sm:$0xff] %vm1292_vm0, %v3985_v32  ;;  %v3873_v44 = vadd.f32 %v3872_v47, %v3760_v22  ;;  %v4076_v34 = vsel %vm1292_vm0, %v3985_v32, 0.0  ;;  %v2161_v47 = vrot.slane %v2160_v38, 1 }
 0x338   : > { %v4077_v14 = vadd.f32 %v4076_v34, %v4075_v23 }
 0x339   : > { %v3917_v55 = vmul.f32 %v9098_v33, %v3873_v44  ;;  %v3649_v46 = vpop.f32.mrf.mxu3  ;;  %v2162_v56 = vadd.f32 %v2161_v47, %v2160_v38 }
 0x33b   : > { %v3954_v21 = vadd.f32 %v9108_v25, %v3917_v55 }
 0x33c   : > { %v3762_v15 = vpop.f32.mrf.mxu2 }
 0x33d   : > { %v3986_v60 = vmax.f32 %v3954_v21, 0.0  ;;  %v3763_v31 = vadd.f32 %v3762_v15, %v3649_v46 }
 0x33f   : > { %4857 = vst.msk [vmem:[%s8253_s30 + $0x1e0] sm:$0xff] %vm1292_vm0, %v3986_v60  ;;  %v3876_v51 = vadd.f32 %v3875_v36, %v3763_v31  ;;  %v4078_v57 = vsel %vm1292_vm0, %v3986_v60, 0.0 }
 0x340   : > { %v4079_v27 = vadd.f32 %v4078_v57, %v4077_v14 }
 0x341   : > { %v3918_v26 = vmul.f32 %v9098_v33, %v3876_v51  ;;  %v3652_v53 = vpop.f32.mrf.mxu3 }
 0x343   : > { %v3955_v58 = vadd.f32 %v9108_v25, %v3918_v26 }
 0x344   : > { %v3765_v50 = vpop.f32.mrf.mxu2 }
 0x345   : > { %v3987_v59 = vmax.f32 %v3955_v58, 0.0  ;;  %v3766_v49 = vadd.f32 %v3765_v50, %v3652_v53 }
 0x347   : > { %4858 = vst.msk [vmem:[%s8253_s30 + $0x1e8] sm:$0xff] %vm1292_vm0, %v3987_v59  ;;  %v3879_v4 = vadd.f32 %v3878_v24, %v3766_v49  ;;  %v4080_v19 = vsel %vm1292_vm0, %v3987_v59, 0.0 }
 0x348   : > { %v4081_v0 = vadd.f32 %v4080_v19, %v4079_v27 }
 0x349   : > { %v3919_v12 = vmul.f32 %v9098_v33, %v3879_v4  ;;  %v3655_v41 = vpop.f32.mrf.mxu3 }
 0x34b   : > { %v3956_v52 = vadd.f32 %v9108_v25, %v3919_v12 }
 0x34c   : > { %v3768_v8 = vpop.f32.mrf.mxu2 }
 0x34d   : > { %v3988_v63 = vmax.f32 %v3956_v52, 0.0  ;;  %v3769_v61 = vadd.f32 %v3768_v8, %v3655_v41 }
 0x34f   : > { %4859 = vst.msk [vmem:[%s8253_s30 + $0x1f0] sm:$0xff] %vm1292_vm0, %v3988_v63  ;;  %v4082_v29 = vsel %vm1292_vm0, %v3988_v63, 0.0 }
 0x350   : > { %v4083_v17 = vadd.f32 %v4082_v29, %v4081_v0 }
 0x351   : > { %v3881_v39 = vpop.f32.mrf.mxu3 }
 0x352   : > { %v3882_v1 = vadd.f32 %v3881_v39, %v3769_v61 }
 0x354   : > { %v3920_v42 = vmul.f32 %v9098_v33, %v3882_v1 }
 0x356   : > { %v3957_v45 = vadd.f32 %v9108_v25, %v3920_v42 }
 0x358   : > { %v3989_v11 = vmax.f32 %v3957_v45, 0.0 }
 0x35a   : > { %4860 = vst.msk [vmem:[%s8253_s30 + $0x1f8] sm:$0xff] %vm1292_vm0, %v3989_v11  ;;  %v4084_v3 = vsel %vm1292_vm0, %v3989_v11, 0.0 }
 0x35b   : > { %v4085_v54 = vadd.f32 %v4084_v3, %v4083_v17 }
 0x35d   : > { %v4086_v33 = vrot.slane %v4085_v54, 4 }
 0x35f   : > { %v4087_v9 = vadd.f32 %v4086_v33, %v4085_v54 }
 0x361   : > { %v4088_v5 = vrot.slane %v4087_v9, 2 }
 0x363   : > { %v4089_v25 = vadd.f32 %v4088_v5, %v4087_v9 }
 0x365   : > { %v4090_v7 = vrot.slane %v4089_v25, 1 }
 0x367   : > { %v4091_v13 = vadd.f32 %v4090_v7, %v4089_v25 }
 0x369   : > { %v4092_v16 = vadd.f32 %v4091_v13, %v2162_v56 }
 0x36b   : > { %4094 = vst.msk [vmem:[%s227_s12] sm:$0x1] %vm4093_vm3, %v4092_v16 }
 0x36c   : > { %s4866_s8 = sshll.u32 %s6063_s22, 8  ;;  %s4122_s13 = sshll.u32 %s8253_s30, 4  ;;  %s4123_s13 = int_to_ptr.vmem [resolvable:$true] %s4122_s13 }
 0x36d   : > { %s4111_s16 = scalar_lea.hbm %s9347_s4, %s4866_s8  ;;  %s6005_s25 = smov 4096  }
 0x36e   : > { %s4124_s23 = sshll.u32 %s4111_s16, 4  ;;  %4892 = sst [smem:[#allocation7]] (%p6080_p5), %s6005_s25  ;;  %s4125_s23 = int_to_ptr.hbm [resolvable:$true] %s4124_s23 }
 0x36f   : > { %s6006_s9 = smov 8192   ;;  %s6007_s26 = smov 32  }
 0x370   : > { %4893 = sst [smem:[#allocation7 + $0x1]] (%p6080_p5), %s6006_s9  ;;  %s6008_s10 = smov 128  }
 0x371   : > { %4894 = sst [smem:[#allocation7 + $0x2]] (%p6080_p5), %s6007_s26  ;;  %s6009_s30 = smov 8  }
 0x372   : > { %4895 = sst [smem:[#allocation7 + $0x3]] (%p6080_p5), %s6008_s10  ;;  %s6010_s11 = smov [#allocation6]  }
 0x373   : > { %4896 = sst [smem:[#allocation7 + $0x4]] (%p6080_p5), %s6008_s10  ;;  %s6011_s8 = smov 0  }
 0x374   : > { %4897 = sst [smem:[#allocation7 + $0x5]] (%p6080_p5), %s6009_s30  ;;  %s4149_s16 = scalar_lea.hbm %s9348_s5, %s6063_s22 }
 0x375   : > { %4898 = dma.general (%p6080_p5), %s4123_s13, 8192, %s4125_s23, %s4096_s6, %s6010_s11, [#allocation7], %s6011_s8, 0  }
 0x376   : > { %s4151_s25 = sshll.u32 %s227_s12, 4  ;;  %s4153_s9 = sshll.u32 %s4149_s16, 4  ;;  %s4152_s25 = int_to_ptr.vmem [resolvable:$true] %s4151_s25  ;;  %s4154_s9 = int_to_ptr.hbm [resolvable:$true] %s4153_s9 }
 0x377   : > { %s5948_s26 = sshra.s32 %s4154_s9, 4  ;;  %s5954_s6 = scalar_lea.hbm %s9348_s5, 2  ;;  %s5949_s26 = int_to_ptr.hbm [resolvable:$true] %s5948_s26 }
 0x378   : > { %s5950_s10 = scalar_lea.hbm %s5949_s26, 1  ;;  %p5955_p0 = scmp.lt.s32.totalorder %s5949_s26, %s9348_s5 }
 0x379   : > { %p5951_p11 = scmp.ne.s32.totalorder %s5949_s26, %s5950_s10  ;;  %p5956_p1 = scmp.lt.s32.totalorder %s5954_s6, %s5950_s10 }
 0x37b   : > { %p5952_p12 = pnand %p5951_p11, %p6080_p5  ;;  %p5957_p2 = por %p5956_p1, %p5955_p0 }
 0x37d   : > { %p5953_p13 = pneg %p5952_p12 }
 0x37f   : > { %p5958_p3 = pnand %p5957_p2, %p5953_p13 }
 0x381   : > { %5961 = shalt.err (!%p5958_p3)
}
 0x382   : > { %s9491_s22 = scalar_lea.sflag [#allocation5], %s8198_s17 }
 0x383   : > { %4899 = dma.vmem_to_hbm [thread:$0]  (%p6080_p5), %s4152_s25, 16, %s4154_s9, %s9491_s22  }
 0x384 PF: > { %p4909_p4 = scmp.ge.s32.totalorder %s6000_s21, 2  ;;  %s4165_s12 = sand.u32 1, %s5988_s18  }
 0x385   : > { %s4166_s7 = scalar_lea.sflag [#allocation3], %s4165_s12 }
 0x386   : > { %p4903_p7 = pnand %p4909_p4, %p6084_p6 }
 0x388   : > { %p4904_p8 = pneg %p4903_p7 }
 0x38a   : > { %5979 = dma.done.wait (%p4904_p8), %s4166_s7, 8192  }
 0x38b   : > { %5981 = vsyncadd (%p4904_p8), %s4166_s7, 4294959104  ;;  %s4176_s11 = scalar_lea.sflag [#allocation5], %s4165_s12 }
 0x38c   : > { %5983 = dma.done.wait (%p4904_p8), %s4176_s11, 16  }
 0x38d   : > { %5985 = vsyncadd (%p4904_p8), %s4176_s11, 4294967280  ;;  %p19_p5 = scmp.ge.s32.totalorder %s6067_s24, 4   ;;  %s9492_s18 = smov %s5992_s19 }
 0x38e   : > { %s9493_s19 = smov %s5996_s20  ;;  %s9494_s20 = smov %s6078_s27 }
 0x38f   : > { %s9495_s21 = smov %s6067_s24  ;;  %21 = sbr.rel (!%p19_p5) target bundleno = 5 (0x5), region = 101 }
 0x394   :  { %4181 = vsyncpa [#allocation3], 1 }
 0x395   :  { %4183 = vsyncpa [#allocation3 + $0x1], 1 }
 0x396   :  { %4184 = vsyncpa [#allocation5], 1 }
 0x397   :  { %4186 = vsyncpa [#allocation5 + $0x1], 1 }

</bundles_post_ra>
